<compile_context>
chip_gen: v7x
topology: tpu7x:2x2x1
jax: 0.10.0
libtpu: 0.0.40
codegen_flags: <defaults>
</compile_context>

<pallas_src>
import functools

import numpy as np
import jax
import jax.numpy as jnp
from jax.experimental import pallas as pl
from jax.experimental.pallas import tpu as pltpu

FPAD = 128                      # lane-padded feature/class width
N_ALIGN = 256                   # MXU-aligned node-count padding (mult. of 128)
_EPS = 1e-5
CLIP_LO = -1.0 + _EPS
CLIP_HI = 1.0 - _EPS
Z_CLIP = float(np.arctanh(1.0 - _EPS))   # arctanh(clamp(tanh(z))) == clip(z, +-Z_CLIP)
_NEG_BIG = -1e30                # mask value for padded class columns


# ----------------------------------------------------------------------------
# Fused 5-layer Bregman GCN kernel
# ----------------------------------------------------------------------------
def _gcnnet5_fused_kernel(x_ref, adj_hbm_ref, wrep0_ref, wrep4_ref, wg_ref,
                          bg_ref, out_ref, adj_vmem, adj_sem, *, num_classes):
    f32 = jnp.float32
    bf16 = jnp.bfloat16

    # Kick off the (N, N) bf16 adjacency HBM->VMEM DMA; it is hidden behind the
    # layer-0 feature matmuls below (the only work that does not need adj).
    adj_copy = pltpu.make_async_copy(adj_hbm_ref, adj_vmem, adj_sem)
    adj_copy.start()

    x_b = x_ref[...]                                 # (N, FPAD) bf16

    def arctanh_clamped(v):
        # arctanh(clamp(v, lo, hi)); approx EUP reciprocal (~2^-12 rel err on
        # 1 - v -> ~1e-4 abs err in the offset near the clamp boundary; within
        # tolerance of the bf16-matmul forward pass).
        v = jnp.clip(v, CLIP_LO, CLIP_HI)
        return 0.5 * jnp.log((1.0 + v) * pl.reciprocal(1.0 - v, approx=True))

    # ---- layer 0 feature matmuls (bf16 operands, f32 accumulate), adj in flight
    off0 = arctanh_clamped(
        jnp.dot(x_b, wrep0_ref[...], preferred_element_type=f32))
    xw0 = jnp.dot(x_b, wg_ref[0], preferred_element_type=f32).astype(bf16)

    adj_copy.wait()                                  # adj now resident in VMEM
    adj_b = adj_vmem[...]                            # (N, N) bf16, read once

    def gcn_conv(h_b, i):
        # GCNConv_i: A_hat @ (h @ W_i) + b_i ; bf16 MXU operands, f32 accumulate.
        xw = jnp.dot(h_b, wg_ref[i], preferred_element_type=f32).astype(bf16)
        return jnp.dot(adj_b, xw, preferred_element_type=f32) + bg_ref[i]

    # ---- layer 0: simplex-Linear reparametrization ----
    z = jnp.dot(adj_b, xw0, preferred_element_type=f32) + bg_ref[0] + off0
    h = jnp.tanh(z)

    # ---- layers 1..3: nn.Identity reparametrization ----
    # offset = arctanh(clamp(tanh(z))) == clip(z, +-Z_CLIP): carry z, skip the
    # x @ I matmul, the clamp+arctanh chain and the redundant tanh recompute.
    for i in range(1, 4):
        off = jnp.clip(z, -Z_CLIP, Z_CLIP)
        z = off + gcn_conv(h.astype(bf16), i)
        h = jnp.tanh(z)

    # ---- layer 4: simplex-Linear reparametrization ----
    h_b = h.astype(bf16)
    off = arctanh_clamped(
        jnp.dot(h_b, wrep4_ref[...], preferred_element_type=f32))
    z = off + gcn_conv(h_b, 4)
    h = jnp.tanh(z)

    # ---- log_softmax over the class axis (padded columns masked out) ----
    col = jax.lax.broadcasted_iota(jnp.int32, h.shape, 1)
    hm = jnp.where(col < num_classes, h, _NEG_BIG)
    m = jnp.max(hm, axis=1, keepdims=True)
    s = hm - m
    lse = jnp.log(jnp.sum(jnp.exp(s), axis=1, keepdims=True))
    out_ref[...] = s - lse                           # (N, FPAD), lane-dense store


def _vmem_limit_bytes(npad, fpad):
    """Scoped-VMEM request sized from the actual shapes, capped below physical
    capacity (128 MiB v5e/v6e, 64 MiB per TensorCore on v7x)."""
    need = (2 * npad * npad                     # adj bf16 VMEM scratch
            + 2 * npad * fpad * (2 + 4)         # x (bf16) in + out (f32), dbl-buffered
            + 10 * npad * fpad * 4              # z / h / off / xw f32 temporaries
            + (5 + 2) * fpad * fpad * 2         # wg + wrep0/4 (bf16)
            + 5 * fpad * 4)                     # biases
    need = int(need * 1.5) + (2 << 20)          # compiler scratch / regalloc headroom
    try:
        cap = pltpu.get_tpu_info().vmem_capacity_bytes
    except Exception:                           # conservative fallback (v7x per-TC)
        cap = 64 << 20
    return int(min(max(need, 32 << 20), cap - (8 << 20)))


def gcnnet5_pallas(x_pad, adj_pad, wrep0, wrep4, wg, bg, *, num_classes):
    n, fpad = x_pad.shape
    kern = functools.partial(_gcnnet5_fused_kernel, num_classes=num_classes)
    vmem = pl.BlockSpec(memory_space=pltpu.MemorySpace.VMEM)
    return pl.pallas_call(
        kern,
        out_shape=jax.ShapeDtypeStruct((n, fpad), jnp.float32),
        in_specs=[vmem,                               # x (bf16, whole array)
                  pl.BlockSpec(memory_space=pl.ANY),  # adj stays in HBM; manual DMA
                  vmem, vmem, vmem, vmem],
        out_specs=vmem,
        scratch_shapes=[pltpu.VMEM((n, n), jnp.bfloat16),   # adj landing buffer
                        pltpu.SemaphoreType.DMA],
        compiler_params=pltpu.CompilerParams(
            vmem_limit_bytes=_vmem_limit_bytes(n, fpad)),
    )(x_pad, adj_pad, wrep0, wrep4, wg, bg)


def _round_up(n, m):
    return ((n + m - 1) // m) * m


@functools.partial(jax.jit, static_argnames=("num_classes",))
def gcnnet5_forward(x, adj, wrep0, wrep4, wg, bg, *, num_classes):
    n, f = x.shape
    npad = _round_up(max(n, N_ALIGN), N_ALIGN)
    # Lane-pad features to 128 and row-pad nodes to an MXU-aligned count; padded
    # adj rows/cols are zero so padded nodes never influence real rows.
    x_pad = jnp.pad(x, ((0, npad - n), (0, FPAD - f))).astype(jnp.bfloat16)
    adj_pad = jnp.pad(adj, ((0, npad - n), (0, npad - n))).astype(jnp.bfloat16)
    out_pad = gcnnet5_pallas(x_pad, adj_pad, wrep0, wrep4, wg, bg,
                             num_classes=num_classes)
    return out_pad[:n, :num_classes]


# ----------------------------------------------------------------------------
# Plain-JAX / numpy glue: parameters, simplex projection, GCN normalization
# ----------------------------------------------------------------------------
def projection_simplex(v, radius=1.0):
    """Exact effective semantics of the reference torch code.

    With ascending sort, its condition `u - cssv/ind > 0` is always true, so
    rho == n_feat and theta == (rowsum(v) - radius) / n_feat.
    """
    n_feat = v.shape[1]
    theta = (v.sum(axis=1, keepdims=True) - radius) / float(n_feat)
    return np.maximum(v - theta, 0.0)


def gcn_norm_dense(edge_index, num_nodes):
    """Dense D^-1/2 (A + I) D^-1/2 with A[dst, src] = 1 per edge src->dst."""
    src, dst = edge_index
    a = np.zeros((num_nodes, num_nodes), dtype=np.float32)
    a[dst, src] = 1.0
    a = a + np.eye(num_nodes, dtype=np.float32)      # add self loops
    deg = a.sum(axis=1)
    d_inv_sqrt = np.where(deg > 0, 1.0 / np.sqrt(deg), 0.0).astype(np.float32)
    return (d_inv_sqrt[:, None] * a) * d_inv_sqrt[None, :]


def pad2d(w, rows, cols):
    r, c = w.shape
    return jnp.pad(w, ((0, rows - r), (0, cols - c)))


# ----------------------------------------------------------------------------
# Demo
# ----------------------------------------------------------------------------
if __name__ == "__main__":
    N, NUM_FEATURES, NHID, NUM_CLASSES = 16, 16, 32, 8

    key = jax.random.PRNGKey(0)
    k_x, k_r0, k_r4, *k_w = jax.random.split(key, 3 + 5)

    # node features (data.x)
    x = jax.random.normal(k_x, (N, NUM_FEATURES), dtype=jnp.float32)

    # deterministic edge_index: ring + chords, both directions (2, 64)
    src, dst = [], []
    for i in range(N):
        for d in (1, 3):
            j = (i + d) % N
            src += [i, j]
            dst += [j, i]
    edge_index = np.stack([np.asarray(src), np.asarray(dst)])
    # normalized adjacency shipped as bf16 (the only O(N^2) operand); ~0.4% rel
    # error on the D^-1/2 weights, f32 accumulation in-kernel.
    adj = jnp.asarray(gcn_norm_dense(edge_index, N), dtype=jnp.float32)

    # reparametrization weights: simplex init, then `constraint` re-applied in
    # forward -> projection applied twice.  Stored transposed (Fin, Fout).
    def simplex_linear_weight(k, fan_out, fan_in):
        bound = 1.0 / np.sqrt(fan_in)
        w = np.asarray(
            jax.random.uniform(k, (fan_out, fan_in), minval=-bound, maxval=bound))
        w = projection_simplex(projection_simplex(w))
        return jnp.asarray(w.T, dtype=jnp.float32)

    wrep0 = simplex_linear_weight(k_r0, NHID, NUM_FEATURES)   # (16, 32)
    wrep4 = simplex_linear_weight(k_r4, NUM_CLASSES, NHID)    # (32, 8)
    # layers 1-3 use nn.Identity -> no weight passed; handled statically in-kernel

    # GCNConv weights (glorot uniform) and biases (zeros, as in PyG reset)
    dims = [(NUM_FEATURES, NHID), (NHID, NHID), (NHID, NHID),
            (NHID, NHID), (NHID, NUM_CLASSES)]
    w_gcns, b_gcns = [], []
    for k, (fi, fo) in zip(k_w, dims):
        lim = float(np.sqrt(6.0 / (fi + fo)))
        w_gcns.append(jax.random.uniform(k, (fi, fo), minval=-lim, maxval=lim,
                                         dtype=jnp.float32))
        b_gcns.append(jnp.zeros((fo,), dtype=jnp.float32))

    # Zero-pad every weight to 128 lanes once, up front, and cast the MXU
    # operands to bf16 (f32 accumulation happens in-kernel). Biases stay f32.
    wrep0_p = pad2d(wrep0, FPAD, FPAD).astype(jnp.bfloat16)
    wrep4_p = pad2d(wrep4, FPAD, FPAD).astype(jnp.bfloat16)
    wg = jnp.stack([pad2d(w, FPAD, FPAD) for w in w_gcns]
                   ).astype(jnp.bfloat16)                            # (5,128,128)
    bg = jnp.stack([jnp.pad(b, (0, FPAD - b.shape[0])) for b in b_gcns]
                   ).reshape(5, 1, FPAD).astype(jnp.float32)         # (5,1,128)

    out = gcnnet5_forward(x, adj, wrep0_p, wrep4_p, wg, bg,
                          num_classes=NUM_CLASSES)
    out = jax.block_until_ready(out)

    assert out.shape == (N, NUM_CLASSES), out.shape
    assert bool(jnp.all(jnp.isfinite(out)))
    # rows of log_softmax should exp-sum to 1
    assert bool(jnp.allclose(jnp.sum(jnp.exp(out), axis=1), 1.0, atol=1e-4))
    print("KERNEL_OK")
</pallas_src>

<mosaic_0001>
module attributes {stable_mosaic.version = 11 : i64} {
  func.func @_gcnnet5_fused_kernel(%arg0: memref<256x128xbf16, #tpu.memory_space<vmem>>, %arg1: memref<256x256xbf16, #tpu.memory_space<any>>, %arg2: memref<128x128xbf16, #tpu.memory_space<vmem>>, %arg3: memref<128x128xbf16, #tpu.memory_space<vmem>>, %arg4: memref<5x128x128xbf16, #tpu.memory_space<vmem>>, %arg5: memref<5x1x128xf32, #tpu.memory_space<vmem>>, %arg6: memref<256x128xf32, #tpu.memory_space<vmem>>, %arg7: memref<256x256xbf16, #tpu.memory_space<vmem>>, %arg8: memref<!tpu.dma_semaphore, #tpu.memory_space<semaphore_mem>>) attributes {dimension_semantics = [], scalar_prefetch = 0 : i64, scratch_operands = 2 : i64, tpu.core_type = #tpu.core_type<tc>} {
    tpu.enqueue_dma source(%arg1 : memref<256x256xbf16, #tpu.memory_space<any>>) target(%arg7 : memref<256x256xbf16, #tpu.memory_space<vmem>>) target_semaphore(%arg8 : memref<!tpu.dma_semaphore, #tpu.memory_space<semaphore_mem>>)
    %c0 = arith.constant 0 : index
    %c0_0 = arith.constant 0 : index
    %0 = vector.load %arg0[%c0, %c0_0] : memref<256x128xbf16, #tpu.memory_space<vmem>>, vector<256x128xbf16>
    %c0_1 = arith.constant 0 : index
    %c0_2 = arith.constant 0 : index
    %1 = vector.load %arg2[%c0_1, %c0_2] : memref<128x128xbf16, #tpu.memory_space<vmem>>, vector<128x128xbf16>
    %cst = arith.constant dense<0.000000e+00> : vector<256x128xf32>
    %2 = tpu.matmul %0, %1, %cst {dimension_numbers = #tpu.dot_dimension_numbers<[1], [0], [0], [1], [0, 0, 1, 1], [], []>} : vector<256x128xbf16>, vector<128x128xbf16>, vector<256x128xf32> -> vector<256x128xf32>
    %cst_3 = arith.constant -0.999989986 : f32
    %cst_4 = arith.constant 0.999989986 : f32
    %3 = vector.broadcast %cst_3 : f32 to vector<256x128xf32>
    %4 = arith.maximumf %3, %2 : vector<256x128xf32>
    %5 = vector.broadcast %cst_4 : f32 to vector<256x128xf32>
    %6 = arith.minimumf %5, %4 : vector<256x128xf32>
    %cst_5 = arith.constant 1.000000e+00 : f32
    %7 = vector.broadcast %cst_5 : f32 to vector<256x128xf32>
    %8 = arith.addf %7, %6 : vector<256x128xf32>
    %cst_6 = arith.constant 1.000000e+00 : f32
    %9 = vector.broadcast %cst_6 : f32 to vector<256x128xf32>
    %10 = arith.subf %9, %6 : vector<256x128xf32>
    %11 = tpu.reciprocal %10 {approx = true} : vector<256x128xf32> -> vector<256x128xf32>
    %12 = arith.mulf %8, %11 : vector<256x128xf32>
    %13 = math.log %12 : vector<256x128xf32>
    %cst_7 = arith.constant 5.000000e-01 : f32
    %14 = vector.broadcast %cst_7 : f32 to vector<256x128xf32>
    %15 = arith.mulf %14, %13 : vector<256x128xf32>
    %c0_8 = arith.constant 0 : index
    %c0_9 = arith.constant 0 : index
    %c0_10 = arith.constant 0 : index
    %16 = vector.load %arg4[%c0_8, %c0_9, %c0_10] : memref<5x128x128xbf16, #tpu.memory_space<vmem>>, vector<1x128x128xbf16>
    %17 = vector.shape_cast %16 : vector<1x128x128xbf16> to vector<128x128xbf16>
    %cst_11 = arith.constant dense<0.000000e+00> : vector<256x128xf32>
    %18 = tpu.matmul %0, %17, %cst_11 {dimension_numbers = #tpu.dot_dimension_numbers<[1], [0], [0], [1], [0, 0, 1, 1], [], []>} : vector<256x128xbf16>, vector<128x128xbf16>, vector<256x128xf32> -> vector<256x128xf32>
    %19 = arith.truncf %18 : vector<256x128xf32> to vector<256x128xbf16>
    tpu.wait_dma2 semaphore(%arg8 : memref<!tpu.dma_semaphore, #tpu.memory_space<semaphore_mem>>) src(%arg1 : memref<256x256xbf16, #tpu.memory_space<any>>) dst(%arg7 : memref<256x256xbf16, #tpu.memory_space<vmem>>)
    %c0_12 = arith.constant 0 : index
    %c0_13 = arith.constant 0 : index
    %20 = vector.load %arg7[%c0_12, %c0_13] : memref<256x256xbf16, #tpu.memory_space<vmem>>, vector<256x256xbf16>
    %cst_14 = arith.constant dense<0.000000e+00> : vector<256x128xf32>
    %21 = tpu.matmul %20, %19, %cst_14 {dimension_numbers = #tpu.dot_dimension_numbers<[1], [0], [0], [1], [0, 0, 1, 1], [], []>} : vector<256x256xbf16>, vector<256x128xbf16>, vector<256x128xf32> -> vector<256x128xf32>
    %c0_15 = arith.constant 0 : index
    %c0_16 = arith.constant 0 : index
    %c0_17 = arith.constant 0 : index
    %22 = vector.load %arg5[%c0_15, %c0_16, %c0_17] : memref<5x1x128xf32, #tpu.memory_space<vmem>>, vector<1x1x128xf32>
    %23 = vector.shape_cast %22 : vector<1x1x128xf32> to vector<1x128xf32>
    %24 = vector.broadcast %23 : vector<1x128xf32> to vector<256x128xf32>
    %25 = arith.addf %21, %24 : vector<256x128xf32>
    %26 = arith.addf %25, %15 : vector<256x128xf32>
    %27 = math.tanh %26 : vector<256x128xf32>
    %cst_18 = arith.constant -6.10303401 : f32
    %cst_19 = arith.constant 6.10303401 : f32
    %28 = vector.broadcast %cst_18 : f32 to vector<256x128xf32>
    %29 = arith.maximumf %28, %26 : vector<256x128xf32>
    %30 = vector.broadcast %cst_19 : f32 to vector<256x128xf32>
    %31 = arith.minimumf %30, %29 : vector<256x128xf32>
    %32 = arith.truncf %27 : vector<256x128xf32> to vector<256x128xbf16>
    %c1 = arith.constant 1 : index
    %c0_20 = arith.constant 0 : index
    %c0_21 = arith.constant 0 : index
    %33 = vector.load %arg4[%c1, %c0_20, %c0_21] : memref<5x128x128xbf16, #tpu.memory_space<vmem>>, vector<1x128x128xbf16>
    %34 = vector.shape_cast %33 : vector<1x128x128xbf16> to vector<128x128xbf16>
    %cst_22 = arith.constant dense<0.000000e+00> : vector<256x128xf32>
    %35 = tpu.matmul %32, %34, %cst_22 {dimension_numbers = #tpu.dot_dimension_numbers<[1], [0], [0], [1], [0, 0, 1, 1], [], []>} : vector<256x128xbf16>, vector<128x128xbf16>, vector<256x128xf32> -> vector<256x128xf32>
    %36 = arith.truncf %35 : vector<256x128xf32> to vector<256x128xbf16>
    %cst_23 = arith.constant dense<0.000000e+00> : vector<256x128xf32>
    %37 = tpu.matmul %20, %36, %cst_23 {dimension_numbers = #tpu.dot_dimension_numbers<[1], [0], [0], [1], [0, 0, 1, 1], [], []>} : vector<256x256xbf16>, vector<256x128xbf16>, vector<256x128xf32> -> vector<256x128xf32>
    %c1_24 = arith.constant 1 : index
    %c0_25 = arith.constant 0 : index
    %c0_26 = arith.constant 0 : index
    %38 = vector.load %arg5[%c1_24, %c0_25, %c0_26] : memref<5x1x128xf32, #tpu.memory_space<vmem>>, vector<1x1x128xf32>
    %39 = vector.shape_cast %38 : vector<1x1x128xf32> to vector<1x128xf32>
    %40 = vector.broadcast %39 : vector<1x128xf32> to vector<256x128xf32>
    %41 = arith.addf %37, %40 : vector<256x128xf32>
    %42 = arith.addf %31, %41 : vector<256x128xf32>
    %43 = math.tanh %42 : vector<256x128xf32>
    %cst_27 = arith.constant -6.10303401 : f32
    %cst_28 = arith.constant 6.10303401 : f32
    %44 = vector.broadcast %cst_27 : f32 to vector<256x128xf32>
    %45 = arith.maximumf %44, %42 : vector<256x128xf32>
    %46 = vector.broadcast %cst_28 : f32 to vector<256x128xf32>
    %47 = arith.minimumf %46, %45 : vector<256x128xf32>
    %48 = arith.truncf %43 : vector<256x128xf32> to vector<256x128xbf16>
    %c2 = arith.constant 2 : index
    %c0_29 = arith.constant 0 : index
    %c0_30 = arith.constant 0 : index
    %49 = vector.load %arg4[%c2, %c0_29, %c0_30] : memref<5x128x128xbf16, #tpu.memory_space<vmem>>, vector<1x128x128xbf16>
    %50 = vector.shape_cast %49 : vector<1x128x128xbf16> to vector<128x128xbf16>
    %cst_31 = arith.constant dense<0.000000e+00> : vector<256x128xf32>
    %51 = tpu.matmul %48, %50, %cst_31 {dimension_numbers = #tpu.dot_dimension_numbers<[1], [0], [0], [1], [0, 0, 1, 1], [], []>} : vector<256x128xbf16>, vector<128x128xbf16>, vector<256x128xf32> -> vector<256x128xf32>
    %52 = arith.truncf %51 : vector<256x128xf32> to vector<256x128xbf16>
    %cst_32 = arith.constant dense<0.000000e+00> : vector<256x128xf32>
    %53 = tpu.matmul %20, %52, %cst_32 {dimension_numbers = #tpu.dot_dimension_numbers<[1], [0], [0], [1], [0, 0, 1, 1], [], []>} : vector<256x256xbf16>, vector<256x128xbf16>, vector<256x128xf32> -> vector<256x128xf32>
    %c2_33 = arith.constant 2 : index
    %c0_34 = arith.constant 0 : index
    %c0_35 = arith.constant 0 : index
    %54 = vector.load %arg5[%c2_33, %c0_34, %c0_35] : memref<5x1x128xf32, #tpu.memory_space<vmem>>, vector<1x1x128xf32>
    %55 = vector.shape_cast %54 : vector<1x1x128xf32> to vector<1x128xf32>
    %56 = vector.broadcast %55 : vector<1x128xf32> to vector<256x128xf32>
    %57 = arith.addf %53, %56 : vector<256x128xf32>
    %58 = arith.addf %47, %57 : vector<256x128xf32>
    %59 = math.tanh %58 : vector<256x128xf32>
    %cst_36 = arith.constant -6.10303401 : f32
    %cst_37 = arith.constant 6.10303401 : f32
    %60 = vector.broadcast %cst_36 : f32 to vector<256x128xf32>
    %61 = arith.maximumf %60, %58 : vector<256x128xf32>
    %62 = vector.broadcast %cst_37 : f32 to vector<256x128xf32>
    %63 = arith.minimumf %62, %61 : vector<256x128xf32>
    %64 = arith.truncf %59 : vector<256x128xf32> to vector<256x128xbf16>
    %c3 = arith.constant 3 : index
    %c0_38 = arith.constant 0 : index
    %c0_39 = arith.constant 0 : index
    %65 = vector.load %arg4[%c3, %c0_38, %c0_39] : memref<5x128x128xbf16, #tpu.memory_space<vmem>>, vector<1x128x128xbf16>
    %66 = vector.shape_cast %65 : vector<1x128x128xbf16> to vector<128x128xbf16>
    %cst_40 = arith.constant dense<0.000000e+00> : vector<256x128xf32>
    %67 = tpu.matmul %64, %66, %cst_40 {dimension_numbers = #tpu.dot_dimension_numbers<[1], [0], [0], [1], [0, 0, 1, 1], [], []>} : vector<256x128xbf16>, vector<128x128xbf16>, vector<256x128xf32> -> vector<256x128xf32>
    %68 = arith.truncf %67 : vector<256x128xf32> to vector<256x128xbf16>
    %cst_41 = arith.constant dense<0.000000e+00> : vector<256x128xf32>
    %69 = tpu.matmul %20, %68, %cst_41 {dimension_numbers = #tpu.dot_dimension_numbers<[1], [0], [0], [1], [0, 0, 1, 1], [], []>} : vector<256x256xbf16>, vector<256x128xbf16>, vector<256x128xf32> -> vector<256x128xf32>
    %c3_42 = arith.constant 3 : index
    %c0_43 = arith.constant 0 : index
    %c0_44 = arith.constant 0 : index
    %70 = vector.load %arg5[%c3_42, %c0_43, %c0_44] : memref<5x1x128xf32, #tpu.memory_space<vmem>>, vector<1x1x128xf32>
    %71 = vector.shape_cast %70 : vector<1x1x128xf32> to vector<1x128xf32>
    %72 = vector.broadcast %71 : vector<1x128xf32> to vector<256x128xf32>
    %73 = arith.addf %69, %72 : vector<256x128xf32>
    %74 = arith.addf %63, %73 : vector<256x128xf32>
    %75 = math.tanh %74 : vector<256x128xf32>
    %76 = arith.truncf %75 : vector<256x128xf32> to vector<256x128xbf16>
    %c0_45 = arith.constant 0 : index
    %c0_46 = arith.constant 0 : index
    %77 = vector.load %arg3[%c0_45, %c0_46] : memref<128x128xbf16, #tpu.memory_space<vmem>>, vector<128x128xbf16>
    %cst_47 = arith.constant dense<0.000000e+00> : vector<256x128xf32>
    %78 = tpu.matmul %76, %77, %cst_47 {dimension_numbers = #tpu.dot_dimension_numbers<[1], [0], [0], [1], [0, 0, 1, 1], [], []>} : vector<256x128xbf16>, vector<128x128xbf16>, vector<256x128xf32> -> vector<256x128xf32>
    %cst_48 = arith.constant -0.999989986 : f32
    %cst_49 = arith.constant 0.999989986 : f32
    %79 = vector.broadcast %cst_48 : f32 to vector<256x128xf32>
    %80 = arith.maximumf %79, %78 : vector<256x128xf32>
    %81 = vector.broadcast %cst_49 : f32 to vector<256x128xf32>
    %82 = arith.minimumf %81, %80 : vector<256x128xf32>
    %cst_50 = arith.constant 1.000000e+00 : f32
    %83 = vector.broadcast %cst_50 : f32 to vector<256x128xf32>
    %84 = arith.addf %83, %82 : vector<256x128xf32>
    %cst_51 = arith.constant 1.000000e+00 : f32
    %85 = vector.broadcast %cst_51 : f32 to vector<256x128xf32>
    %86 = arith.subf %85, %82 : vector<256x128xf32>
    %87 = tpu.reciprocal %86 {approx = true} : vector<256x128xf32> -> vector<256x128xf32>
    %88 = arith.mulf %84, %87 : vector<256x128xf32>
    %89 = math.log %88 : vector<256x128xf32>
    %cst_52 = arith.constant 5.000000e-01 : f32
    %90 = vector.broadcast %cst_52 : f32 to vector<256x128xf32>
    %91 = arith.mulf %90, %89 : vector<256x128xf32>
    %c4 = arith.constant 4 : index
    %c0_53 = arith.constant 0 : index
    %c0_54 = arith.constant 0 : index
    %92 = vector.load %arg4[%c4, %c0_53, %c0_54] : memref<5x128x128xbf16, #tpu.memory_space<vmem>>, vector<1x128x128xbf16>
    %93 = vector.shape_cast %92 : vector<1x128x128xbf16> to vector<128x128xbf16>
    %cst_55 = arith.constant dense<0.000000e+00> : vector<256x128xf32>
    %94 = tpu.matmul %76, %93, %cst_55 {dimension_numbers = #tpu.dot_dimension_numbers<[1], [0], [0], [1], [0, 0, 1, 1], [], []>} : vector<256x128xbf16>, vector<128x128xbf16>, vector<256x128xf32> -> vector<256x128xf32>
    %95 = arith.truncf %94 : vector<256x128xf32> to vector<256x128xbf16>
    %cst_56 = arith.constant dense<0.000000e+00> : vector<256x128xf32>
    %96 = tpu.matmul %20, %95, %cst_56 {dimension_numbers = #tpu.dot_dimension_numbers<[1], [0], [0], [1], [0, 0, 1, 1], [], []>} : vector<256x256xbf16>, vector<256x128xbf16>, vector<256x128xf32> -> vector<256x128xf32>
    %c4_57 = arith.constant 4 : index
    %c0_58 = arith.constant 0 : index
    %c0_59 = arith.constant 0 : index
    %97 = vector.load %arg5[%c4_57, %c0_58, %c0_59] : memref<5x1x128xf32, #tpu.memory_space<vmem>>, vector<1x1x128xf32>
    %98 = vector.shape_cast %97 : vector<1x1x128xf32> to vector<1x128xf32>
    %99 = vector.broadcast %98 : vector<1x128xf32> to vector<256x128xf32>
    %100 = arith.addf %96, %99 : vector<256x128xf32>
    %101 = arith.addf %91, %100 : vector<256x128xf32>
    %102 = math.tanh %101 : vector<256x128xf32>
    %103 = tpu.iota {dimensions = array<i32: 1>} : vector<256x128xi32>
    %c8_i32 = arith.constant 8 : i32
    %104 = vector.broadcast %c8_i32 : i32 to vector<256x128xi32>
    %105 = arith.cmpi slt, %103, %104 : vector<256x128xi32>
    %cst_60 = arith.constant -1.000000e+30 : f32
    %106 = vector.broadcast %cst_60 : f32 to vector<256x128xf32>
    %107 = arith.select %105, %102, %106 : vector<256x128xi1>, vector<256x128xf32>
    %cst_61 = arith.constant dense<0xFF800000> : vector<256xf32>
    %108 = vector.multi_reduction <maximumf>, %107, %cst_61 [1] : vector<256x128xf32> to vector<256xf32>
    %109 = vector.shape_cast %108 : vector<256xf32> to vector<256x1xf32>
    %110 = vector.broadcast %109 : vector<256x1xf32> to vector<256x128xf32>
    %111 = arith.subf %107, %110 : vector<256x128xf32>
    %112 = math.exp %111 : vector<256x128xf32>
    %cst_62 = arith.constant dense<0.000000e+00> : vector<256xf32>
    %113 = vector.multi_reduction <add>, %112, %cst_62 [1] : vector<256x128xf32> to vector<256xf32>
    %114 = vector.shape_cast %113 : vector<256xf32> to vector<256x1xf32>
    %115 = math.log %114 : vector<256x1xf32>
    %116 = vector.broadcast %115 : vector<256x1xf32> to vector<256x128xf32>
    %117 = arith.subf %111, %116 : vector<256x128xf32>
    %c0_63 = arith.constant 0 : index
    %c0_64 = arith.constant 0 : index
    %118 = vector.load %arg6[%c0_63, %c0_64] : memref<256x128xf32, #tpu.memory_space<vmem>>, vector<256x128xf32>
    tpu.vector_store %arg6[%c0_63, %c0_64], %117 {strides = array<i32>} : memref<256x128xf32, #tpu.memory_space<vmem>>, vector<256x128xf32>,
    return
  }
}

</mosaic_0001>

<bundles_post_ra>
// kernel: gcnnet5_forward.1
= control target key start
LH: loop header
LB: loop body
LE: loop exit
PB: predicated region body
PF: predicated region fallthrough
CT: control target
= control target key end

     0   :  { %s8993_s0 = inlined_call_operand.vmem [shape: bf16[256,128], index: 0, kind: input, shape index: {}]   ;;  %s8994_s1 = inlined_call_operand.vmem [shape: bf16[256,256], index: 1, kind: input, shape index: {}]   ;;  %s8995_s2 = inlined_call_operand.vmem [shape: bf16[128,128], index: 2, kind: input, shape index: {}]   ;;  %s8996_s3 = inlined_call_operand.vmem [shape: bf16[128,128], index: 3, kind: input, shape index: {}]   ;;  %s8997_s4 = inlined_call_operand.vmem [shape: bf16[5,128,128], index: 4, kind: input, shape index: {}]   ;;  %s8998_s5 = inlined_call_operand.vmem [shape: f32[5,1,128], index: 5, kind: input, shape index: {}]   ;;  %s8999_s6 = inlined_call_operand.vmem [shape: f32[256,128], index: 6, kind: output, shape index: {}]  }
   0x1   :  { %v39_v0 = vld [vmem:[%s8994_s1] sm:$0xf]  ;;  %v41_v1 = vld [vmem:[%s8994_s1 + $0x8] sm:$0xf]  ;;  %v43_v2 = vld [vmem:[%s8994_s1 + $0x4] sm:$0xf] }
   0x2   :  { %40 = vst [vmem:[#allocation2] sm:$0xf] %v39_v0  ;;  %42 = vst [vmem:[#allocation2 + $0x4] sm:$0xf] %v41_v1  ;;  %v45_v3 = vld [vmem:[%s8994_s1 + $0xc] sm:$0xff]   ;;  %v53_v6 = vld [vmem:[%s8994_s1 + $0x1c] sm:$0xff]  }
   0x3   :  { %44 = vst [vmem:[#allocation2 + $0x8] sm:$0xf] %v43_v2  ;;  %v49_v4 = vld [vmem:[%s8994_s1 + $0x18] sm:$0xf]  ;;  %v51_v5 = vld [vmem:[%s8994_s1 + $0x14] sm:$0xf] }
   0x4   :  { %46 = vst [vmem:[#allocation2 + $0xc] sm:$0xff] %v45_v3   ;;  %50 = vst [vmem:[#allocation2 + $0x14] sm:$0xf] %v49_v4  ;;  %v57_v7 = vld [vmem:[%s8994_s1 + $0x28] sm:$0xf]  ;;  %v61_v9 = vld [vmem:[%s8994_s1 + $0x2c] sm:$0xff]  }
   0x5   :  { %52 = vst [vmem:[#allocation2 + $0x18] sm:$0xf] %v51_v5  ;;  %v59_v8 = vld [vmem:[%s8994_s1 + $0x24] sm:$0xf]  ;;  %54 = vst [vmem:[#allocation2 + $0x1c] sm:$0xff] %v53_v6   ;;  %v69_v12 = vld [vmem:[%s8994_s1 + $0x3c] sm:$0xff]  }
   0x6   :  { %58 = vst [vmem:[#allocation2 + $0x24] sm:$0xf] %v57_v7  ;;  %60 = vst [vmem:[#allocation2 + $0x28] sm:$0xf] %v59_v8  ;;  %v65_v10 = vld [vmem:[%s8994_s1 + $0x38] sm:$0xf] }
   0x7   :  { %v67_v11 = vld [vmem:[%s8994_s1 + $0x34] sm:$0xf]  ;;  %62 = vst [vmem:[#allocation2 + $0x2c] sm:$0xff] %v61_v9   ;;  %66 = vst [vmem:[#allocation2 + $0x34] sm:$0xf] %v65_v10  ;;  %v77_v15 = vld [vmem:[%s8994_s1 + $0x4c] sm:$0xff]  }
   0x8   :  { %68 = vst [vmem:[#allocation2 + $0x38] sm:$0xf] %v67_v11  ;;  %v73_v13 = vld [vmem:[%s8994_s1 + $0x48] sm:$0xf]  ;;  %v75_v14 = vld [vmem:[%s8994_s1 + $0x44] sm:$0xf] }
   0x9   :  { %70 = vst [vmem:[#allocation2 + $0x3c] sm:$0xff] %v69_v12   ;;  %74 = vst [vmem:[#allocation2 + $0x44] sm:$0xf] %v73_v13  ;;  %v81_v16 = vld [vmem:[%s8994_s1 + $0x58] sm:$0xf]  ;;  %v85_v18 = vld [vmem:[%s8994_s1 + $0x5c] sm:$0xff]  }
   0xa   :  { %76 = vst [vmem:[#allocation2 + $0x48] sm:$0xf] %v75_v14  ;;  %v83_v17 = vld [vmem:[%s8994_s1 + $0x54] sm:$0xf]  ;;  %78 = vst [vmem:[#allocation2 + $0x4c] sm:$0xff] %v77_v15   ;;  %v93_v21 = vld [vmem:[%s8994_s1 + $0x6c] sm:$0xff]  }
   0xb   :  { %82 = vst [vmem:[#allocation2 + $0x54] sm:$0xf] %v81_v16  ;;  %84 = vst [vmem:[#allocation2 + $0x58] sm:$0xf] %v83_v17  ;;  %v89_v19 = vld [vmem:[%s8994_s1 + $0x68] sm:$0xf] }
   0xc   :  { %v91_v20 = vld [vmem:[%s8994_s1 + $0x64] sm:$0xf]  ;;  %86 = vst [vmem:[#allocation2 + $0x5c] sm:$0xff] %v85_v18   ;;  %90 = vst [vmem:[#allocation2 + $0x64] sm:$0xf] %v89_v19  ;;  %v101_v24 = vld [vmem:[%s8994_s1 + $0x7c] sm:$0xff]  }
   0xd   :  { %92 = vst [vmem:[#allocation2 + $0x68] sm:$0xf] %v91_v20  ;;  %v97_v22 = vld [vmem:[%s8994_s1 + $0x78] sm:$0xf]  ;;  %v99_v23 = vld [vmem:[%s8994_s1 + $0x74] sm:$0xf] }
   0xe   :  { %94 = vst [vmem:[#allocation2 + $0x6c] sm:$0xff] %v93_v21   ;;  %98 = vst [vmem:[#allocation2 + $0x74] sm:$0xf] %v97_v22  ;;  %v105_v25 = vld [vmem:[%s8994_s1 + $0x88] sm:$0xf]  ;;  %v109_v27 = vld [vmem:[%s8994_s1 + $0x8c] sm:$0xff]  }
   0xf   :  { %100 = vst [vmem:[#allocation2 + $0x78] sm:$0xf] %v99_v23  ;;  %v107_v26 = vld [vmem:[%s8994_s1 + $0x84] sm:$0xf]  ;;  %102 = vst [vmem:[#allocation2 + $0x7c] sm:$0xff] %v101_v24   ;;  %v117_v30 = vld [vmem:[%s8994_s1 + $0x9c] sm:$0xff]  }
  0x10   :  { %106 = vst [vmem:[#allocation2 + $0x84] sm:$0xf] %v105_v25  ;;  %108 = vst [vmem:[#allocation2 + $0x88] sm:$0xf] %v107_v26  ;;  %v113_v28 = vld [vmem:[%s8994_s1 + $0x98] sm:$0xf] }
  0x11   :  { %v115_v29 = vld [vmem:[%s8994_s1 + $0x94] sm:$0xf]  ;;  %110 = vst [vmem:[#allocation2 + $0x8c] sm:$0xff] %v109_v27   ;;  %114 = vst [vmem:[#allocation2 + $0x94] sm:$0xf] %v113_v28  ;;  %v125_v33 = vld [vmem:[%s8994_s1 + $0xac] sm:$0xff]  }
  0x12   :  { %116 = vst [vmem:[#allocation2 + $0x98] sm:$0xf] %v115_v29  ;;  %v121_v31 = vld [vmem:[%s8994_s1 + $0xa8] sm:$0xf]  ;;  %v123_v32 = vld [vmem:[%s8994_s1 + $0xa4] sm:$0xf] }
  0x13   :  { %118 = vst [vmem:[#allocation2 + $0x9c] sm:$0xff] %v117_v30   ;;  %122 = vst [vmem:[#allocation2 + $0xa4] sm:$0xf] %v121_v31  ;;  %v129_v34 = vld [vmem:[%s8994_s1 + $0xb8] sm:$0xf]  ;;  %v133_v36 = vld [vmem:[%s8994_s1 + $0xbc] sm:$0xff]  }
  0x14   :  { %124 = vst [vmem:[#allocation2 + $0xa8] sm:$0xf] %v123_v32  ;;  %v131_v35 = vld [vmem:[%s8994_s1 + $0xb4] sm:$0xf]  ;;  %126 = vst [vmem:[#allocation2 + $0xac] sm:$0xff] %v125_v33   ;;  %v141_v39 = vld [vmem:[%s8994_s1 + $0xcc] sm:$0xff]  }
  0x15   :  { %130 = vst [vmem:[#allocation2 + $0xb4] sm:$0xf] %v129_v34  ;;  %132 = vst [vmem:[#allocation2 + $0xb8] sm:$0xf] %v131_v35  ;;  %v137_v37 = vld [vmem:[%s8994_s1 + $0xc8] sm:$0xf] }
  0x16   :  { %v139_v38 = vld [vmem:[%s8994_s1 + $0xc4] sm:$0xf]  ;;  %134 = vst [vmem:[#allocation2 + $0xbc] sm:$0xff] %v133_v36   ;;  %138 = vst [vmem:[#allocation2 + $0xc4] sm:$0xf] %v137_v37  ;;  %v149_v42 = vld [vmem:[%s8994_s1 + $0xdc] sm:$0xff]  }
  0x17   :  { %140 = vst [vmem:[#allocation2 + $0xc8] sm:$0xf] %v139_v38  ;;  %v145_v40 = vld [vmem:[%s8994_s1 + $0xd8] sm:$0xf]  ;;  %v147_v41 = vld [vmem:[%s8994_s1 + $0xd4] sm:$0xf] }
  0x18   :  { %142 = vst [vmem:[#allocation2 + $0xcc] sm:$0xff] %v141_v39   ;;  %146 = vst [vmem:[#allocation2 + $0xd4] sm:$0xf] %v145_v40  ;;  %v153_v43 = vld [vmem:[%s8994_s1 + $0xe8] sm:$0xf]  ;;  %v157_v45 = vld [vmem:[%s8994_s1 + $0xec] sm:$0xff]  }
  0x19   :  { %148 = vst [vmem:[#allocation2 + $0xd8] sm:$0xf] %v147_v41  ;;  %v155_v44 = vld [vmem:[%s8994_s1 + $0xe4] sm:$0xf]  ;;  %150 = vst [vmem:[#allocation2 + $0xdc] sm:$0xff] %v149_v42  }
  0x1a   :  { %154 = vst [vmem:[#allocation2 + $0xe4] sm:$0xf] %v153_v43  ;;  %156 = vst [vmem:[#allocation2 + $0xe8] sm:$0xf] %v155_v44  ;;  %v161_v46 = vld [vmem:[%s8994_s1 + $0xf8] sm:$0xf] }
  0x1b   :  { %v163_v47 = vld [vmem:[%s8994_s1 + $0xf4] sm:$0xf]  ;;  %158 = vst [vmem:[#allocation2 + $0xec] sm:$0xff] %v157_v45   ;;  %162 = vst [vmem:[#allocation2 + $0xf4] sm:$0xf] %v161_v46 }
  0x1c   :  { %164 = vst [vmem:[#allocation2 + $0xf8] sm:$0xf] %v163_v47  ;;  %v165_v48 = vld [vmem:[%s8994_s1 + $0xfc] sm:$0xf] }
  0x1d   :  { %166 = vst [vmem:[#allocation2 + $0xfc] sm:$0xf] %v165_v48 }
  0x1e   :  { %325 = vsyncadd [#allocation3], 4096  ;;  %v5942_v49 = vld [vmem:[%s8995_s2] sm:$0xff]   ;;  %v5943_v50 = vld [vmem:[%s8995_s2 + $0x8] sm:$0xff]  }
  0x1f   :  { %5590 = vmatprep.subr.bf16.mxu0 %v5942_v49  ;;  %v5944_v51 = vld [vmem:[%s8995_s2 + $0x10] sm:$0xff]   ;;  %v5945_v52 = vld [vmem:[%s8995_s2 + $0x18] sm:$0xff]   ;;  %v6982_v53 = vld [vmem:[%s8993_s0] sm:$0xff]  }
  0x20   :  { %5591 = vmatpush3.bf16.msra.mxu0 %v5942_v49  ;;  %5606 = vmatprep.mubr.bf16.mxu0 %v6982_v53  ;;  %v5952_v54 = vld [vmem:[%s8997_s4] sm:$0xff]   ;;  %v5955_v56 = vld [vmem:[%s8997_s4 + $0x8] sm:$0xff]   ;;  %v5958_v58 = vld [vmem:[%s8997_s4 + $0x10] sm:$0xff]  }
  0x21   :  { %5592 = vmatprep.subr.bf16.mxu0 %v5943_v50  ;;  %v5946_v55 = vld [vmem:[%s8995_s2 + $0x20] sm:$0xff]   ;;  %5926 = vmatprep.subr.bf16.mxu1 %v5952_v54  ;;  %v5947_v57 = vld [vmem:[%s8995_s2 + $0x28] sm:$0xff]   ;;  %v5948_v59 = vld [vmem:[%s8995_s2 + $0x30] sm:$0xff]  }
  0x22   :  { %5934 = vmatpush3.bf16.msra.mxu1 %v5952_v54  ;;  %v5961_v60 = vld [vmem:[%s8997_s4 + $0x18] sm:$0xff]   ;;  %v5962_v61 = vld [vmem:[%s8993_s0 + $0x40] sm:$0xff]   ;;  %v5967_v0 = vld [vmem:[%s8997_s4 + $0x28] sm:$0xff]  }
  0x23   :  { %5927 = vmatprep.subr.bf16.mxu1 %v5955_v56  ;;  %v5964_v62 = vld [vmem:[%s8997_s4 + $0x20] sm:$0xff]   ;;  %5670 = vmatprep.mubr.bf16.mxu1 %v5962_v61  ;;  %v5949_v63 = vld [vmem:[%s8995_s2 + $0x38] sm:$0xff]   ;;  %v5951_v1 = vld [vmem:[%s8993_s0 + $0x8] sm:$0xff]  }
  0x24   :  { %5593 = vmatpush3.bf16.msra.mxu0 %v5943_v50  ;;  %v5970_v2 = vld [vmem:[%s8997_s4 + $0x30] sm:$0xff]   ;;  %v5973_v4 = vld [vmem:[%s8997_s4 + $0x38] sm:$0xff]   ;;  %v5956_v6 = vld [vmem:[%s8993_s0 + $0x20] sm:$0xff]  }
  0x25   :  { %5594 = vmatprep.subr.bf16.mxu0 %v5944_v51  ;;  %v5953_v3 = vld [vmem:[%s8993_s0 + $0x10] sm:$0xff]   ;;  %v5954_v5 = vld [vmem:[%s8993_s0 + $0x18] sm:$0xff]   ;;  %v5963_v7 = vld [vmem:[%s8993_s0 + $0x48] sm:$0xff]  }
  0x26   :  { %5935 = vmatpush3.bf16.msra.mxu1 %v5955_v56  ;;  %v5965_v8 = vld [vmem:[%s8993_s0 + $0x50] sm:$0xff]   ;;  %v5957_v9 = vld [vmem:[%s8993_s0 + $0x28] sm:$0xff]   ;;  %v5966_v11 = vld [vmem:[%s8993_s0 + $0x58] sm:$0xff]  }
  0x27   :  { %5928 = vmatprep.subr.bf16.mxu1 %v5958_v58  ;;  %v5959_v10 = vld [vmem:[%s8993_s0 + $0x30] sm:$0xff]   ;;  %v5968_v12 = vld [vmem:[%s8993_s0 + $0x60] sm:$0xff]   ;;  %v5960_v13 = vld [vmem:[%s8993_s0 + $0x38] sm:$0xff]  }
  0x28   :  { %5595 = vmatpush3.bf16.msra.mxu0 %v5944_v51  ;;  %v5969_v14 = vld [vmem:[%s8993_s0 + $0x68] sm:$0xff]   ;;  %v5971_v15 = vld [vmem:[%s8993_s0 + $0x70] sm:$0xff]   ;;  %v5972_v16 = vld [vmem:[%s8993_s0 + $0x78] sm:$0xff]  }
  0x29   :  { %5596 = vmatprep.subr.bf16.mxu0 %v5945_v52 }
  0x2a   :  { %5936 = vmatpush3.bf16.msra.mxu1 %v5958_v58 }
  0x2b   :  { %5929 = vmatprep.subr.bf16.mxu1 %v5961_v60 }
  0x2c   :  { %5597 = vmatpush3.bf16.msra.mxu0 %v5945_v52 }
  0x2d   :  { %5598 = vmatprep.subr.bf16.mxu0 %v5946_v55 }
  0x2e   :  { %5937 = vmatpush3.bf16.msra.mxu1 %v5961_v60 }
  0x2f   :  { %5930 = vmatprep.subr.bf16.mxu1 %v5964_v62 }
  0x30   :  { %5599 = vmatpush3.bf16.msra.mxu0 %v5946_v55 }
  0x31   :  { %5600 = vmatprep.subr.bf16.mxu0 %v5947_v57 }
  0x32   :  { %5938 = vmatpush3.bf16.msra.mxu1 %v5964_v62 }
  0x33   :  { %5931 = vmatprep.subr.bf16.mxu1 %v5967_v0 }
  0x34   :  { %5601 = vmatpush3.bf16.msra.mxu0 %v5947_v57 }
  0x35   :  { %5602 = vmatprep.subr.bf16.mxu0 %v5948_v59 }
  0x36   :  { %5939 = vmatpush3.bf16.msra.mxu1 %v5967_v0 }
  0x37   :  { %5932 = vmatprep.subr.bf16.mxu1 %v5970_v2 }
  0x38   :  { %5603 = vmatpush3.bf16.msra.mxu0 %v5948_v59 }
  0x39   :  { %5604 = vmatprep.subr.bf16.mxu0 %v5949_v63 }
  0x3a   :  { %5940 = vmatpush3.bf16.msra.mxu1 %v5970_v2 }
  0x3b   :  { %5933 = vmatprep.subr.bf16.mxu1 %v5973_v4 }
  0x3c   :  { %5605 = vmatpush3.bf16.msra.mxu0 %v5949_v63 }
  0x3d   :  { %5638 = vmatprep.subr.bf16.mxu0 %v5952_v54 }
  0x3e   :  { %5941 = vmatpush3.bf16.msra.mxu1 %v5973_v4 }
  0x3f   :  { %5607 = vmatmul.mubr.bf16.vlgmr.msra.gmra.mrb[0].mxu0 %v5951_v1 }
  0x40   :  { %5639 = vmatpush3.bf16.msra.mxu0 %v5952_v54  ;;  %5610 = vmatprep.mubr.bf16.mxu0 %v5953_v3 }
  0x41   :  { %5640 = vmatprep.subr.bf16.mxu0 %v5955_v56  ;;  %5671 = vmatmul.mubr.bf16.vlgmr.msra.gmra.mrb[0].mxu1 %v5963_v7 }
  0x42   :  { %5674 = vmatprep.mubr.bf16.mxu1 %v5965_v8 }
  0x44   :  { %5641 = vmatpush3.bf16.msra.mxu0 %v5955_v56 }
  0x45   :  { %5642 = vmatprep.subr.bf16.mxu0 %v5958_v58 }
  0x47   :  { %5611 = vmatmul.mubr.bf16.gmra.mrb[4].mxu0 %v5954_v5 }
  0x48   :  { %5614 = vmatprep.mubr.bf16.mxu0 %v5956_v6  ;;  %5643 = vmatpush3.bf16.msra.mxu0 %v5958_v58 }
  0x49   :  { %5644 = vmatprep.subr.bf16.mxu0 %v5961_v60  ;;  %5675 = vmatmul.mubr.bf16.gmra.mrb[4].mxu1 %v5966_v11 }
  0x4a   :  { %5678 = vmatprep.mubr.bf16.mxu1 %v5968_v12 }
  0x4c   :  { %5645 = vmatpush3.bf16.msra.mxu0 %v5961_v60 }
  0x4d   :  { %5646 = vmatprep.subr.bf16.mxu0 %v5964_v62 }
  0x4f   :  { %5615 = vmatmul.mubr.bf16.gmra.mrb[8].mxu0 %v5957_v9 }
  0x50   :  { %5618 = vmatprep.mubr.bf16.mxu0 %v5959_v10  ;;  %5647 = vmatpush3.bf16.msra.mxu0 %v5964_v62 }
  0x51   :  { %5648 = vmatprep.subr.bf16.mxu0 %v5967_v0  ;;  %5679 = vmatmul.mubr.bf16.gmra.mrb[8].mxu1 %v5969_v14 }
  0x52   :  { %5682 = vmatprep.mubr.bf16.mxu1 %v5971_v15 }
  0x54   :  { %5649 = vmatpush3.bf16.msra.mxu0 %v5967_v0 }
  0x55   :  { %5650 = vmatprep.subr.bf16.mxu0 %v5970_v2 }
  0x57   :  { %5619 = vmatmul.mubr.bf16.gmra.mrb[12].mxu0 %v5960_v13 }
  0x58   :  { %5622 = vmatprep.mubr.bf16.mxu0 %v5962_v61  ;;  %5651 = vmatpush3.bf16.msra.mxu0 %v5970_v2 }
  0x59   :  { %5652 = vmatprep.subr.bf16.mxu0 %v5973_v4  ;;  %5683 = vmatmul.mubr.bf16.gmra.mrb[12].mxu1 %v5972_v16 }
  0x5c   :  { %5653 = vmatpush3.bf16.msra.mxu0 %v5973_v4 }
  0x5f   :  { %5623 = vmatmul.mubr.bf16.gmra.mrb[16].mxu0 %v5963_v7 }
  0x60   :  { %5626 = vmatprep.mubr.bf16.mxu0 %v5965_v8 }
  0x67   :  { %5627 = vmatmul.mubr.bf16.gmra.mrb[20].mxu0 %v5966_v11 }
  0x68   :  { %5630 = vmatprep.mubr.bf16.mxu0 %v5968_v12 }
  0x6f   :  { %5631 = vmatmul.mubr.bf16.gmra.mrb[24].mxu0 %v5969_v14 }
  0x70   :  { %5634 = vmatprep.mubr.bf16.mxu0 %v5971_v15 }
  0x77   :  { %5635 = vmatmul.mubr.bf16.gmra.mrb[28].mxu0 %v5972_v16 }
  0x78   :  { %5654 = vmatprep.mubr.bf16.mxu0 %v6982_v53 }
  0x7f   :  { %5655 = vmatmul.mubr.bf16.vlgmr.msra.gmra.mrb[32].mxu0 %v5951_v1 }
  0x80   :  { %5658 = vmatprep.mubr.bf16.mxu0 %v5953_v3 }
  0x87   :  { %5659 = vmatmul.mubr.bf16.gmra.mrb[36].mxu0 %v5954_v5 }
  0x88   :  { %5662 = vmatprep.mubr.bf16.mxu0 %v5956_v6 }
  0x8f   :  { %5663 = vmatmul.mubr.bf16.gmra.mrb[40].mxu0 %v5957_v9 }
  0x90   :  { %5666 = vmatprep.mubr.bf16.mxu0 %v5959_v10 }
  0x97   :  { %5667 = vmatmul.mubr.bf16.gmra.mrb[44].mxu0 %v5960_v13 }
 0x112   :  { %v5608_v17 = vpop.f32.mrb[0].mxu0 }
 0x113   :  { %v4582_v18 = vclamps-f32 %v5608_v17, 0.99999  ;;  %v552_v19 = vpop.f32.mrb[1].mxu0 }
 0x114   :  { %v4580_v20 = vclamps-f32 %v552_v19, 0.99999  ;;  %v5609_v21 = vpop.f32.mrb[2].mxu0  ;;  %v7067_v34 = vpop.f32.mrb[0].mxu1 }
 0x115   :  { %v777_v22 = vsub.f32 1.0, %v4582_v18  ;;  %v4583_v23 = vclamps-f32 %v5609_v21, 0.99999  ;;  %v555_v24 = vpop.f32.mrb[3].mxu0  ;;  %v7069_v38 = vpop.f32.mrb[1].mxu1  ;;  %v745_v45 = vadd.f32 1.0, %v4582_v18 }
 0x116   :  { %v775_v25 = vsub.f32 1.0, %v4580_v20  ;;  %v4581_v26 = vclamps-f32 %v555_v24, 0.99999  ;;  %v7071_v41 = vpop.f32.mrb[2].mxu1  ;;  %v743_v49 = vadd.f32 1.0, %v4580_v20 }
 0x117   :  { %5974 = vrcp.f32 %v777_v22  ;;  %v778_v27 = vsub.f32 1.0, %v4583_v23  ;;  %v7075_v44 = vpop.f32.mrb[3].mxu1  ;;  %v746_v52 = vadd.f32 1.0, %v4583_v23 }
 0x118   :  { %5976 = vrcp.f32 %v775_v25  ;;  %v776_v28 = vsub.f32 1.0, %v4581_v26  ;;  %v744_v56 = vadd.f32 1.0, %v4581_v26 }
 0x119   :  { %5978 = vrcp.f32 %v778_v27 }
 0x11a   :  { %5980 = vrcp.f32 %v776_v28  ;;  %v5612_v29 = vpop.f32.mrb[4].mxu0 }
 0x11b   :  { %v4586_v30 = vclamps-f32 %v5612_v29, 0.99999  ;;  %v568_v31 = vpop.f32.mrb[5].mxu0 }
 0x11c   :  { %v4584_v32 = vclamps-f32 %v568_v31, 0.99999  ;;  %v5613_v33 = vpop.f32.mrb[6].mxu0  ;;  %v7079_v63 = vpop.f32.mrb[4].mxu1 }
 0x11d   :  { %v781_v35 = vsub.f32 1.0, %v4586_v30  ;;  %v4587_v36 = vclamps-f32 %v5613_v33, 0.99999  ;;  %v571_v37 = vpop.f32.mrb[7].mxu0  ;;  %v7081_v3 = vpop.f32.mrb[5].mxu1  ;;  %v749_v10 = vadd.f32 1.0, %v4586_v30 }
 0x11e   :  { %v779_v39 = vsub.f32 1.0, %v4584_v32  ;;  %v4585_v40 = vclamps-f32 %v571_v37, 0.99999  ;;  %v7083_v6 = vpop.f32.mrb[6].mxu1  ;;  %v747_v14 = vadd.f32 1.0, %v4584_v32 }
 0x11f   :  { %5982 = vrcp.f32 %v781_v35  ;;  %v782_v42 = vsub.f32 1.0, %v4587_v36  ;;  %v7087_v9 = vpop.f32.mrb[7].mxu1  ;;  %v750_v18 = vadd.f32 1.0, %v4587_v36 }
 0x120   :  { %5984 = vrcp.f32 %v779_v39  ;;  %v780_v46 = vsub.f32 1.0, %v4585_v40  ;;  %v748_v22 = vadd.f32 1.0, %v4585_v40 }
 0x121   :  { %v5975_v48 = vpop.eup %5974  ;;  %5986 = vrcp.f32 %v782_v42 }
 0x122   :  { %v5977_v50 = vpop.eup %5976  ;;  %v841_v51 = vmul.f32 %v5975_v48, %v745_v45  ;;  %5988 = vrcp.f32 %v780_v46  ;;  %v5616_v53 = vpop.f32.mrb[8].mxu0 }
 0x123   :  { %v5979_v54 = vpop.eup %5978  ;;  %v839_v55 = vmul.f32 %v5977_v50, %v743_v49  ;;  %v4590_v57 = vclamps-f32 %v5616_v53, 0.99999  ;;  %v584_v58 = vpop.f32.mrb[9].mxu0 }
 0x124   :  { %v5981_v59 = vpop.eup %5980  ;;  %5990 = vlog2.f32 %v841_v51  ;;  %v842_v60 = vmul.f32 %v5979_v54, %v746_v52  ;;  %v4588_v61 = vclamps-f32 %v584_v58, 0.99999  ;;  %v5617_v62 = vpop.f32.mrb[10].mxu0 }
 0x125   :  { %5992 = vlog2.f32 %v839_v55  ;;  %v840_v0 = vmul.f32 %v5981_v59, %v744_v56  ;;  %v785_v1 = vsub.f32 1.0, %v4590_v57  ;;  %v587_v2 = vpop.f32.mrb[11].mxu0  ;;  %v4591_v5 = vclamps-f32 %v5617_v62, 0.99999  ;;  %v7099_v29 = vpop.f32.mrb[8].mxu1 }
 0x126   :  { %5994 = vlog2.f32 %v842_v60  ;;  %v783_v4 = vsub.f32 1.0, %v4588_v61  ;;  %v4589_v7 = vclamps-f32 %v587_v2, 0.99999  ;;  %v753_v31 = vadd.f32 1.0, %v4590_v57  ;;  %v7105_v35 = vpop.f32.mrb[9].mxu1 }
 0x127   :  { %5996 = vlog2.f32 %v840_v0  ;;  %v786_v11 = vsub.f32 1.0, %v4591_v5  ;;  %v751_v37 = vadd.f32 1.0, %v4588_v61  ;;  %v7110_v42 = vpop.f32.mrb[10].mxu1  ;;  %v754_v53 = vadd.f32 1.0, %v4591_v5 }
 0x128   :  { %5998 = vrcp.f32 %v785_v1  ;;  %v784_v15 = vsub.f32 1.0, %v4589_v7  ;;  %v7115_v50 = vpop.f32.mrb[11].mxu1  ;;  %v752_v58 = vadd.f32 1.0, %v4589_v7 }
 0x129   :  { %v5983_v13 = vpop.eup %5982  ;;  %6000 = vrcp.f32 %v783_v4 }
 0x12a   :  { %v5985_v16 = vpop.eup %5984  ;;  %v845_v17 = vmul.f32 %v5983_v13, %v749_v10  ;;  %6002 = vrcp.f32 %v786_v11  ;;  %v7091_v19 = vpop.f32.mrb[12].mxu0 }
 0x12b   :  { %v5987_v20 = vpop.eup %5986  ;;  %v843_v21 = vmul.f32 %v5985_v16, %v747_v14  ;;  %6004 = vrcp.f32 %v784_v15  ;;  %v4594_v23 = vclamps-f32 %v7091_v19, 0.99999  ;;  %v7094_v24 = vpop.f32.mrb[13].mxu0 }
 0x12c   :  { %v5989_v25 = vpop.eup %5988  ;;  %6006 = vlog2.f32 %v845_v17  ;;  %v846_v26 = vmul.f32 %v5987_v20, %v750_v18  ;;  %v4592_v27 = vclamps-f32 %v7094_v24, 0.99999  ;;  %v7097_v28 = vpop.f32.mrb[14].mxu0 }
 0x12d   :  { %6008 = vlog2.f32 %v843_v21  ;;  %v844_v30 = vmul.f32 %v5989_v25, %v748_v22  ;;  %v789_v32 = vsub.f32 1.0, %v4594_v23  ;;  %v7103_v33 = vpop.f32.mrb[15].mxu0  ;;  %v4595_v40 = vclamps-f32 %v7097_v28, 0.99999  ;;  %v7137_v17 = vpop.f32.mrb[12].mxu1 }
 0x12e   :  { %v5991_v36 = vpop.eup %5990  ;;  %6010 = vlog2.f32 %v846_v26  ;;  %v787_v39 = vsub.f32 1.0, %v4592_v27  ;;  %v4593_v48 = vclamps-f32 %v7103_v33, 0.99999  ;;  %v7143_v25 = vpop.f32.mrb[13].mxu1 }
 0x12f   :  { %v5993_v45 = vpop.eup %5992  ;;  %v876_v46 = vmul.f32 0.6931472, %v5991_v36  ;;  %6012 = vlog2.f32 %v844_v30  ;;  %v790_v54 = vsub.f32 1.0, %v4595_v40  ;;  %v757_v30 = vadd.f32 1.0, %v4594_v23 }
 0x130   :  { %v5995_v51 = vpop.eup %5994  ;;  %v872_v52 = vmul.f32 0.6931472, %v5993_v45  ;;  %6014 = vrcp.f32 %v789_v32  ;;  %v788_v62 = vsub.f32 1.0, %v4593_v48  ;;  %v7149_v32 = vpop.f32.mrb[14].mxu1 }
 0x131   :  { %v5997_v55 = vpop.eup %5996  ;;  %v7117_v56 = vmul.f32 0.5, %v876_v46  ;;  %v878_v57 = vmul.f32 0.6931472, %v5995_v51  ;;  %6016 = vrcp.f32 %v787_v39  ;;  %v7157_v23 = vpop.f32.mrb[15].mxu1 }
 0x132   :  { %v5999_v59 = vpop.eup %5998  ;;  %v7119_v60 = vmul.f32 0.5, %v872_v52  ;;  %v874_v61 = vmul.f32 0.6931472, %v5997_v55  ;;  %6018 = vrcp.f32 %v790_v54  ;;  %v7123_v0 = vpop.f32.mrb[16].mxu0  ;;  %v755_v52 = vadd.f32 1.0, %v4592_v27 }
 0x133   :  { %v6001_v1 = vpop.eup %6000  ;;  %v7125_v2 = vmul.f32 0.5, %v878_v57  ;;  %v849_v4 = vmul.f32 %v5999_v59, %v753_v31  ;;  %v4598_v5 = vclamps-f32 %v7123_v0, 0.99999  ;;  %v7128_v10 = vpop.f32.mrb[17].mxu0  ;;  %6020 = vrcp.f32 %v788_v62 }
 0x134   :  { %v6003_v11 = vpop.eup %6002  ;;  %v7132_v13 = vmul.f32 0.5, %v874_v61  ;;  %v847_v14 = vmul.f32 %v6001_v1, %v751_v37  ;;  %v4596_v15 = vclamps-f32 %v7128_v10, 0.99999  ;;  %v7135_v16 = vpop.f32.mrb[18].mxu0  ;;  %v758_v57 = vadd.f32 1.0, %v4595_v40 }
 0x135   :  { %v6005_v18 = vpop.eup %6004  ;;  %6022 = vlog2.f32 %v849_v4  ;;  %v850_v20 = vmul.f32 %v6003_v11, %v754_v53  ;;  %v793_v21 = vsub.f32 1.0, %v4598_v5  ;;  %v7141_v22 = vpop.f32.mrb[19].mxu0  ;;  %v4599_v39 = vclamps-f32 %v7135_v16, 0.99999 }
 0x136   :  { %v6007_v26 = vpop.eup %6006  ;;  %6024 = vlog2.f32 %v847_v14  ;;  %v848_v28 = vmul.f32 %v6005_v18, %v752_v58  ;;  %v791_v31 = vsub.f32 1.0, %v4596_v15  ;;  %v4597_v45 = vclamps-f32 %v7141_v22, 0.99999 }
 0x137   :  { %v6009_v36 = vpop.eup %6008  ;;  %v884_v37 = vmul.f32 0.6931472, %v6007_v26  ;;  %6026 = vlog2.f32 %v850_v20  ;;  %v794_v24 = vsub.f32 1.0, %v4599_v39  ;;  %v756_v11 = vadd.f32 1.0, %v4593_v48 }
 0x138   :  { %v6011_v46 = vpop.eup %6010  ;;  %v880_v51 = vmul.f32 0.6931472, %v6009_v36  ;;  %6028 = vlog2.f32 %v848_v28  ;;  %v792_v40 = vsub.f32 1.0, %v4597_v45 }
 0x139   :  { %v6013_v53 = vpop.eup %6012  ;;  %v7159_v54 = vmul.f32 0.5, %v884_v37  ;;  %v886_v55 = vmul.f32 0.6931472, %v6011_v46  ;;  %6030 = vrcp.f32 %v793_v21 }
 0x13a   :  { %v6015_v58 = vpop.eup %6014  ;;  %v7161_v59 = vmul.f32 0.5, %v880_v51  ;;  %v882_v61 = vmul.f32 0.6931472, %v6013_v53  ;;  %6032 = vrcp.f32 %v791_v31  ;;  %v7165_v27 = vpop.f32.mrb[20].mxu0 }
 0x13b   :  { %v6017_v62 = vpop.eup %6016  ;;  %v7167_v1 = vmul.f32 0.5, %v886_v55  ;;  %v853_v4 = vmul.f32 %v6015_v58, %v757_v30  ;;  %v7173_v14 = vpop.f32.mrb[21].mxu0  ;;  %6034 = vrcp.f32 %v794_v24  ;;  %v4602_v26 = vclamps-f32 %v7165_v27, 0.99999 }
 0x13c   :  { %v6019_v18 = vpop.eup %6018  ;;  %v7175_v20 = vmul.f32 0.5, %v882_v61  ;;  %v851_v21 = vmul.f32 %v6017_v62, %v755_v52  ;;  %v7178_v28 = vpop.f32.mrb[22].mxu0  ;;  %v4600_v30 = vclamps-f32 %v7173_v14, 0.99999  ;;  %v759_v62 = vadd.f32 1.0, %v4596_v15 }
 0x13d   :  { %6036 = vlog2.f32 %v853_v4  ;;  %v854_v31 = vmul.f32 %v6019_v18, %v758_v57  ;;  %v4603_v33 = vclamps-f32 %v7178_v28, 0.99999  ;;  %v7182_v48 = vpop.f32.mrb[23].mxu0  ;;  %v6021_v36 = vpop.eup %6020  ;;  %v797_v37 = vsub.f32 1.0, %v4602_v26 }
 0x13e   :  { %6038 = vlog2.f32 %v851_v21  ;;  %v4601_v46 = vclamps-f32 %v7182_v48, 0.99999  ;;  %v852_v52 = vmul.f32 %v6021_v36, %v756_v11  ;;  %v795_v53 = vsub.f32 1.0, %v4600_v30 }
 0x13f   :  { %v6023_v51 = vpop.eup %6022  ;;  %6040 = vlog2.f32 %v854_v31  ;;  %v761_v57 = vadd.f32 1.0, %v4598_v5  ;;  %v798_v61 = vsub.f32 1.0, %v4603_v33  ;;  %v763_v5 = vadd.f32 1.0, %v4600_v30 }
 0x140   :  { %v6025_v55 = vpop.eup %6024  ;;  %v892_v58 = vmul.f32 0.6931472, %v6023_v51  ;;  %6042 = vrcp.f32 %v792_v40  ;;  %v796_v4 = vsub.f32 1.0, %v4601_v46  ;;  %v766_v7 = vadd.f32 1.0, %v4603_v33 }
 0x141   :  { %v6027_v24 = vpop.eup %6026  ;;  %v888_v27 = vmul.f32 0.6931472, %v6025_v55  ;;  %6044 = vlog2.f32 %v852_v52 }
 0x142   :  { %v6029_v11 = vpop.eup %6028  ;;  %v7193_v14 = vmul.f32 0.5, %v892_v58  ;;  %v894_v18 = vmul.f32 0.6931472, %v6027_v24  ;;  %6046 = vrcp.f32 %v797_v37  ;;  %v7195_v0 = vpop.f32.mrb[24].mxu0 }
 0x143   :  { %v6031_v40 = vpop.eup %6030  ;;  %v7199_v21 = vmul.f32 0.5, %v888_v27  ;;  %v890_v31 = vmul.f32 0.6931472, %v6029_v11  ;;  %6048 = vrcp.f32 %v795_v53  ;;  %v4606_v10 = vclamps-f32 %v7195_v0, 0.99999  ;;  %v7202_v15 = vpop.f32.mrb[25].mxu0 }
 0x144   :  { %v6033_v36 = vpop.eup %6032  ;;  %v7204_v51 = vmul.f32 0.5, %v894_v18  ;;  %v857_v52 = vmul.f32 %v6031_v40, %v761_v57  ;;  %6050 = vrcp.f32 %v798_v61  ;;  %v4604_v37 = vclamps-f32 %v7202_v15, 0.99999  ;;  %v7207_v55 = vpop.f32.mrb[26].mxu0 }
 0x145   :  { %v7209_v58 = vmul.f32 0.5, %v890_v31  ;;  %v855_v24 = vmul.f32 %v6033_v36, %v759_v62  ;;  %v762_v27 = vadd.f32 1.0, %v4599_v39  ;;  %6052 = vrcp.f32 %v796_v4  ;;  %v7213_v53 = vpop.f32.mrb[27].mxu0  ;;  %v6035_v11 = vpop.eup %6034 }
 0x146   :  { %6054 = vlog2.f32 %v857_v52  ;;  %v801_v18 = vsub.f32 1.0, %v4606_v10  ;;  %v799_v57 = vsub.f32 1.0, %v4604_v37  ;;  %v4607_v31 = vclamps-f32 %v7207_v55, 0.99999 }
 0x147   :  { %v6037_v61 = vpop.eup %6036  ;;  %6056 = vlog2.f32 %v855_v24  ;;  %v858_v40 = vmul.f32 %v6035_v11, %v762_v27  ;;  %v4605_v62 = vclamps-f32 %v7213_v53, 0.99999  ;;  %v760_v4 = vadd.f32 1.0, %v4597_v45 }
 0x148   :  { %v6039_v16 = vpop.eup %6038  ;;  %v900_v39 = vmul.f32 0.6931472, %v6037_v61  ;;  %v765_v36 = vadd.f32 1.0, %v4602_v26  ;;  %6058 = vrcp.f32 %v801_v18  ;;  %v802_v49 = vsub.f32 1.0, %v4607_v31 }
 0x149   :  { %v6041_v52 = vpop.eup %6040  ;;  %v896_v19 = vmul.f32 0.6931472, %v6039_v16  ;;  %6060 = vlog2.f32 %v858_v40  ;;  %v800_v30 = vsub.f32 1.0, %v4605_v62 }
 0x14a   :  { %v6043_v24 = vpop.eup %6042  ;;  %v7225_v27 = vmul.f32 0.5, %v900_v39  ;;  %v902_v11 = vmul.f32 0.6931472, %v6041_v52  ;;  %6062 = vrcp.f32 %v799_v57  ;;  %v7229_v61 = vpop.f32.mrb[28].mxu0 }
 0x14b   :  { %v6045_v22 = vpop.eup %6044  ;;  %v7231_v45 = vmul.f32 0.5, %v896_v19  ;;  %v856_v26 = vmul.f32 %v6043_v24, %v760_v4  ;;  %6064 = vrcp.f32 %v802_v49  ;;  %v7235_v18 = vpop.f32.mrb[29].mxu0  ;;  %v4610_v28 = vclamps-f32 %v7229_v61, 0.99999 }
 0x14c   :  { %v6047_v40 = vpop.eup %6046  ;;  %v7237_v16 = vmul.f32 0.5, %v902_v11  ;;  %v898_v39 = vmul.f32 0.6931472, %v6045_v22  ;;  %v7240_v33 = vpop.f32.mrb[30].mxu0  ;;  %v764_v19 = vadd.f32 1.0, %v4601_v46 }
 0x14d   :  { %v6049_v57 = vpop.eup %6048  ;;  %6066 = vlog2.f32 %v856_v26  ;;  %v861_v52 = vmul.f32 %v6047_v40, %v765_v36  ;;  %v4608_v49 = vclamps-f32 %v7235_v18, 0.99999  ;;  %v7245_v4 = vpop.f32.mrb[31].mxu0  ;;  %v9000_v22 = vclamps-f32 %v7240_v33, 0.99999 }
 0x14e   :  { %v6051_v24 = vpop.eup %6050  ;;  %v7247_v8 = vmul.f32 0.5, %v898_v39  ;;  %v859_v11 = vmul.f32 %v6049_v57, %v763_v5  ;;  %6068 = vrcp.f32 %v800_v30  ;;  %v805_v36 = vsub.f32 1.0, %v4610_v28 }
 0x14f   :  { %v6053_v12 = vpop.eup %6052  ;;  %6070 = vlog2.f32 %v861_v52  ;;  %v862_v43 = vmul.f32 %v6051_v24, %v766_v7  ;;  %v803_v46 = vsub.f32 1.0, %v4608_v49  ;;  %v769_v5 = vadd.f32 1.0, %v4606_v10 }
 0x150   :  { %v6055_v26 = vpop.eup %6054  ;;  %6072 = vlog2.f32 %v859_v11  ;;  %v860_v48 = vmul.f32 %v6053_v12, %v764_v19  ;;  %v9001_v30 = vclamps-f32 %v7245_v4, 0.99999  ;;  %v806_v7 = vsub.f32 1.0, %v9000_v22 }
 0x151   :  { %v6057_v40 = vpop.eup %6056  ;;  %v908_v47 = vmul.f32 0.6931472, %v6055_v26  ;;  %6074 = vlog2.f32 %v862_v43  ;;  %v767_v43 = vadd.f32 1.0, %v4604_v37 }
 0x152   :  { %v6059_v39 = vpop.eup %6058  ;;  %v904_v57 = vmul.f32 0.6931472, %v6057_v40  ;;  %6076 = vlog2.f32 %v860_v48  ;;  %v7259_v52 = vpop.f32.mrb[32].mxu0  ;;  %v770_v48 = vadd.f32 1.0, %v4607_v31  ;;  %v804_v15 = vsub.f32 1.0, %v9001_v30 }
 0x153   :  { %v6061_v12 = vpop.eup %6060  ;;  %v7261_v19 = vmul.f32 0.5, %v908_v47  ;;  %v865_v24 = vmul.f32 %v6059_v39, %v769_v5  ;;  %6078 = vrcp.f32 %v805_v36  ;;  %v7265_v0 = vpop.f32.mrb[33].mxu0 }
 0x154   :  { %v6063_v10 = vpop.eup %6062  ;;  %v7267_v11 = vmul.f32 0.5, %v904_v57  ;;  %v910_v26 = vmul.f32 0.6931472, %v6061_v12  ;;  %6080 = vrcp.f32 %v803_v46  ;;  %v7271_v40 = vpop.f32.mrb[34].mxu0  ;;  %v768_v46 = vadd.f32 1.0, %v4605_v62 }
 0x155   :  { %9050 = vst [vmem:[#allocation6_spill] sm:$0xff] %v7261_v19  ;;  %v6065_v22 = vpop.eup %6064  ;;  %6082 = vlog2.f32 %v865_v24  ;;  %v863_v47 = vmul.f32 %v6063_v10, %v767_v43  ;;  %v7277_v36 = vpop.f32.mrb[35].mxu0 }
 0x156   :  { %v7279_v5 = vmul.f32 0.5, %v910_v26  ;;  %v866_v39 = vmul.f32 %v6065_v22, %v770_v48  ;;  %6084 = vrcp.f32 %v806_v7 }
 0x157   :  { %v6067_v31 = vpop.eup %6066  ;;  %6086 = vlog2.f32 %v863_v47 }
 0x158   :  { %9051 = vst [vmem:[#allocation7_spill] sm:$0xff] %v7279_v5  ;;  %v6069_v57 = vpop.eup %6068  ;;  %v906_v12 = vmul.f32 0.6931472, %v6067_v31  ;;  %6088 = vlog2.f32 %v866_v39  ;;  %v773_v39 = vadd.f32 1.0, %v4610_v28 }
 0x159   :  { %v6071_v24 = vpop.eup %6070  ;;  %v864_v43 = vmul.f32 %v6069_v57, %v768_v46  ;;  %6090 = vrcp.f32 %v804_v15 }
 0x15a   :  { %v6073_v10 = vpop.eup %6072  ;;  %v7285_v37 = vmul.f32 0.5, %v906_v12  ;;  %v916_v26 = vmul.f32 0.6931472, %v6071_v24  ;;  %v7287_v22 = vpop.f32.mrb[36].mxu0  ;;  %v771_v12 = vadd.f32 1.0, %v4608_v49 }
 0x15b   :  { %v6075_v7 = vpop.eup %6074  ;;  %v912_v48 = vmul.f32 0.6931472, %v6073_v10  ;;  %6092 = vlog2.f32 %v864_v43  ;;  %v7289_v55 = vpop.f32.mrb[37].mxu0 }
 0x15c   :  { %v6077_v47 = vpop.eup %6076  ;;  %v7291_v53 = vmul.f32 0.5, %v916_v26  ;;  %v918_v62 = vmul.f32 0.6931472, %v6075_v7  ;;  %v7295_v31 = vpop.f32.mrb[38].mxu0 }
 0x15d   :  { %v6079_v15 = vpop.eup %6078  ;;  %v7297_v46 = vmul.f32 0.5, %v912_v48  ;;  %v914_v57 = vmul.f32 0.6931472, %v6077_v47  ;;  %v1084_v43 = vpop.f32.mrb[39].mxu0  ;;  %v9055_v48 = vclamps-f32 %v7240_v33, 0.99999 }
 0x15e   :  { %9052 = vst [vmem:[#allocation8_spill] sm:$0xff] %v7291_v53  ;;  %v6081_v10 = vpop.eup %6080  ;;  %v7303_v26 = vmul.f32 0.5, %v918_v62  ;;  %v869_v7 = vmul.f32 %v6079_v15, %v773_v39  ;;  %v1194_v61 = vpack.c.bf16 %v1084_v43, %v7289_v55  ;;  %v9057_v39 = vclamps-f32 %v7245_v4, 0.99999 }
 0x15f   :  { %9053 = vst [vmem:[#allocation9_spill] sm:$0xff] %v7297_v46  ;;  %v6083_v28 = vpop.eup %6082  ;;  %v7306_v30 = vmul.f32 0.5, %v914_v57  ;;  %v867_v53 = vmul.f32 %v6081_v10, %v771_v12  ;;  %v774_v47 = vadd.f32 1.0, %v9055_v48 }
 0x160   :  { %9054 = vst [vmem:[#allocation10_spill] sm:$0xff] %v7303_v26  ;;  %v6085_v46 = vpop.eup %6084  ;;  %v924_v18 = vmul.f32 0.6931472, %v6083_v28  ;;  %6094 = vlog2.f32 %v869_v7  ;;  %v772_v55 = vadd.f32 1.0, %v9057_v39 }
 0x161   :  { %v6087_v49 = vpop.eup %6086  ;;  %6096 = vlog2.f32 %v867_v53  ;;  %v870_v24 = vmul.f32 %v6085_v46, %v774_v47 }
 0x162   :  { %v6089_v5 = vpop.eup %6088  ;;  %v7310_v19 = vmul.f32 0.5, %v924_v18  ;;  %v920_v62 = vmul.f32 0.6931472, %v6087_v49  ;;  %v5664_v15 = vpop.f32.mrb[40].mxu0 }
 0x163   :  { %v6091_v57 = vpop.eup %6090  ;;  %v926_v43 = vmul.f32 0.6931472, %v6089_v5  ;;  %6098 = vlog2.f32 %v870_v24  ;;  %v1097_v12 = vpop.f32.mrb[41].mxu0 }
 0x164   :  { %9056 = vst [vmem:[#allocation11_spill] sm:$0xff] %v7310_v19  ;;  %v7314_v33 = vmul.f32 0.5, %v920_v62  ;;  %v868_v10 = vmul.f32 %v6091_v57, %v772_v55  ;;  %v5665_v28 = vpop.f32.mrb[42].mxu0 }
 0x165   :  { %v6093_v7 = vpop.eup %6092  ;;  %v7316_v48 = vmul.f32 0.5, %v926_v43  ;;  %v1197_v53 = vpack.c.bf16 %v5665_v28, %v5664_v15  ;;  %v1100_v46 = vpop.f32.mrb[43].mxu0 }
 0x166   :  { %9058 = vst [vmem:[#allocation12_spill] sm:$0xff] %v7314_v33  ;;  %v922_v47 = vmul.f32 0.6931472, %v6093_v7  ;;  %6100 = vlog2.f32 %v868_v10  ;;  %v1196_v18 = vpack.c.bf16 %v1100_v46, %v1097_v12 }
 0x167   :  { %9059 = vst [vmem:[#allocation13_spill] sm:$0xff] %v7316_v48 }
 0x168   :  { %v7318_v49 = vmul.f32 0.5, %v922_v47  ;;  %v9060_v47 = vpack.c.bf16 %v7075_v44, %v7069_v38 }
 0x16a   :  { %v6095_v4 = vpop.eup %6094  ;;  %v5668_v39 = vpop.f32.mrb[44].mxu0  ;;  %4910 = vmatprep.subr.bf16.mxu0 %v9060_v47 }
 0x16b   :  { %v6097_v19 = vpop.eup %6096  ;;  %v932_v5 = vmul.f32 0.6931472, %v6095_v4  ;;  %v1113_v24 = vpop.f32.mrb[45].mxu0 }
 0x16c   :  { %v928_v26 = vmul.f32 0.6931472, %v6097_v19  ;;  %v5669_v62 = vpop.f32.mrb[46].mxu0 }
 0x16d   :  { %v6099_v33 = vpop.eup %6098  ;;  %v7320_v55 = vmul.f32 0.5, %v932_v5  ;;  %v1199_v57 = vpack.c.bf16 %v5669_v62, %v5668_v39  ;;  %v1116_v43 = vpop.f32.mrb[47].mxu0 }
 0x16e   :  { %v7322_v48 = vmul.f32 0.5, %v928_v26  ;;  %v934_v15 = vmul.f32 0.6931472, %v6099_v33  ;;  %v1198_v28 = vpack.c.bf16 %v1116_v43, %v1113_v24 }
 0x170   :  { %v6101_v10 = vpop.eup %6100  ;;  %v7324_v12 = vmul.f32 0.5, %v934_v15 }
 0x171   :  { %v930_v7 = vmul.f32 0.6931472, %v6101_v10 }
 0x173   :  { %v7326_v46 = vmul.f32 0.5, %v930_v7 }
 0x174   :  { %6783 = dma.done.wait [#allocation3], 4096 }
 0x175   :  { %6784 = vsyncadd [#allocation3], 4294963200  ;;  %v9061_v19 = vpack.c.bf16 %v7277_v36, %v7265_v0  ;;  %v9062_v26 = vpack.c.bf16 %v7071_v41, %v7067_v34  ;;  %v9063_v33 = vpack.c.bf16 %v7271_v40, %v7259_v52  ;;  %v9064_v4 = vpack.c.bf16 %v7087_v9, %v7081_v3  ;;  %v7343_v38 = vld [vmem:[#allocation2 + $0x8] sm:$0xff]  ;;  %v7391_v52 = vld [vmem:[#allocation2 + $0x40] sm:$0xff] }
 0x176   :  { %1283 = vmatprep.mubr.bf16.mxu0 %v7343_v38  ;;  %v9065_v44 = vpack.c.bf16 %v7083_v6, %v7079_v63  ;;  %v9066_v34 = vpack.c.bf16 %v7295_v31, %v7287_v22  ;;  %v9067_v41 = vpack.c.bf16 %v7115_v50, %v7105_v35  ;;  %v9068_v3 = vpack.c.bf16 %v7110_v42, %v7099_v29  ;;  %v6102_v63 = vld [vmem:[%s8997_s4 + $0x40] sm:$0xff]   ;;  %v7369_v29 = vld [vmem:[#allocation2 + $0x18] sm:$0xff]  ;;  %v7373_v42 = vld [vmem:[#allocation2 + $0x10] sm:$0xff] }
 0x177   :  { %4911 = vmatpush3.bf16.msra.mxu0 %v9061_v19  ;;  %v9069_v9 = vpack.c.bf16 %v7157_v23, %v7143_v25  ;;  %v9070_v6 = vpack.c.bf16 %v7149_v32, %v7137_v17  ;;  %5686 = vmatprep.subr.bf16.mxu1 %v6102_v63  ;;  %v7367_v35 = vld [vmem:[#allocation2] sm:$0xff]  ;;  %v7375_v50 = vld [vmem:[#allocation2 + $0x28] sm:$0xff]  ;;  %v7381_v25 = vld [vmem:[#allocation2 + $0x38] sm:$0xff] }
 0x178   :  { %4912 = vmatprep.subr.bf16.mxu0 %v9062_v26  ;;  %5687 = vmatpush3.bf16.msra.mxu1 %v6102_v63  ;;  %v7379_v17 = vld [vmem:[#allocation2 + $0x20] sm:$0xff]  ;;  %v7385_v32 = vld [vmem:[#allocation2 + $0x30] sm:$0xff]  ;;  %v7387_v23 = vld [vmem:[#allocation2 + $0x48] sm:$0xff] }
 0x179   :  { %v7393_v0 = vld [vmem:[#allocation2 + $0x58] sm:$0xff]  ;;  %v7397_v40 = vld [vmem:[#allocation2 + $0x50] sm:$0xff]  ;;  %v7399_v36 = vld [vmem:[#allocation2 + $0x68] sm:$0xff] }
 0x17a   :  { %v7403_v22 = vld [vmem:[#allocation2 + $0x60] sm:$0xff]  ;;  %v7405_v31 = vld [vmem:[#allocation2 + $0x78] sm:$0xff]  ;;  %v7421_v5 = vld [vmem:[#allocation2 + $0x90] sm:$0xff] }
 0x17b   :  { %4913 = vmatpush3.bf16.msra.mxu0 %v9063_v33  ;;  %v7417_v39 = vld [vmem:[#allocation2 + $0x98] sm:$0xff]  ;;  %v7423_v24 = vld [vmem:[#allocation2 + $0xa8] sm:$0xff]  ;;  %v7427_v62 = vld [vmem:[#allocation2 + $0xa0] sm:$0xff] }
 0x17c   :  { %4914 = vmatprep.subr.bf16.mxu0 %v9064_v4  ;;  %v6103_v43 = vld [vmem:[%s8997_s4 + $0x48] sm:$0xff]   ;;  %v7436_v15 = vld [vmem:[#allocation2 + $0xb0] sm:$0xff]  ;;  %v6105_v7 = vld [vmem:[%s8997_s4 + $0x58] sm:$0xff]  }
 0x17d   :  { %5688 = vmatprep.subr.bf16.mxu1 %v6103_v43  ;;  %v6104_v10 = vld [vmem:[%s8997_s4 + $0x50] sm:$0xff]   ;;  %v7448_v47 = vld [vmem:[#allocation2 + $0xc0] sm:$0xff]  ;;  %v7450_v19 = vld [vmem:[#allocation2 + $0xd8] sm:$0xff] }
 0x17e   :  { %5689 = vmatpush3.bf16.msra.mxu1 %v6103_v43  ;;  %9071 = vst [vmem:[#allocation14_spill] sm:$0xff] %v7450_v19  ;;  %v6106_v26 = vld [vmem:[%s8997_s4 + $0x60] sm:$0xff]   ;;  %v6107_v33 = vld [vmem:[%s8997_s4 + $0x68] sm:$0xff]   ;;  %v7460_v4 = vld [vmem:[#allocation2 + $0xd0] sm:$0xff] }
 0x17f   :  { %4915 = vmatpush3.bf16.msra.mxu0 %v1194_v61  ;;  %v7409_v61 = vld [vmem:[#allocation2 + $0x70] sm:$0xff]  ;;  %5690 = vmatprep.subr.bf16.mxu1 %v6104_v10  ;;  %9072 = vst [vmem:[#allocation15_spill] sm:$0xff] %v7460_v4  ;;  %v7484_v43 = vld [vmem:[%s8998_s5] ss:$0 sm:$0xff] }
 0x180   :  { %4916 = vmatprep.subr.bf16.mxu0 %v9065_v44  ;;  %v7462_v44 = vld [vmem:[#allocation2 + $0xe8] sm:$0xff]  ;;  %v7478_v63 = vld [vmem:[#allocation2 + $0xf0] sm:$0xff] }
 0x181   :  { %9073 = vst [vmem:[#allocation16_spill] sm:$0xff] %v7462_v44  ;;  %9076 = vst [vmem:[#allocation19_spill] sm:$0xff] %v7478_v63 }
 0x182   :  { %5691 = vmatpush3.bf16.msra.mxu1 %v6104_v10 }
 0x183   :  { %4917 = vmatpush3.bf16.msra.mxu0 %v9066_v34  ;;  %5692 = vmatprep.subr.bf16.mxu1 %v6105_v7  ;;  %v6108_v34 = vld [vmem:[%s8997_s4 + $0x70] sm:$0xff]  }
 0x184   :  { %4918 = vmatprep.subr.bf16.mxu0 %v9067_v41  ;;  %v6109_v41 = vld [vmem:[%s8997_s4 + $0x78] sm:$0xff]  }
 0x186   :  { %5693 = vmatpush3.bf16.msra.mxu1 %v6105_v7 }
 0x187   :  { %4919 = vmatpush3.bf16.msra.mxu0 %v1196_v18  ;;  %v7415_v18 = vld [vmem:[#allocation2 + $0x80] sm:$0xff]  ;;  %5694 = vmatprep.subr.bf16.mxu1 %v6106_v26 }
 0x188   :  { %4920 = vmatprep.subr.bf16.mxu0 %v9068_v3  ;;  %v7472_v3 = vld [vmem:[#allocation2 + $0xe0] sm:$0xff] }
 0x189   :  { %9074 = vst [vmem:[#allocation17_spill] sm:$0xff] %v7472_v3 }
 0x18a   :  { %5695 = vmatpush3.bf16.msra.mxu1 %v6106_v26 }
 0x18b   :  { %4921 = vmatpush3.bf16.msra.mxu0 %v1197_v53  ;;  %v7411_v53 = vld [vmem:[#allocation2 + $0x88] sm:$0xff]  ;;  %5696 = vmatprep.subr.bf16.mxu1 %v6107_v33 }
 0x18c   :  { %4922 = vmatprep.subr.bf16.mxu0 %v9069_v9  ;;  %v7474_v9 = vld [vmem:[#allocation2 + $0xf8] sm:$0xff] }
 0x18d   :  { %9075 = vst [vmem:[#allocation18_spill] sm:$0xff] %v7474_v9 }
 0x18e   :  { %5697 = vmatpush3.bf16.msra.mxu1 %v6107_v33 }
 0x18f   :  { %4923 = vmatpush3.bf16.msra.mxu0 %v1198_v28  ;;  %v7438_v28 = vld [vmem:[#allocation2 + $0xc8] sm:$0xff]  ;;  %5698 = vmatprep.subr.bf16.mxu1 %v6108_v34 }
 0x190   :  { %4924 = vmatprep.subr.bf16.mxu0 %v9070_v6 }
 0x192   :  { %5699 = vmatpush3.bf16.msra.mxu1 %v6108_v34 }
 0x193   :  { %4925 = vmatpush3.bf16.msra.mxu0 %v1199_v57  ;;  %v7429_v57 = vld [vmem:[#allocation2 + $0xb8] sm:$0xff]  ;;  %5700 = vmatprep.subr.bf16.mxu1 %v6109_v41 }
 0x196   :  { %1284 = vmatmul.mubr.bf16.vlgmr.msra.gmra.mrb[48].mxu0 %v7367_v35  ;;  %5701 = vmatpush3.bf16.msra.mxu1 %v6109_v41 }
 0x197   :  { %1291 = vmatprep.mubr.bf16.mxu0 %v7369_v29 }
 0x19e   :  { %1292 = vmatmul.mubr.bf16.gmra.mrb[52].mxu0 %v7373_v42 }
 0x19f   :  { %1299 = vmatprep.mubr.bf16.mxu0 %v7375_v50 }
 0x1a6   :  { %1300 = vmatmul.mubr.bf16.gmra.mrb[56].mxu0 %v7379_v17 }
 0x1a7   :  { %1307 = vmatprep.mubr.bf16.mxu0 %v7381_v25 }
 0x1ae   :  { %1308 = vmatmul.mubr.bf16.gmra.mrb[60].mxu0 %v7385_v32 }
 0x1af   :  { %1315 = vmatprep.mubr.bf16.mxu0 %v7387_v23 }
 0x1b6   :  { %1316 = vmatmul.mubr.bf16.gmra.mrb[64].mxu0 %v7391_v52 }
 0x1b7   :  { %1323 = vmatprep.mubr.bf16.mxu0 %v7393_v0 }
 0x1be   :  { %1324 = vmatmul.mubr.bf16.gmra.mrb[68].mxu0 %v7397_v40 }
 0x1bf   :  { %1331 = vmatprep.mubr.bf16.mxu0 %v7399_v36 }
 0x1c6   :  { %1332 = vmatmul.mubr.bf16.gmra.mrb[72].mxu0 %v7403_v22 }
 0x1c7   :  { %1339 = vmatprep.mubr.bf16.mxu0 %v7405_v31 }
 0x1ce   :  { %1340 = vmatmul.mubr.bf16.gmra.mrb[76].mxu0 %v7409_v61 }
 0x1cf   :  { %1347 = vmatprep.mubr.bf16.mxu0 %v7411_v53 }
 0x1d6   :  { %1348 = vmatmul.mubr.bf16.gmra.mrb[80].mxu0 %v7415_v18 }
 0x1d7   :  { %1355 = vmatprep.mubr.bf16.mxu0 %v7417_v39 }
 0x1de   :  { %1356 = vmatmul.mubr.bf16.gmra.mrb[84].mxu0 %v7421_v5 }
 0x1df   :  { %1363 = vmatprep.mubr.bf16.mxu0 %v7423_v24 }
 0x1e6   :  { %1364 = vmatmul.mubr.bf16.gmra.mrb[88].mxu0 %v7427_v62 }
 0x1e7   :  { %1371 = vmatprep.mubr.bf16.mxu0 %v7429_v57 }
 0x1ee   :  { %1372 = vmatmul.mubr.bf16.gmra.mrb[92].mxu0 %v7436_v15 }
 0x1ef   :  { %1379 = vmatprep.mubr.bf16.mxu0 %v7438_v28 }
 0x1f6   :  { %1380 = vmatmul.mubr.bf16.gmra.mrb[96].mxu0 %v7448_v47 }
 0x1f7   :  { %1387 = vmatprep.mubr.bf16.mxu0 %v7450_v19 }
 0x1fe   :  { %1388 = vmatmul.mubr.bf16.gmra.mrb[100].mxu0 %v7460_v4 }
 0x1ff   :  { %1395 = vmatprep.mubr.bf16.mxu0 %v7462_v44 }
 0x206   :  { %1396 = vmatmul.mubr.bf16.gmra.mrb[104].mxu0 %v7472_v3 }
 0x207   :  { %1403 = vmatprep.mubr.bf16.mxu0 %v7474_v9 }
 0x20e   :  { %1404 = vmatmul.mubr.bf16.gmra.mrb[108].mxu0 %v7478_v63 }
 0x269   :  { %v4926_v6 = vpop.f32.mrb[48].mxu0 }
 0x26a   :  { %v4927_v10 = vpop.f32.mrb[49].mxu0 }
 0x26b   :  { %v4928_v7 = vadd.f32 %v4927_v10, %v4926_v6  ;;  %v4929_v26 = vpop.f32.mrb[50].mxu0 }
 0x26c   :  { %v4930_v33 = vpop.f32.mrb[51].mxu0 }
 0x26d   :  { %v1286_v34 = vadd.f32 %v4928_v7, %v7484_v43  ;;  %v4931_v41 = vadd.f32 %v4930_v33, %v4929_v26 }
 0x26f   :  { %v7488_v3 = vadd.f32 %v1286_v34, %v7119_v60  ;;  %v1289_v9 = vadd.f32 %v4931_v41, %v7484_v43 }
 0x271   :  { %v7492_v63 = vadd.f32 %v1289_v9, %v7132_v13  ;;  %v4932_v44 = vpop.f32.mrb[52].mxu0  ;;  %6142 = vtanh.f32 %v7488_v3 }
 0x272   :  { %v4933_v4 = vpop.f32.mrb[53].mxu0 }
 0x273   :  { %9077 = vst [vmem:[#allocation20_spill] sm:$0xff] %v7492_v63  ;;  %6144 = vtanh.f32 %v7492_v63  ;;  %v4934_v6 = vadd.f32 %v4933_v4, %v4932_v44  ;;  %v4935_v10 = vpop.f32.mrb[54].mxu0 }
 0x274   :  { %v4936_v19 = vpop.f32.mrb[55].mxu0 }
 0x275   :  { %v1294_v7 = vadd.f32 %v4934_v6, %v7484_v43  ;;  %v4937_v26 = vadd.f32 %v4936_v19, %v4935_v10 }
 0x277   :  { %v7498_v60 = vadd.f32 %v1294_v7, %v7117_v56  ;;  %v1297_v33 = vadd.f32 %v4937_v26, %v7484_v43 }
 0x279   :  { %v7502_v13 = vadd.f32 %v1297_v33, %v7125_v2  ;;  %v4938_v9 = vpop.f32.mrb[56].mxu0  ;;  %6146 = vtanh.f32 %v7498_v60 }
 0x27a   :  { %v4939_v34 = vpop.f32.mrb[57].mxu0 }
 0x27b   :  { %9078 = vst [vmem:[#allocation21_spill] sm:$0xff] %v7502_v13  ;;  %6148 = vtanh.f32 %v7502_v13  ;;  %v4940_v4 = vadd.f32 %v4939_v34, %v4938_v9  ;;  %v4941_v44 = vpop.f32.mrb[58].mxu0  ;;  %v6143_v41 = vpop.eup %6142 }
 0x27c   :  { %v4942_v63 = vpop.f32.mrb[59].mxu0 }
 0x27d   :  { %v6145_v6 = vpop.eup %6144  ;;  %v1302_v19 = vadd.f32 %v4940_v4, %v7484_v43  ;;  %v4943_v56 = vadd.f32 %v4942_v63, %v4941_v44 }
 0x27e   :  { %v1540_v10 = vpack.c.bf16 %v6145_v6, %v6143_v41 }
 0x27f   :  { %v7508_v7 = vadd.f32 %v1302_v19, %v7161_v59  ;;  %v1305_v2 = vadd.f32 %v4943_v56, %v7484_v43 }
 0x280   :  { %5702 = vmatprep.mubr.bf16.mxu1 %v1540_v10 }
 0x281   :  { %v7512_v26 = vadd.f32 %v1305_v2, %v7175_v20  ;;  %v4944_v33 = vpop.f32.mrb[60].mxu0  ;;  %6150 = vtanh.f32 %v7508_v7 }
 0x282   :  { %v4945_v9 = vpop.f32.mrb[61].mxu0 }
 0x283   :  { %6152 = vtanh.f32 %v7512_v26  ;;  %v4946_v34 = vadd.f32 %v4945_v9, %v4944_v33  ;;  %v4947_v13 = vpop.f32.mrb[62].mxu0  ;;  %v6147_v4 = vpop.eup %6146 }
 0x284   :  { %v4948_v63 = vpop.f32.mrb[63].mxu0 }
 0x285   :  { %v6149_v44 = vpop.eup %6148  ;;  %v1310_v59 = vadd.f32 %v4946_v34, %v7484_v43  ;;  %v4949_v41 = vadd.f32 %v4948_v63, %v4947_v13 }
 0x286   :  { %v1541_v6 = vpack.c.bf16 %v6149_v44, %v6147_v4 }
 0x287   :  { %v7518_v19 = vadd.f32 %v1310_v59, %v7159_v54  ;;  %v1313_v20 = vadd.f32 %v4949_v41, %v7484_v43 }
 0x288   :  { %5703 = vmatmul.mubr.bf16.vlgmr.msra.gmra.mrb[16].mxu1 %v1541_v6 }
 0x289   :  { %v7522_v56 = vadd.f32 %v1313_v20, %v7167_v1  ;;  %v4950_v10 = vpop.f32.mrb[64].mxu0  ;;  %6154 = vtanh.f32 %v7518_v19 }
 0x28a   :  { %v4951_v2 = vpop.f32.mrb[65].mxu0 }
 0x28b   :  { %6156 = vtanh.f32 %v7522_v56  ;;  %v4952_v33 = vadd.f32 %v4951_v2, %v4950_v10  ;;  %v4953_v9 = vpop.f32.mrb[66].mxu0  ;;  %v6151_v34 = vpop.eup %6150 }
 0x28c   :  { %v4954_v13 = vpop.f32.mrb[67].mxu0 }
 0x28d   :  { %v6153_v4 = vpop.eup %6152  ;;  %v1318_v54 = vadd.f32 %v4952_v33, %v7484_v43  ;;  %v4955_v63 = vadd.f32 %v4954_v13, %v4953_v9 }
 0x28e   :  { %v1542_v44 = vpack.c.bf16 %v6153_v4, %v6151_v34 }
 0x28f   :  { %v7528_v59 = vadd.f32 %v1318_v54, %v7199_v21  ;;  %v1321_v1 = vadd.f32 %v4955_v63, %v7484_v43 }
 0x290   :  { %5706 = vmatprep.mubr.bf16.mxu1 %v1542_v44 }
 0x291   :  { %v7532_v41 = vadd.f32 %v1321_v1, %v7209_v58  ;;  %v4956_v6 = vpop.f32.mrb[68].mxu0  ;;  %6158 = vtanh.f32 %v7528_v59 }
 0x292   :  { %v4957_v20 = vpop.f32.mrb[69].mxu0 }
 0x293   :  { %6160 = vtanh.f32 %v7532_v41  ;;  %v4958_v10 = vadd.f32 %v4957_v20, %v4956_v6  ;;  %v4959_v2 = vpop.f32.mrb[70].mxu0  ;;  %v6155_v33 = vpop.eup %6154 }
 0x294   :  { %v4960_v9 = vpop.f32.mrb[71].mxu0 }
 0x295   :  { %v6157_v34 = vpop.eup %6156  ;;  %v1326_v21 = vadd.f32 %v4958_v10, %v7484_v43  ;;  %v4961_v13 = vadd.f32 %v4960_v9, %v4959_v2 }
 0x296   :  { %v1543_v4 = vpack.c.bf16 %v6157_v34, %v6155_v33 }
 0x297   :  { %v7538_v54 = vadd.f32 %v1326_v21, %v7193_v14  ;;  %v1329_v58 = vadd.f32 %v4961_v13, %v7484_v43 }
 0x298   :  { %5707 = vmatmul.mubr.bf16.gmra.mrb[20].mxu1 %v1543_v4 }
 0x299   :  { %v7542_v63 = vadd.f32 %v1329_v58, %v7204_v51  ;;  %v4962_v44 = vpop.f32.mrb[72].mxu0  ;;  %6162 = vtanh.f32 %v7538_v54 }
 0x29a   :  { %v4963_v1 = vpop.f32.mrb[73].mxu0 }
 0x29b   :  { %6164 = vtanh.f32 %v7542_v63  ;;  %v4964_v6 = vadd.f32 %v4963_v1, %v4962_v44  ;;  %v4965_v20 = vpop.f32.mrb[74].mxu0  ;;  %v6159_v10 = vpop.eup %6158 }
 0x29c   :  { %v4966_v2 = vpop.f32.mrb[75].mxu0 }
 0x29d   :  { %v6161_v33 = vpop.eup %6160  ;;  %v1334_v14 = vadd.f32 %v4964_v6, %v7484_v43  ;;  %v4967_v9 = vadd.f32 %v4966_v2, %v4965_v20 }
 0x29e   :  { %v1544_v34 = vpack.c.bf16 %v6161_v33, %v6159_v10 }
 0x29f   :  { %v7548_v21 = vadd.f32 %v1334_v14, %v7231_v45  ;;  %v1337_v51 = vadd.f32 %v4967_v9, %v7484_v43 }
 0x2a0   :  { %5710 = vmatprep.mubr.bf16.mxu1 %v1544_v34 }
 0x2a1   :  { %v7552_v13 = vadd.f32 %v1337_v51, %v7247_v8  ;;  %v4968_v4 = vpop.f32.mrb[76].mxu0  ;;  %6166 = vtanh.f32 %v7548_v21 }
 0x2a2   :  { %v4969_v58 = vpop.f32.mrb[77].mxu0 }
 0x2a3   :  { %6168 = vtanh.f32 %v7552_v13  ;;  %v4970_v44 = vadd.f32 %v4969_v58, %v4968_v4  ;;  %v4971_v1 = vpop.f32.mrb[78].mxu0  ;;  %v6163_v6 = vpop.eup %6162 }
 0x2a4   :  { %v4972_v20 = vpop.f32.mrb[79].mxu0 }
 0x2a5   :  { %v6165_v10 = vpop.eup %6164  ;;  %v1342_v45 = vadd.f32 %v4970_v44, %v7484_v43  ;;  %v4973_v2 = vadd.f32 %v4972_v20, %v4971_v1 }
 0x2a6   :  { %v1545_v33 = vpack.c.bf16 %v6165_v10, %v6163_v6 }
 0x2a7   :  { %v7558_v14 = vadd.f32 %v1342_v45, %v7225_v27  ;;  %v1345_v8 = vadd.f32 %v4973_v2, %v7484_v43 }
 0x2a8   :  { %5711 = vmatmul.mubr.bf16.gmra.mrb[24].mxu1 %v1545_v33 }
 0x2a9   :  { %v7562_v9 = vadd.f32 %v1345_v8, %v7237_v16  ;;  %v4974_v34 = vpop.f32.mrb[80].mxu0  ;;  %6170 = vtanh.f32 %v7558_v14 }
 0x2aa   :  { %v4975_v51 = vpop.f32.mrb[81].mxu0 }
 0x2ab   :  { %6172 = vtanh.f32 %v7562_v9  ;;  %v4976_v4 = vadd.f32 %v4975_v51, %v4974_v34  ;;  %v4977_v58 = vpop.f32.mrb[82].mxu0  ;;  %v6167_v44 = vpop.eup %6166 }
 0x2ac   :  { %v4978_v1 = vpop.f32.mrb[83].mxu0 }
 0x2ad   :  { %v6169_v6 = vpop.eup %6168  ;;  %v1350_v27 = vadd.f32 %v4976_v4, %v7484_v43  ;;  %v4979_v20 = vadd.f32 %v4978_v1, %v4977_v58 }
 0x2ae   :  { %v1546_v10 = vpack.c.bf16 %v6169_v6, %v6167_v44 }
 0x2af   :  { %v7568_v45 = vadd.f32 %v1350_v27, %v7267_v11  ;;  %v1353_v16 = vadd.f32 %v4979_v20, %v7484_v43  ;;  %v9081_v27 = vld [vmem:[#allocation6_spill] sm:$0xff] }
 0x2b0   :  { %5714 = vmatprep.mubr.bf16.mxu1 %v1546_v10  ;;  %v9083_v10 = vld [vmem:[#allocation7_spill] sm:$0xff] }
 0x2b1   :  { %9079 = vst [vmem:[#allocation22_spill] sm:$0xff] %v7568_v45  ;;  %v7572_v2 = vadd.f32 %v1353_v16, %v7285_v37  ;;  %v4980_v33 = vpop.f32.mrb[84].mxu0  ;;  %6174 = vtanh.f32 %v7568_v45 }
 0x2b2   :  { %v4981_v8 = vpop.f32.mrb[85].mxu0 }
 0x2b3   :  { %9080 = vst [vmem:[#allocation23_spill] sm:$0xff] %v7572_v2  ;;  %6176 = vtanh.f32 %v7572_v2  ;;  %v4982_v34 = vadd.f32 %v4981_v8, %v4980_v33  ;;  %v4983_v51 = vpop.f32.mrb[86].mxu0  ;;  %v6171_v4 = vpop.eup %6170 }
 0x2b4   :  { %v4984_v58 = vpop.f32.mrb[87].mxu0 }
 0x2b5   :  { %v6173_v44 = vpop.eup %6172  ;;  %v1358_v11 = vadd.f32 %v4982_v34, %v7484_v43  ;;  %v4985_v1 = vadd.f32 %v4984_v58, %v4983_v51 }
 0x2b6   :  { %v1547_v6 = vpack.c.bf16 %v6173_v44, %v6171_v4 }
 0x2b7   :  { %v7578_v20 = vadd.f32 %v1358_v11, %v9081_v27  ;;  %v1361_v37 = vadd.f32 %v4985_v1, %v7484_v43  ;;  %v9085_v1 = vld [vmem:[#allocation9_spill] sm:$0xff] }
 0x2b8   :  { %5715 = vmatmul.mubr.bf16.gmra.mrb[28].mxu1 %v1547_v6 }
 0x2b9   :  { %9082 = vst [vmem:[#allocation6_spill] sm:$0xff] %v7578_v20  ;;  %v7582_v16 = vadd.f32 %v1361_v37, %v9083_v10  ;;  %v4986_v45 = vpop.f32.mrb[88].mxu0  ;;  %6178 = vtanh.f32 %v7578_v20 }
 0x2ba   :  { %v4987_v33 = vpop.f32.mrb[89].mxu0 }
 0x2bb   :  { %9084 = vst [vmem:[#allocation7_spill] sm:$0xff] %v7582_v16  ;;  %6180 = vtanh.f32 %v7582_v16  ;;  %v4988_v8 = vadd.f32 %v4987_v33, %v4986_v45  ;;  %v4989_v2 = vpop.f32.mrb[90].mxu0  ;;  %v6175_v34 = vpop.eup %6174 }
 0x2bc   :  { %v4990_v51 = vpop.f32.mrb[91].mxu0 }
 0x2bd   :  { %v6177_v4 = vpop.eup %6176  ;;  %v1366_v58 = vadd.f32 %v4988_v8, %v7484_v43  ;;  %v4991_v44 = vadd.f32 %v4990_v51, %v4989_v2 }
 0x2be   :  { %v1548_v11 = vpack.c.bf16 %v6177_v4, %v6175_v34 }
 0x2bf   :  { %v7588_v6 = vadd.f32 %v1366_v58, %v9085_v1  ;;  %v1369_v27 = vadd.f32 %v4991_v44, %v7484_v43  ;;  %v9088_v44 = vld [vmem:[#allocation8_spill] sm:$0xff]  ;;  %v9090_v1 = vld [vmem:[#allocation10_spill] sm:$0xff] }
 0x2c0   :  { %5718 = vmatprep.mubr.bf16.mxu1 %v1548_v11 }
 0x2c1   :  { %9086 = vst [vmem:[#allocation9_spill] sm:$0xff] %v7588_v6  ;;  %v7592_v37 = vadd.f32 %v1369_v27, %v7306_v30  ;;  %v4992_v10 = vpop.f32.mrb[92].mxu0  ;;  %6182 = vtanh.f32 %v7588_v6 }
 0x2c2   :  { %v4993_v45 = vpop.f32.mrb[93].mxu0 }
 0x2c3   :  { %9087 = vst [vmem:[#allocation24_spill] sm:$0xff] %v7592_v37  ;;  %6184 = vtanh.f32 %v7592_v37  ;;  %v4994_v33 = vadd.f32 %v4993_v45, %v4992_v10  ;;  %v4995_v16 = vpop.f32.mrb[94].mxu0  ;;  %v6179_v8 = vpop.eup %6178 }
 0x2c4   :  { %v4996_v2 = vpop.f32.mrb[95].mxu0 }
 0x2c5   :  { %v6181_v34 = vpop.eup %6180  ;;  %v1374_v51 = vadd.f32 %v4994_v33, %v7484_v43  ;;  %v4997_v4 = vadd.f32 %v4996_v2, %v4995_v16 }
 0x2c6   :  { %v1549_v58 = vpack.c.bf16 %v6181_v34, %v6179_v8 }
 0x2c7   :  { %v7598_v11 = vadd.f32 %v1374_v51, %v9088_v44  ;;  %v1377_v30 = vadd.f32 %v4997_v4, %v7484_v43  ;;  %v9092_v4 = vld [vmem:[#allocation12_spill] sm:$0xff] }
 0x2c8   :  { %5719 = vmatmul.mubr.bf16.gmra.mrb[32].mxu1 %v1549_v58 }
 0x2c9   :  { %9089 = vst [vmem:[#allocation8_spill] sm:$0xff] %v7598_v11  ;;  %v7602_v27 = vadd.f32 %v1377_v30, %v9090_v1  ;;  %v4998_v6 = vpop.f32.mrb[96].mxu0  ;;  %6186 = vtanh.f32 %v7598_v11 }
 0x2ca   :  { %v4999_v10 = vpop.f32.mrb[97].mxu0 }
 0x2cb   :  { %9091 = vst [vmem:[#allocation10_spill] sm:$0xff] %v7602_v27  ;;  %6188 = vtanh.f32 %v7602_v27  ;;  %v5000_v45 = vadd.f32 %v4999_v10, %v4998_v6  ;;  %v5001_v37 = vpop.f32.mrb[98].mxu0  ;;  %v6183_v33 = vpop.eup %6182 }
 0x2cc   :  { %v5002_v16 = vpop.f32.mrb[99].mxu0 }
 0x2cd   :  { %v6185_v8 = vpop.eup %6184  ;;  %v1382_v2 = vadd.f32 %v5000_v45, %v7484_v43  ;;  %v5003_v34 = vadd.f32 %v5002_v16, %v5001_v37 }
 0x2ce   :  { %v1550_v51 = vpack.c.bf16 %v6185_v8, %v6183_v33 }
 0x2cf   :  { %v7608_v58 = vadd.f32 %v1382_v2, %v9092_v4  ;;  %v1385_v44 = vadd.f32 %v5003_v34, %v7484_v43  ;;  %v9095_v34 = vld [vmem:[#allocation11_spill] sm:$0xff]  ;;  %v9097_v4 = vld [vmem:[#allocation13_spill] sm:$0xff] }
 0x2d0   :  { %5722 = vmatprep.mubr.bf16.mxu1 %v1550_v51 }
 0x2d1   :  { %9093 = vst [vmem:[#allocation12_spill] sm:$0xff] %v7608_v58  ;;  %v7612_v30 = vadd.f32 %v1385_v44, %v7318_v49  ;;  %v5004_v1 = vpop.f32.mrb[100].mxu0  ;;  %6190 = vtanh.f32 %v7608_v58 }
 0x2d2   :  { %v5005_v6 = vpop.f32.mrb[101].mxu0 }
 0x2d3   :  { %9094 = vst [vmem:[#allocation25_spill] sm:$0xff] %v7612_v30  ;;  %6192 = vtanh.f32 %v7612_v30  ;;  %v5006_v10 = vadd.f32 %v5005_v6, %v5004_v1  ;;  %v5007_v27 = vpop.f32.mrb[102].mxu0  ;;  %v6187_v45 = vpop.eup %6186 }
 0x2d4   :  { %v5008_v37 = vpop.f32.mrb[103].mxu0 }
 0x2d5   :  { %v6189_v33 = vpop.eup %6188  ;;  %v1390_v16 = vadd.f32 %v5006_v10, %v7484_v43  ;;  %v5009_v8 = vadd.f32 %v5008_v37, %v5007_v27 }
 0x2d6   :  { %v1551_v2 = vpack.c.bf16 %v6189_v33, %v6187_v45 }
 0x2d7   :  { %v7618_v51 = vadd.f32 %v1390_v16, %v9095_v34  ;;  %v1393_v49 = vadd.f32 %v5009_v8, %v7484_v43 }
 0x2d8   :  { %5723 = vmatmul.mubr.bf16.gmra.mrb[36].mxu1 %v1551_v2 }
 0x2d9   :  { %9096 = vst [vmem:[#allocation11_spill] sm:$0xff] %v7618_v51  ;;  %v7622_v44 = vadd.f32 %v1393_v49, %v9097_v4  ;;  %v5010_v58 = vpop.f32.mrb[104].mxu0  ;;  %6194 = vtanh.f32 %v7618_v51 }
 0x2da   :  { %v5011_v1 = vpop.f32.mrb[105].mxu0 }
 0x2db   :  { %9098 = vst [vmem:[#allocation13_spill] sm:$0xff] %v7622_v44  ;;  %6196 = vtanh.f32 %v7622_v44  ;;  %v5012_v6 = vadd.f32 %v5011_v1, %v5010_v58  ;;  %v5013_v30 = vpop.f32.mrb[106].mxu0  ;;  %v6191_v10 = vpop.eup %6190 }
 0x2dc   :  { %v5014_v27 = vpop.f32.mrb[107].mxu0 }
 0x2dd   :  { %v6193_v45 = vpop.eup %6192  ;;  %v1398_v37 = vadd.f32 %v5012_v6, %v7484_v43  ;;  %v5015_v33 = vadd.f32 %v5014_v27, %v5013_v30 }
 0x2de   :  { %v1552_v16 = vpack.c.bf16 %v6193_v45, %v6191_v10 }
 0x2df   :  { %v7628_v8 = vadd.f32 %v1398_v37, %v7322_v48  ;;  %v1401_v2 = vadd.f32 %v5015_v33, %v7484_v43 }
 0x2e0   :  { %5726 = vmatprep.mubr.bf16.mxu1 %v1552_v16 }
 0x2e1   :  { %9099 = vst [vmem:[#allocation26_spill] sm:$0xff] %v7628_v8  ;;  %v7632_v34 = vadd.f32 %v1401_v2, %v7326_v46  ;;  %v5016_v49 = vpop.f32.mrb[108].mxu0  ;;  %6198 = vtanh.f32 %v7628_v8 }
 0x2e2   :  { %v5017_v58 = vpop.f32.mrb[109].mxu0 }
 0x2e3   :  { %9100 = vst [vmem:[#allocation27_spill] sm:$0xff] %v7632_v34  ;;  %6200 = vtanh.f32 %v7632_v34  ;;  %v5018_v4 = vadd.f32 %v5017_v58, %v5016_v49  ;;  %v5019_v1 = vpop.f32.mrb[110].mxu0  ;;  %v6195_v6 = vpop.eup %6194 }
 0x2e4   :  { %v5020_v30 = vpop.f32.mrb[111].mxu0 }
 0x2e5   :  { %v6197_v10 = vpop.eup %6196  ;;  %v1406_v48 = vadd.f32 %v5018_v4, %v7484_v43  ;;  %v5021_v27 = vadd.f32 %v5020_v30, %v5019_v1 }
 0x2e6   :  { %v1553_v45 = vpack.c.bf16 %v6197_v10, %v6195_v6 }
 0x2e7   :  { %v7638_v37 = vadd.f32 %v1406_v48, %v7320_v55  ;;  %v1409_v46 = vadd.f32 %v5021_v27, %v7484_v43 }
 0x2e8   :  { %5727 = vmatmul.mubr.bf16.gmra.mrb[40].mxu1 %v1553_v45 }
 0x2e9   :  { %9101 = vst [vmem:[#allocation28_spill] sm:$0xff] %v7638_v37  ;;  %v7642_v33 = vadd.f32 %v1409_v46, %v7324_v12  ;;  %6202 = vtanh.f32 %v7638_v37 }
 0x2eb   :  { %9102 = vst [vmem:[#allocation29_spill] sm:$0xff] %v7642_v33  ;;  %6204 = vtanh.f32 %v7642_v33  ;;  %v6199_v16 = vpop.eup %6198 }
 0x2ed   :  { %v6201_v2 = vpop.eup %6200 }
 0x2ee   :  { %v1554_v49 = vpack.c.bf16 %v6201_v2, %v6199_v16 }
 0x2f0   :  { %5730 = vmatprep.mubr.bf16.mxu1 %v1554_v49 }
 0x2f3   :  { %v6203_v58 = vpop.eup %6202 }
 0x2f5   :  { %v6205_v4 = vpop.eup %6204 }
 0x2f6   :  { %v1555_v1 = vpack.c.bf16 %v6205_v4, %v6203_v58 }
 0x2f8   :  { %5731 = vmatmul.mubr.bf16.gmra.mrb[44].mxu1 %v1555_v1 }
 0x2f9   :  { %1838 = vmatprep.mubr.bf16.mxu1 %v7343_v38 }
 0x35b   :  { %v5704_v55 = vpop.f32.mrb[16].mxu1 }
 0x35c   :  { %v1655_v43 = vpop.f32.mrb[17].mxu1 }
 0x35d   :  { %v5705_v6 = vpop.f32.mrb[18].mxu1 }
 0x35e   :  { %v1783_v30 = vpack.c.bf16 %v5705_v6, %v5704_v55  ;;  %v1658_v12 = vpop.f32.mrb[19].mxu1 }
 0x35f   :  { %v1782_v10 = vpack.c.bf16 %v1658_v12, %v1655_v43 }
 0x36b   :  { %v5708_v48 = vpop.f32.mrb[20].mxu1 }
 0x36c   :  { %v1671_v27 = vpop.f32.mrb[21].mxu1 }
 0x36d   :  { %v5709_v45 = vpop.f32.mrb[22].mxu1 }
 0x36e   :  { %v1785_v46 = vpack.c.bf16 %v5709_v45, %v5708_v48  ;;  %v1674_v33 = vpop.f32.mrb[23].mxu1 }
 0x36f   :  { %v1784_v37 = vpack.c.bf16 %v1674_v33, %v1671_v27 }
 0x37b   :  { %v5712_v16 = vpop.f32.mrb[24].mxu1 }
 0x37c   :  { %v1687_v2 = vpop.f32.mrb[25].mxu1 }
 0x37d   :  { %v5713_v49 = vpop.f32.mrb[26].mxu1 }
 0x37e   :  { %v1787_v34 = vpack.c.bf16 %v5713_v49, %v5712_v16  ;;  %v1690_v58 = vpop.f32.mrb[27].mxu1 }
 0x37f   :  { %v1786_v4 = vpack.c.bf16 %v1690_v58, %v1687_v2 }
 0x38b   :  { %v5716_v1 = vpop.f32.mrb[28].mxu1 }
 0x38c   :  { %v1703_v38 = vpop.f32.mrb[29].mxu1 }
 0x38d   :  { %v5717_v8 = vpop.f32.mrb[30].mxu1 }
 0x38e   :  { %v1789_v44 = vpack.c.bf16 %v5717_v8, %v5716_v1  ;;  %v1706_v51 = vpop.f32.mrb[31].mxu1 }
 0x38f   :  { %v1788_v55 = vpack.c.bf16 %v1706_v51, %v1703_v38 }
 0x39b   :  { %v5720_v6 = vpop.f32.mrb[32].mxu1 }
 0x39c   :  { %v1719_v43 = vpop.f32.mrb[33].mxu1 }
 0x39d   :  { %v5721_v12 = vpop.f32.mrb[34].mxu1 }
 0x39e   :  { %v1791_v11 = vpack.c.bf16 %v5721_v12, %v5720_v6  ;;  %v1722_v20 = vpop.f32.mrb[35].mxu1 }
 0x39f   :  { %v1790_v48 = vpack.c.bf16 %v1722_v20, %v1719_v43 }
 0x3a1   :  { %5046 = vmatprep.subr.bf16.mxu1 %v1790_v48 }
 0x3a2   :  { %5047 = vmatpush3.bf16.msra.mxu1 %v1782_v10 }
 0x3a3   :  { %5048 = vmatprep.subr.bf16.mxu1 %v1791_v11 }
 0x3a6   :  { %5049 = vmatpush3.bf16.msra.mxu1 %v1783_v30 }
 0x3ab   :  { %v5724_v33 = vpop.f32.mrb[36].mxu1 }
 0x3ac   :  { %v1735_v27 = vpop.f32.mrb[37].mxu1 }
 0x3ad   :  { %v5725_v45 = vpop.f32.mrb[38].mxu1 }
 0x3ae   :  { %v1793_v16 = vpack.c.bf16 %v5725_v45, %v5724_v33  ;;  %v1738_v2 = vpop.f32.mrb[39].mxu1  ;;  %v4623_v33 = vclamps-f32 %v7498_v60, 6.103034 }
 0x3af   :  { %v1792_v49 = vpack.c.bf16 %v1738_v2, %v1735_v27 }
 0x3b1   :  { %5050 = vmatprep.subr.bf16.mxu1 %v1792_v49 }
 0x3b2   :  { %5051 = vmatpush3.bf16.msra.mxu1 %v1784_v37  ;;  %v6110_v37 = vld [vmem:[%s8997_s4 + $0x80] sm:$0xff]  }
 0x3b3   :  { %5052 = vmatprep.subr.bf16.mxu1 %v1793_v16  ;;  %5734 = vmatprep.subr.bf16.mxu0 %v6110_v37  ;;  %v9110_v16 = vld [vmem:[#allocation21_spill] sm:$0xff] }
 0x3b4   :  { %5735 = vmatpush3.bf16.msra.mxu0 %v6110_v37  ;;  %v4624_v2 = vclamps-f32 %v9110_v16, 6.103034  ;;  %v4626_v37 = vclamps-f32 %v7512_v26, 6.103034  ;;  %v4627_v26 = vclamps-f32 %v7518_v19, 6.103034 }
 0x3b6   :  { %5053 = vmatpush3.bf16.msra.mxu1 %v1785_v46 }
 0x3bb   :  { %v5728_v51 = vpop.f32.mrb[40].mxu1 }
 0x3bc   :  { %v1751_v8 = vpop.f32.mrb[41].mxu1 }
 0x3bd   :  { %v5729_v58 = vpop.f32.mrb[42].mxu1 }
 0x3be   :  { %v1795_v1 = vpack.c.bf16 %v5729_v58, %v5728_v51  ;;  %v1754_v38 = vpop.f32.mrb[43].mxu1 }
 0x3bf   :  { %v1794_v20 = vpack.c.bf16 %v1754_v38, %v1751_v8 }
 0x3c1   :  { %5054 = vmatprep.subr.bf16.mxu1 %v1794_v20 }
 0x3c2   :  { %5055 = vmatpush3.bf16.msra.mxu1 %v1786_v4 }
 0x3c3   :  { %5056 = vmatprep.subr.bf16.mxu1 %v1795_v1 }
 0x3c6   :  { %5057 = vmatpush3.bf16.msra.mxu1 %v1787_v34 }
 0x3cb   :  { %v5732_v11 = vpop.f32.mrb[44].mxu1 }
 0x3cc   :  { %v1767_v30 = vpop.f32.mrb[45].mxu1 }
 0x3cd   :  { %v5733_v10 = vpop.f32.mrb[46].mxu1 }
 0x3ce   :  { %v1797_v6 = vpack.c.bf16 %v5733_v10, %v5732_v11  ;;  %v1770_v43 = vpop.f32.mrb[47].mxu1  ;;  %v4625_v10 = vclamps-f32 %v7508_v7, 6.103034 }
 0x3cf   :  { %v1796_v12 = vpack.c.bf16 %v1770_v43, %v1767_v30 }
 0x3d1   :  { %5058 = vmatprep.subr.bf16.mxu1 %v1796_v12 }
 0x3d2   :  { %5059 = vmatpush3.bf16.msra.mxu1 %v1788_v55 }
 0x3d3   :  { %5060 = vmatprep.subr.bf16.mxu1 %v1797_v6 }
 0x3d6   :  { %5061 = vmatpush3.bf16.msra.mxu1 %v1789_v44 }
 0x3d9   :  { %1839 = vmatmul.mubr.bf16.vlgmr.msra.gmra.mrb[48].mxu1 %v7367_v35  ;;  %v6111_v35 = vld [vmem:[%s8997_s4 + $0x88] sm:$0xff]  }
 0x3da   :  { %1846 = vmatprep.mubr.bf16.mxu1 %v7369_v29  ;;  %5736 = vmatprep.subr.bf16.mxu0 %v6111_v35  ;;  %v6112_v29 = vld [vmem:[%s8997_s4 + $0x90] sm:$0xff]  }
 0x3db   :  { %5737 = vmatpush3.bf16.msra.mxu0 %v6111_v35 }
 0x3dc   :  { %5738 = vmatprep.subr.bf16.mxu0 %v6112_v29 }
 0x3df   :  { %5739 = vmatpush3.bf16.msra.mxu0 %v6112_v29 }
 0x3e1   :  { %1847 = vmatmul.mubr.bf16.gmra.mrb[52].mxu1 %v7373_v42  ;;  %v6113_v42 = vld [vmem:[%s8997_s4 + $0x98] sm:$0xff]  }
 0x3e2   :  { %1854 = vmatprep.mubr.bf16.mxu1 %v7375_v50  ;;  %5740 = vmatprep.subr.bf16.mxu0 %v6113_v42  ;;  %v6114_v50 = vld [vmem:[%s8997_s4 + $0xa0] sm:$0xff]  }
 0x3e3   :  { %5741 = vmatpush3.bf16.msra.mxu0 %v6113_v42 }
 0x3e4   :  { %5742 = vmatprep.subr.bf16.mxu0 %v6114_v50 }
 0x3e7   :  { %5743 = vmatpush3.bf16.msra.mxu0 %v6114_v50 }
 0x3e9   :  { %1855 = vmatmul.mubr.bf16.gmra.mrb[56].mxu1 %v7379_v17  ;;  %v9103_v17 = vld [vmem:[#allocation14_spill] sm:$0xff] }
 0x3ea   :  { %1862 = vmatprep.mubr.bf16.mxu1 %v7381_v25  ;;  %v6115_v25 = vld [vmem:[%s8997_s4 + $0xa8] sm:$0xff]  }
 0x3eb   :  { %5744 = vmatprep.subr.bf16.mxu0 %v6115_v25 }
 0x3ec   :  { %5745 = vmatpush3.bf16.msra.mxu0 %v6115_v25 }
 0x3f1   :  { %1863 = vmatmul.mubr.bf16.gmra.mrb[60].mxu1 %v7385_v32  ;;  %v9104_v32 = vld [vmem:[#allocation15_spill] sm:$0xff] }
 0x3f2   :  { %1870 = vmatprep.mubr.bf16.mxu1 %v7387_v23  ;;  %v6116_v23 = vld [vmem:[%s8997_s4 + $0xb0] sm:$0xff]  }
 0x3f3   :  { %5746 = vmatprep.subr.bf16.mxu0 %v6116_v23 }
 0x3f4   :  { %5747 = vmatpush3.bf16.msra.mxu0 %v6116_v23 }
 0x3f9   :  { %1871 = vmatmul.mubr.bf16.gmra.mrb[64].mxu1 %v7391_v52  ;;  %v9105_v52 = vld [vmem:[#allocation16_spill] sm:$0xff] }
 0x3fa   :  { %1878 = vmatprep.mubr.bf16.mxu1 %v7393_v0  ;;  %v6117_v0 = vld [vmem:[%s8997_s4 + $0xb8] sm:$0xff]  }
 0x3fb   :  { %5748 = vmatprep.subr.bf16.mxu0 %v6117_v0 }
 0x3fc   :  { %5749 = vmatpush3.bf16.msra.mxu0 %v6117_v0 }
 0x401   :  { %1879 = vmatmul.mubr.bf16.gmra.mrb[68].mxu1 %v7397_v40  ;;  %v9106_v40 = vld [vmem:[#allocation17_spill] sm:$0xff] }
 0x402   :  { %1886 = vmatprep.mubr.bf16.mxu1 %v7399_v36  ;;  %v9107_v36 = vld [vmem:[#allocation18_spill] sm:$0xff] }
 0x409   :  { %1887 = vmatmul.mubr.bf16.gmra.mrb[72].mxu1 %v7403_v22  ;;  %v9108_v22 = vld [vmem:[#allocation19_spill] sm:$0xff] }
 0x40a   :  { %1894 = vmatprep.mubr.bf16.mxu1 %v7405_v31 }
 0x411   :  { %1895 = vmatmul.mubr.bf16.gmra.mrb[76].mxu1 %v7409_v61  ;;  %v7705_v61 = vld [vmem:[%s8998_s5 + $0x1] ss:$0 sm:$0xff] }
 0x412   :  { %1902 = vmatprep.mubr.bf16.mxu1 %v7411_v53 }
 0x419   :  { %1903 = vmatmul.mubr.bf16.gmra.mrb[80].mxu1 %v7415_v18 }
 0x41a   :  { %1910 = vmatprep.mubr.bf16.mxu1 %v7417_v39 }
 0x421   :  { %1911 = vmatmul.mubr.bf16.gmra.mrb[84].mxu1 %v7421_v5 }
 0x422   :  { %1918 = vmatprep.mubr.bf16.mxu1 %v7423_v24  ;;  %v4621_v24 = vclamps-f32 %v7488_v3, 6.103034 }
 0x429   :  { %1919 = vmatmul.mubr.bf16.gmra.mrb[88].mxu1 %v7427_v62 }
 0x42a   :  { %1926 = vmatprep.mubr.bf16.mxu1 %v7429_v57 }
 0x431   :  { %1927 = vmatmul.mubr.bf16.gmra.mrb[92].mxu1 %v7436_v15  ;;  %v9109_v15 = vld [vmem:[#allocation20_spill] sm:$0xff] }
 0x432   :  { %1934 = vmatprep.mubr.bf16.mxu1 %v7438_v28  ;;  %v4622_v28 = vclamps-f32 %v9109_v15, 6.103034 }
 0x439   :  { %1935 = vmatmul.mubr.bf16.gmra.mrb[96].mxu1 %v7448_v47 }
 0x43a   :  { %1942 = vmatprep.mubr.bf16.mxu1 %v9103_v17 }
 0x441   :  { %1943 = vmatmul.mubr.bf16.gmra.mrb[100].mxu1 %v9104_v32 }
 0x442   :  { %1950 = vmatprep.mubr.bf16.mxu1 %v9105_v52 }
 0x449   :  { %1951 = vmatmul.mubr.bf16.gmra.mrb[104].mxu1 %v9106_v40 }
 0x44a   :  { %1958 = vmatprep.mubr.bf16.mxu1 %v9107_v36 }
 0x451   :  { %1959 = vmatmul.mubr.bf16.gmra.mrb[108].mxu1 %v9108_v22  ;;  %v4628_v22 = vclamps-f32 %v7522_v56, 6.103034  ;;  %v4629_v56 = vclamps-f32 %v7528_v59, 6.103034 }
 0x4ac   :  { %v5062_v31 = vpop.f32.mrb[48].mxu1 }
 0x4ad   :  { %v5063_v53 = vpop.f32.mrb[49].mxu1 }
 0x4ae   :  { %v5064_v18 = vadd.f32 %v5063_v53, %v5062_v31  ;;  %v5065_v39 = vpop.f32.mrb[50].mxu1 }
 0x4af   :  { %v5066_v5 = vpop.f32.mrb[51].mxu1 }
 0x4b0   :  { %v1841_v62 = vadd.f32 %v5064_v18, %v7705_v61  ;;  %v5067_v57 = vadd.f32 %v5066_v5, %v5065_v39 }
 0x4b2   :  { %v7710_v47 = vadd.f32 %v4621_v24, %v1841_v62  ;;  %v1844_v44 = vadd.f32 %v5067_v57, %v7705_v61 }
 0x4b4   :  { %v7713_v34 = vadd.f32 %v4622_v28, %v1844_v44  ;;  %v5068_v46 = vpop.f32.mrb[52].mxu1  ;;  %6206 = vtanh.f32 %v7710_v47 }
 0x4b5   :  { %v5069_v4 = vpop.f32.mrb[53].mxu1 }
 0x4b6   :  { %6208 = vtanh.f32 %v7713_v34  ;;  %v5070_v55 = vadd.f32 %v5069_v4, %v5068_v46  ;;  %v5071_v48 = vpop.f32.mrb[54].mxu1  ;;  %v4630_v4 = vclamps-f32 %v7532_v41, 6.103034  ;;  %v4631_v41 = vclamps-f32 %v7538_v54, 6.103034 }
 0x4b7   :  { %v5072_v3 = vpop.f32.mrb[55].mxu1 }
 0x4b8   :  { %v1849_v27 = vadd.f32 %v5070_v55, %v7705_v61  ;;  %v5073_v45 = vadd.f32 %v5072_v3, %v5071_v48 }
 0x4ba   :  { %v7720_v49 = vadd.f32 %v4623_v33, %v1849_v27  ;;  %v1852_v51 = vadd.f32 %v5073_v45, %v7705_v61 }
 0x4bc   :  { %v7723_v8 = vadd.f32 %v4624_v2, %v1852_v51  ;;  %v5074_v58 = vpop.f32.mrb[56].mxu1  ;;  %6210 = vtanh.f32 %v7720_v49 }
 0x4bd   :  { %v5075_v1 = vpop.f32.mrb[57].mxu1 }
 0x4be   :  { %6212 = vtanh.f32 %v7723_v8  ;;  %v5076_v38 = vadd.f32 %v5075_v1, %v5074_v58  ;;  %v5077_v20 = vpop.f32.mrb[58].mxu1  ;;  %v6207_v60 = vpop.eup %6206 }
 0x4bf   :  { %v5078_v11 = vpop.f32.mrb[59].mxu1 }
 0x4c0   :  { %v6209_v30 = vpop.eup %6208  ;;  %v1857_v6 = vadd.f32 %v5076_v38, %v7705_v61  ;;  %v5079_v43 = vadd.f32 %v5078_v11, %v5077_v20  ;;  %v4632_v20 = vclamps-f32 %v7542_v63, 6.103034  ;;  %v4633_v63 = vclamps-f32 %v7548_v21, 6.103034 }
 0x4c1   :  { %v2095_v12 = vpack.c.bf16 %v6209_v30, %v6207_v60 }
 0x4c2   :  { %v7730_v35 = vadd.f32 %v4625_v10, %v1857_v6  ;;  %v1860_v29 = vadd.f32 %v5079_v43, %v7705_v61 }
 0x4c3   :  { %5750 = vmatprep.mubr.bf16.mxu0 %v2095_v12 }
 0x4c4   :  { %v7733_v42 = vadd.f32 %v4626_v37, %v1860_v29  ;;  %v5080_v50 = vpop.f32.mrb[60].mxu1  ;;  %6214 = vtanh.f32 %v7730_v35 }
 0x4c5   :  { %v5081_v17 = vpop.f32.mrb[61].mxu1 }
 0x4c6   :  { %6216 = vtanh.f32 %v7733_v42  ;;  %v5082_v7 = vadd.f32 %v5081_v17, %v5080_v50  ;;  %v5083_v25 = vpop.f32.mrb[62].mxu1  ;;  %v6211_v32 = vpop.eup %6210 }
 0x4c7   :  { %v5084_v23 = vpop.f32.mrb[63].mxu1 }
 0x4c8   :  { %v6213_v52 = vpop.eup %6212  ;;  %v1865_v0 = vadd.f32 %v5082_v7, %v7705_v61  ;;  %v5085_v40 = vadd.f32 %v5084_v23, %v5083_v25  ;;  %v4634_v25 = vclamps-f32 %v7552_v13, 6.103034  ;;  %v4635_v13 = vclamps-f32 %v7558_v14, 6.103034 }
 0x4c9   :  { %v2096_v36 = vpack.c.bf16 %v6213_v52, %v6211_v32 }
 0x4ca   :  { %v7740_v31 = vadd.f32 %v4627_v26, %v1865_v0  ;;  %v1868_v53 = vadd.f32 %v5085_v40, %v7705_v61 }
 0x4cb   :  { %5751 = vmatmul.mubr.bf16.vlgmr.msra.gmra.mrb[112].mxu0 %v2096_v36 }
 0x4cc   :  { %v7743_v18 = vadd.f32 %v4628_v22, %v1868_v53  ;;  %v5086_v39 = vpop.f32.mrb[64].mxu1  ;;  %6218 = vtanh.f32 %v7740_v31 }
 0x4cd   :  { %v5087_v5 = vpop.f32.mrb[65].mxu1 }
 0x4ce   :  { %6220 = vtanh.f32 %v7743_v18  ;;  %v5088_v19 = vadd.f32 %v5087_v5, %v5086_v39  ;;  %v5089_v24 = vpop.f32.mrb[66].mxu1  ;;  %v6215_v62 = vpop.eup %6214 }
 0x4cf   :  { %v5090_v57 = vpop.f32.mrb[67].mxu1 }
 0x4d0   :  { %v6217_v15 = vpop.eup %6216  ;;  %v1873_v28 = vadd.f32 %v5088_v19, %v7705_v61  ;;  %v5091_v44 = vadd.f32 %v5090_v57, %v5089_v24  ;;  %v4636_v24 = vclamps-f32 %v7562_v9, 6.103034 }
 0x4d1   :  { %v2097_v46 = vpack.c.bf16 %v6217_v15, %v6215_v62 }
 0x4d2   :  { %v7750_v55 = vadd.f32 %v4629_v56, %v1873_v28  ;;  %v1876_v48 = vadd.f32 %v5091_v44, %v7705_v61 }
 0x4d3   :  { %5754 = vmatprep.mubr.bf16.mxu0 %v2097_v46 }
 0x4d4   :  { %v7753_v3 = vadd.f32 %v4630_v4, %v1876_v48  ;;  %v5092_v33 = vpop.f32.mrb[68].mxu1  ;;  %6222 = vtanh.f32 %v7750_v55 }
 0x4d5   :  { %v5093_v27 = vpop.f32.mrb[69].mxu1 }
 0x4d6   :  { %6224 = vtanh.f32 %v7753_v3  ;;  %v5094_v59 = vadd.f32 %v5093_v27, %v5092_v33  ;;  %v5095_v45 = vpop.f32.mrb[70].mxu1  ;;  %v6219_v16 = vpop.eup %6218  ;;  %v9111_v33 = vld [vmem:[#allocation22_spill] sm:$0xff] }
 0x4d7   :  { %v5096_v2 = vpop.f32.mrb[71].mxu1  ;;  %v4637_v9 = vclamps-f32 %v9111_v33, 6.103034 }
 0x4d8   :  { %v6221_v51 = vpop.eup %6220  ;;  %v1881_v58 = vadd.f32 %v5094_v59, %v7705_v61  ;;  %v5097_v1 = vadd.f32 %v5096_v2, %v5095_v45 }
 0x4d9   :  { %v2098_v38 = vpack.c.bf16 %v6221_v51, %v6219_v16  ;;  %v9112_v16 = vld [vmem:[#allocation23_spill] sm:$0xff] }
 0x4da   :  { %v7760_v60 = vadd.f32 %v4631_v41, %v1881_v58  ;;  %v1884_v11 = vadd.f32 %v5097_v1, %v7705_v61  ;;  %v4638_v2 = vclamps-f32 %v9112_v16, 6.103034 }
 0x4db   :  { %5755 = vmatmul.mubr.bf16.gmra.mrb[116].mxu0 %v2098_v38 }
 0x4dc   :  { %v7763_v30 = vadd.f32 %v4632_v20, %v1884_v11  ;;  %v5098_v10 = vpop.f32.mrb[72].mxu1  ;;  %6226 = vtanh.f32 %v7760_v60 }
 0x4dd   :  { %v5099_v6 = vpop.f32.mrb[73].mxu1 }
 0x4de   :  { %6228 = vtanh.f32 %v7763_v30  ;;  %v5100_v54 = vadd.f32 %v5099_v6, %v5098_v10  ;;  %v5101_v43 = vpop.f32.mrb[74].mxu1  ;;  %v6223_v12 = vpop.eup %6222 }
 0x4df   :  { %v5102_v37 = vpop.f32.mrb[75].mxu1 }
 0x4e0   :  { %v6225_v29 = vpop.eup %6224  ;;  %v1889_v50 = vadd.f32 %v5100_v54, %v7705_v61  ;;  %v5103_v17 = vadd.f32 %v5102_v37, %v5101_v43  ;;  %v9113_v43 = vld [vmem:[#allocation6_spill] sm:$0xff] }
 0x4e1   :  { %v2099_v7 = vpack.c.bf16 %v6225_v29, %v6223_v12  ;;  %v4639_v12 = vclamps-f32 %v9113_v43, 6.103034 }
 0x4e2   :  { %v7770_v32 = vadd.f32 %v4633_v63, %v1889_v50  ;;  %v1892_v23 = vadd.f32 %v5103_v17, %v7705_v61  ;;  %v9114_v50 = vld [vmem:[#allocation7_spill] sm:$0xff] }
 0x4e3   :  { %5758 = vmatprep.mubr.bf16.mxu0 %v2099_v7  ;;  %v4640_v17 = vclamps-f32 %v9114_v50, 6.103034 }
 0x4e4   :  { %v7773_v52 = vadd.f32 %v4634_v25, %v1892_v23  ;;  %v5104_v26 = vpop.f32.mrb[76].mxu1  ;;  %6230 = vtanh.f32 %v7770_v32 }
 0x4e5   :  { %v5105_v0 = vpop.f32.mrb[77].mxu1 }
 0x4e6   :  { %6232 = vtanh.f32 %v7773_v52  ;;  %v5106_v21 = vadd.f32 %v5105_v0, %v5104_v26  ;;  %v5107_v40 = vpop.f32.mrb[78].mxu1  ;;  %v6227_v36 = vpop.eup %6226 }
 0x4e7   :  { %v5108_v22 = vpop.f32.mrb[79].mxu1 }
 0x4e8   :  { %v6229_v53 = vpop.eup %6228  ;;  %v1897_v39 = vadd.f32 %v5106_v21, %v7705_v61  ;;  %v5109_v5 = vadd.f32 %v5108_v22, %v5107_v40 }
 0x4e9   :  { %v2100_v19 = vpack.c.bf16 %v6229_v53, %v6227_v36 }
 0x4ea   :  { %v7780_v62 = vadd.f32 %v4635_v13, %v1897_v39  ;;  %v1900_v57 = vadd.f32 %v5109_v5, %v7705_v61  ;;  %v9115_v13 = vld [vmem:[#allocation9_spill] sm:$0xff] }
 0x4eb   :  { %5759 = vmatmul.mubr.bf16.gmra.mrb[120].mxu0 %v2100_v19  ;;  %v4641_v39 = vclamps-f32 %v9115_v13, 6.103034 }
 0x4ec   :  { %v7783_v15 = vadd.f32 %v4636_v24, %v1900_v57  ;;  %v5110_v56 = vpop.f32.mrb[80].mxu1  ;;  %6234 = vtanh.f32 %v7780_v62  ;;  %v9116_v57 = vld [vmem:[#allocation24_spill] sm:$0xff] }
 0x4ed   :  { %v5111_v28 = vpop.f32.mrb[81].mxu1 }
 0x4ee   :  { %6236 = vtanh.f32 %v7783_v15  ;;  %v5112_v14 = vadd.f32 %v5111_v28, %v5110_v56  ;;  %v5113_v44 = vpop.f32.mrb[82].mxu1  ;;  %v6231_v46 = vpop.eup %6230  ;;  %v4642_v56 = vclamps-f32 %v9116_v57, 6.103034 }
 0x4ef   :  { %v5114_v4 = vpop.f32.mrb[83].mxu1 }
 0x4f0   :  { %v6233_v48 = vpop.eup %6232  ;;  %v1905_v27 = vadd.f32 %v5112_v14, %v7705_v61  ;;  %v5115_v59 = vadd.f32 %v5114_v4, %v5113_v44 }
 0x4f1   :  { %v2101_v45 = vpack.c.bf16 %v6233_v48, %v6231_v46 }
 0x4f2   :  { %v7790_v51 = vadd.f32 %v4637_v9, %v1905_v27  ;;  %v1908_v41 = vadd.f32 %v5115_v59, %v7705_v61 }
 0x4f3   :  { %5762 = vmatprep.mubr.bf16.mxu0 %v2101_v45  ;;  %v9117_v45 = vld [vmem:[#allocation8_spill] sm:$0xff] }
 0x4f4   :  { %v7793_v58 = vadd.f32 %v4638_v2, %v1908_v41  ;;  %v5116_v1 = vpop.f32.mrb[84].mxu1  ;;  %6238 = vtanh.f32 %v7790_v51  ;;  %v4643_v16 = vclamps-f32 %v9117_v45, 6.103034 }
 0x4f5   :  { %v5117_v38 = vpop.f32.mrb[85].mxu1 }
 0x4f6   :  { %6240 = vtanh.f32 %v7793_v58  ;;  %v5118_v20 = vadd.f32 %v5117_v38, %v5116_v1  ;;  %v5119_v11 = vpop.f32.mrb[86].mxu1  ;;  %v6235_v10 = vpop.eup %6234  ;;  %v9118_v38 = vld [vmem:[#allocation10_spill] sm:$0xff] }
 0x4f7   :  { %v5120_v6 = vpop.f32.mrb[87].mxu1 }
 0x4f8   :  { %v6237_v54 = vpop.eup %6236  ;;  %v1913_v37 = vadd.f32 %v5118_v20, %v7705_v61  ;;  %v5121_v29 = vadd.f32 %v5120_v6, %v5119_v11  ;;  %v4644_v20 = vclamps-f32 %v9118_v38, 6.103034 }
 0x4f9   :  { %v2102_v63 = vpack.c.bf16 %v6237_v54, %v6235_v10 }
 0x4fa   :  { %v7800_v7 = vadd.f32 %v4639_v12, %v1913_v37  ;;  %v1916_v25 = vadd.f32 %v5121_v29, %v7705_v61 }
 0x4fb   :  { %5763 = vmatmul.mubr.bf16.gmra.mrb[124].mxu0 %v2102_v63 }
 0x4fc   :  { %v7803_v23 = vadd.f32 %v4640_v17, %v1916_v25  ;;  %v5122_v26 = vpop.f32.mrb[88].mxu1  ;;  %6242 = vtanh.f32 %v7800_v7  ;;  %v9119_v17 = vld [vmem:[#allocation12_spill] sm:$0xff] }
 0x4fd   :  { %v5123_v0 = vpop.f32.mrb[89].mxu1  ;;  %v4645_v25 = vclamps-f32 %v9119_v17, 6.103034  ;;  %v9124_v17 = vld [vmem:[#allocation27_spill] sm:$0xff] }
 0x4fe   :  { %6244 = vtanh.f32 %v7803_v23  ;;  %v5124_v21 = vadd.f32 %v5123_v0, %v5122_v26  ;;  %v5125_v40 = vpop.f32.mrb[90].mxu1  ;;  %v6239_v36 = vpop.eup %6238 }
 0x4ff   :  { %v5126_v22 = vpop.f32.mrb[91].mxu1 }
 0x500   :  { %v6241_v53 = vpop.eup %6240  ;;  %v1921_v5 = vadd.f32 %v5124_v21, %v7705_v61  ;;  %v5127_v19 = vadd.f32 %v5126_v22, %v5125_v40  ;;  %v9120_v40 = vld [vmem:[#allocation25_spill] sm:$0xff] }
 0x501   :  { %v2103_v24 = vpack.c.bf16 %v6241_v53, %v6239_v36  ;;  %v4646_v36 = vclamps-f32 %v9120_v40, 6.103034 }
 0x502   :  { %v7810_v28 = vadd.f32 %v4641_v39, %v1921_v5  ;;  %v1924_v14 = vadd.f32 %v5127_v19, %v7705_v61 }
 0x503   :  { %5766 = vmatprep.mubr.bf16.mxu0 %v2103_v24 }
 0x504   :  { %v7813_v44 = vadd.f32 %v4642_v56, %v1924_v14  ;;  %v5128_v46 = vpop.f32.mrb[92].mxu1  ;;  %6246 = vtanh.f32 %v7810_v28 }
 0x505   :  { %v5129_v4 = vpop.f32.mrb[93].mxu1 }
 0x506   :  { %6248 = vtanh.f32 %v7813_v44  ;;  %v5130_v48 = vadd.f32 %v5129_v4, %v5128_v46  ;;  %v5131_v33 = vpop.f32.mrb[94].mxu1  ;;  %v6243_v9 = vpop.eup %6242  ;;  %v9121_v46 = vld [vmem:[#allocation11_spill] sm:$0xff] }
 0x507   :  { %v5132_v27 = vpop.f32.mrb[95].mxu1  ;;  %v4647_v4 = vclamps-f32 %v9121_v46, 6.103034 }
 0x508   :  { %v6245_v59 = vpop.eup %6244  ;;  %v1929_v2 = vadd.f32 %v5130_v48, %v7705_v61  ;;  %v5133_v41 = vadd.f32 %v5132_v27, %v5131_v33  ;;  %v9122_v27 = vld [vmem:[#allocation13_spill] sm:$0xff] }
 0x509   :  { %v2104_v1 = vpack.c.bf16 %v6245_v59, %v6243_v9  ;;  %v4648_v59 = vclamps-f32 %v9122_v27, 6.103034 }
 0x50a   :  { %v7820_v11 = vadd.f32 %v4643_v16, %v1929_v2  ;;  %v1932_v10 = vadd.f32 %v5133_v41, %v7705_v61 }
 0x50b   :  { %5767 = vmatmul.mubr.bf16.gmra.mrb[128].mxu0 %v2104_v1 }
 0x50c   :  { %v7823_v6 = vadd.f32 %v4644_v20, %v1932_v10  ;;  %v5134_v54 = vpop.f32.mrb[96].mxu1  ;;  %6250 = vtanh.f32 %v7820_v11 }
 0x50d   :  { %v5135_v43 = vpop.f32.mrb[97].mxu1 }
 0x50e   :  { %6252 = vtanh.f32 %v7823_v6  ;;  %v5136_v12 = vadd.f32 %v5135_v43, %v5134_v54  ;;  %v5137_v37 = vpop.f32.mrb[98].mxu1  ;;  %v6247_v29 = vpop.eup %6246 }
 0x50f   :  { %v5138_v63 = vpop.f32.mrb[99].mxu1 }
 0x510   :  { %v6249_v50 = vpop.eup %6248  ;;  %v1937_v26 = vadd.f32 %v5136_v12, %v7705_v61  ;;  %v5139_v0 = vadd.f32 %v5138_v63, %v5137_v37  ;;  %v9123_v12 = vld [vmem:[#allocation26_spill] sm:$0xff] }
 0x511   :  { %v2105_v21 = vpack.c.bf16 %v6249_v50, %v6247_v29  ;;  %v4649_v37 = vclamps-f32 %v9123_v12, 6.103034 }
 0x512   :  { %v7830_v22 = vadd.f32 %v4645_v25, %v1937_v26  ;;  %v1940_v53 = vadd.f32 %v5139_v0, %v7705_v61  ;;  %v4650_v25 = vclamps-f32 %v9124_v17, 6.103034 }
 0x513   :  { %5770 = vmatprep.mubr.bf16.mxu0 %v2105_v21 }
 0x514   :  { %v7833_v13 = vadd.f32 %v4646_v36, %v1940_v53  ;;  %v5140_v39 = vpop.f32.mrb[100].mxu1  ;;  %6254 = vtanh.f32 %v7830_v22 }
 0x515   :  { %v5141_v5 = vpop.f32.mrb[101].mxu1 }
 0x516   :  { %6256 = vtanh.f32 %v7833_v13  ;;  %v5142_v19 = vadd.f32 %v5141_v5, %v5140_v39  ;;  %v5143_v24 = vpop.f32.mrb[102].mxu1  ;;  %v6251_v57 = vpop.eup %6250 }
 0x517   :  { %v5144_v56 = vpop.f32.mrb[103].mxu1 }
 0x518   :  { %v6253_v14 = vpop.eup %6252  ;;  %v1945_v48 = vadd.f32 %v5142_v19, %v7705_v61  ;;  %v5145_v33 = vadd.f32 %v5144_v56, %v5143_v24 }
 0x519   :  { %v2106_v9 = vpack.c.bf16 %v6253_v14, %v6251_v57  ;;  %v9125_v57 = vld [vmem:[#allocation28_spill] sm:$0xff] }
 0x51a   :  { %v7840_v45 = vadd.f32 %v4647_v4, %v1945_v48  ;;  %v1948_v16 = vadd.f32 %v5145_v33, %v7705_v61  ;;  %v4651_v56 = vclamps-f32 %v9125_v57, 6.103034  ;;  %v9126_v48 = vld [vmem:[#allocation29_spill] sm:$0xff] }
 0x51b   :  { %5771 = vmatmul.mubr.bf16.gmra.mrb[132].mxu0 %v2106_v9  ;;  %v4652_v33 = vclamps-f32 %v9126_v48, 6.103034 }
 0x51c   :  { %v7843_v2 = vadd.f32 %v4648_v59, %v1948_v16  ;;  %v5146_v41 = vpop.f32.mrb[104].mxu1  ;;  %6258 = vtanh.f32 %v7840_v45 }
 0x51d   :  { %v5147_v1 = vpop.f32.mrb[105].mxu1 }
 0x51e   :  { %6260 = vtanh.f32 %v7843_v2  ;;  %v5148_v38 = vadd.f32 %v5147_v1, %v5146_v41  ;;  %v5149_v20 = vpop.f32.mrb[106].mxu1  ;;  %v6255_v10 = vpop.eup %6254 }
 0x51f   :  { %v5150_v54 = vpop.f32.mrb[107].mxu1 }
 0x520   :  { %v6257_v43 = vpop.eup %6256  ;;  %v1953_v29 = vadd.f32 %v5148_v38, %v7705_v61  ;;  %v5151_v63 = vadd.f32 %v5150_v54, %v5149_v20  ;;  %v7867_v54 = vld [vmem:[#allocation2 + $0x8] sm:$0xff] }
 0x521   :  { %v2107_v50 = vpack.c.bf16 %v6257_v43, %v6255_v10 }
 0x522   :  { %v7850_v26 = vadd.f32 %v4649_v37, %v1953_v29  ;;  %v1956_v0 = vadd.f32 %v5151_v63, %v7705_v61 }
 0x523   :  { %5774 = vmatprep.mubr.bf16.mxu0 %v2107_v50 }
 0x524   :  { %v7853_v21 = vadd.f32 %v4650_v25, %v1956_v0  ;;  %v5152_v40 = vpop.f32.mrb[108].mxu1  ;;  %6262 = vtanh.f32 %v7850_v26 }
 0x525   :  { %v5153_v36 = vpop.f32.mrb[109].mxu1 }
 0x526   :  { %6264 = vtanh.f32 %v7853_v21  ;;  %v5154_v53 = vadd.f32 %v5153_v36, %v5152_v40  ;;  %v5155_v39 = vpop.f32.mrb[110].mxu1  ;;  %v6259_v5 = vpop.eup %6258 }
 0x527   :  { %v5156_v19 = vpop.f32.mrb[111].mxu1 }
 0x528   :  { %v6261_v24 = vpop.eup %6260  ;;  %v1961_v14 = vadd.f32 %v5154_v53, %v7705_v61  ;;  %v5157_v46 = vadd.f32 %v5156_v19, %v5155_v39 }
 0x529   :  { %v2108_v4 = vpack.c.bf16 %v6261_v24, %v6259_v5 }
 0x52a   :  { %v7860_v9 = vadd.f32 %v4651_v56, %v1961_v14  ;;  %v1964_v27 = vadd.f32 %v5157_v46, %v7705_v61 }
 0x52b   :  { %5775 = vmatmul.mubr.bf16.gmra.mrb[136].mxu0 %v2108_v4 }
 0x52c   :  { %v7863_v59 = vadd.f32 %v4652_v33, %v1964_v27  ;;  %6266 = vtanh.f32 %v7860_v9 }
 0x52e   :  { %6268 = vtanh.f32 %v7863_v59  ;;  %v6263_v16 = vpop.eup %6262 }
 0x530   :  { %v6265_v41 = vpop.eup %6264 }
 0x531   :  { %v2109_v1 = vpack.c.bf16 %v6265_v41, %v6263_v16 }
 0x533   :  { %5778 = vmatprep.mubr.bf16.mxu0 %v2109_v1 }
 0x536   :  { %v6267_v38 = vpop.eup %6266 }
 0x538   :  { %v6269_v20 = vpop.eup %6268 }
 0x539   :  { %v2110_v10 = vpack.c.bf16 %v6269_v20, %v6267_v38 }
 0x53b   :  { %5779 = vmatmul.mubr.bf16.gmra.mrb[140].mxu0 %v2110_v10 }
 0x53c   :  { %2393 = vmatprep.mubr.bf16.mxu0 %v7867_v54 }
 0x59e   :  { %v5752_v61 = vpop.f32.mrb[112].mxu0 }
 0x59f   :  { %v2210_v43 = vpop.f32.mrb[113].mxu0 }
 0x5a0   :  { %v5753_v12 = vpop.f32.mrb[114].mxu0 }
 0x5a1   :  { %v2338_v37 = vpack.c.bf16 %v5753_v12, %v5752_v61  ;;  %v2213_v29 = vpop.f32.mrb[115].mxu0 }
 0x5a2   :  { %v2337_v63 = vpack.c.bf16 %v2213_v29, %v2210_v43 }
 0x5ae   :  { %v5756_v50 = vpop.f32.mrb[116].mxu0 }
 0x5af   :  { %v2226_v17 = vpop.f32.mrb[117].mxu0 }
 0x5b0   :  { %v5757_v25 = vpop.f32.mrb[118].mxu0 }
 0x5b1   :  { %v2340_v0 = vpack.c.bf16 %v5757_v25, %v5756_v50  ;;  %v2229_v40 = vpop.f32.mrb[119].mxu0 }
 0x5b2   :  { %v2339_v36 = vpack.c.bf16 %v2229_v40, %v2226_v17 }
 0x5be   :  { %v5760_v53 = vpop.f32.mrb[120].mxu0 }
 0x5bf   :  { %v2242_v39 = vpop.f32.mrb[121].mxu0 }
 0x5c0   :  { %v5761_v5 = vpop.f32.mrb[122].mxu0 }
 0x5c1   :  { %v2342_v19 = vpack.c.bf16 %v5761_v5, %v5760_v53  ;;  %v2245_v24 = vpop.f32.mrb[123].mxu0 }
 0x5c2   :  { %v2341_v57 = vpack.c.bf16 %v2245_v24, %v2242_v39 }
 0x5ce   :  { %v5764_v56 = vpop.f32.mrb[124].mxu0 }
 0x5cf   :  { %v2258_v14 = vpop.f32.mrb[125].mxu0 }
 0x5d0   :  { %v5765_v46 = vpop.f32.mrb[126].mxu0 }
 0x5d1   :  { %v2344_v4 = vpack.c.bf16 %v5765_v46, %v5764_v56  ;;  %v2261_v48 = vpop.f32.mrb[127].mxu0 }
 0x5d2   :  { %v2343_v33 = vpack.c.bf16 %v2261_v48, %v2258_v14  ;;  %v7882_v48 = vld [vmem:[#allocation2 + $0x28] sm:$0xff] }
 0x5de   :  { %v5768_v27 = vpop.f32.mrb[128].mxu0 }
 0x5df   :  { %v2274_v16 = vpop.f32.mrb[129].mxu0 }
 0x5e0   :  { %v5769_v41 = vpop.f32.mrb[130].mxu0 }
 0x5e1   :  { %v2346_v1 = vpack.c.bf16 %v5769_v41, %v5768_v27  ;;  %v2277_v38 = vpop.f32.mrb[131].mxu0  ;;  %v7891_v27 = vld [vmem:[#allocation2 + $0x30] sm:$0xff]  ;;  %v7897_v41 = vld [vmem:[#allocation2 + $0x40] sm:$0xff] }
 0x5e2   :  { %v2345_v20 = vpack.c.bf16 %v2277_v38, %v2274_v16  ;;  %v7894_v16 = vld [vmem:[#allocation2 + $0x48] sm:$0xff]  ;;  %v7903_v38 = vld [vmem:[#allocation2 + $0x50] sm:$0xff] }
 0x5e4   :  { %5182 = vmatprep.subr.bf16.mxu0 %v2345_v20  ;;  %v7906_v20 = vld [vmem:[#allocation2 + $0x68] sm:$0xff] }
 0x5e5   :  { %5183 = vmatpush3.bf16.msra.mxu0 %v2337_v63 }
 0x5e6   :  { %5184 = vmatprep.subr.bf16.mxu0 %v2346_v1  ;;  %v7900_v1 = vld [vmem:[#allocation2 + $0x58] sm:$0xff] }
 0x5e9   :  { %5185 = vmatpush3.bf16.msra.mxu0 %v2338_v37 }
 0x5ee   :  { %v5772_v10 = vpop.f32.mrb[132].mxu0 }
 0x5ef   :  { %v2290_v61 = vpop.f32.mrb[133].mxu0 }
 0x5f0   :  { %v5773_v43 = vpop.f32.mrb[134].mxu0 }
 0x5f1   :  { %v2348_v12 = vpack.c.bf16 %v5773_v43, %v5772_v10  ;;  %v2293_v29 = vpop.f32.mrb[135].mxu0  ;;  %v7909_v10 = vld [vmem:[#allocation2 + $0x60] sm:$0xff]  ;;  %v7915_v43 = vld [vmem:[#allocation2 + $0x70] sm:$0xff] }
 0x5f2   :  { %v2347_v50 = vpack.c.bf16 %v2293_v29, %v2290_v61  ;;  %v7912_v61 = vld [vmem:[#allocation2 + $0x78] sm:$0xff]  ;;  %v7921_v29 = vld [vmem:[#allocation2 + $0x80] sm:$0xff] }
 0x5f3   :  { %9127 = vst [vmem:[#allocation14_spill] sm:$0xff] %v7921_v29 }
 0x5f4   :  { %5186 = vmatprep.subr.bf16.mxu0 %v2347_v50  ;;  %v7924_v50 = vld [vmem:[#allocation2 + $0x98] sm:$0xff] }
 0x5f5   :  { %5187 = vmatpush3.bf16.msra.mxu0 %v2339_v36  ;;  %v7873_v36 = vld [vmem:[#allocation2] sm:$0xff]  ;;  %9128 = vst [vmem:[#allocation15_spill] sm:$0xff] %v7924_v50 }
 0x5f6   :  { %5188 = vmatprep.subr.bf16.mxu0 %v2348_v12  ;;  %v7918_v12 = vld [vmem:[#allocation2 + $0x88] sm:$0xff] }
 0x5f9   :  { %5189 = vmatpush3.bf16.msra.mxu0 %v2340_v0  ;;  %v6118_v0 = vld [vmem:[%s8997_s4 + $0xc0] sm:$0xff]  }
 0x5fa   :  { %5782 = vmatprep.subr.bf16.mxu1 %v6118_v0 }
 0x5fb   :  { %5783 = vmatpush3.bf16.msra.mxu1 %v6118_v0  ;;  %v6123_v0 = vld [vmem:[%s8997_s4 + $0xe8] sm:$0xff]  }
 0x5fe   :  { %v5776_v17 = vpop.f32.mrb[136].mxu0 }
 0x5ff   :  { %v2306_v25 = vpop.f32.mrb[137].mxu0 }
 0x600   :  { %v5777_v40 = vpop.f32.mrb[138].mxu0 }
 0x601   :  { %v2350_v53 = vpack.c.bf16 %v5777_v40, %v5776_v17  ;;  %v2309_v39 = vpop.f32.mrb[139].mxu0  ;;  %v7927_v17 = vld [vmem:[#allocation2 + $0x90] sm:$0xff]  ;;  %v7933_v40 = vld [vmem:[#allocation2 + $0xa0] sm:$0xff] }
 0x602   :  { %v2349_v5 = vpack.c.bf16 %v2309_v39, %v2306_v25  ;;  %9129 = vst [vmem:[#allocation16_spill] sm:$0xff] %v7927_v17  ;;  %v7930_v25 = vld [vmem:[#allocation2 + $0xa8] sm:$0xff]  ;;  %9131 = vst [vmem:[#allocation18_spill] sm:$0xff] %v7933_v40 }
 0x603   :  { %9130 = vst [vmem:[#allocation17_spill] sm:$0xff] %v7930_v25  ;;  %v6119_v39 = vld [vmem:[%s8997_s4 + $0xc8] sm:$0xff]  }
 0x604   :  { %5190 = vmatprep.subr.bf16.mxu0 %v2349_v5  ;;  %5784 = vmatprep.subr.bf16.mxu1 %v6119_v39  ;;  %v7942_v5 = vld [vmem:[#allocation2 + $0xb0] sm:$0xff] }
 0x605   :  { %5191 = vmatpush3.bf16.msra.mxu0 %v2341_v57  ;;  %v7879_v57 = vld [vmem:[#allocation2 + $0x10] sm:$0xff]  ;;  %5785 = vmatpush3.bf16.msra.mxu1 %v6119_v39  ;;  %9133 = vst [vmem:[#allocation20_spill] sm:$0xff] %v7942_v5 }
 0x606   :  { %5192 = vmatprep.subr.bf16.mxu0 %v2350_v53  ;;  %v7936_v53 = vld [vmem:[#allocation2 + $0xb8] sm:$0xff]  ;;  %v7966_v39 = vld [vmem:[#allocation2 + $0xd0] sm:$0xff] }
 0x607   :  { %9132 = vst [vmem:[#allocation19_spill] sm:$0xff] %v7936_v53  ;;  %9137 = vst [vmem:[#allocation6_spill] sm:$0xff] %v7966_v39 }
 0x609   :  { %5193 = vmatpush3.bf16.msra.mxu0 %v2342_v19  ;;  %v7876_v19 = vld [vmem:[#allocation2 + $0x18] sm:$0xff] }
 0x60e   :  { %v5780_v37 = vpop.f32.mrb[140].mxu0 }
 0x60f   :  { %v2322_v63 = vpop.f32.mrb[141].mxu0 }
 0x610   :  { %v5781_v24 = vpop.f32.mrb[142].mxu0 }
 0x611   :  { %v2352_v56 = vpack.c.bf16 %v5781_v24, %v5780_v37  ;;  %v2325_v14 = vpop.f32.mrb[143].mxu0  ;;  %v6120_v37 = vld [vmem:[%s8997_s4 + $0xd0] sm:$0xff]   ;;  %v6121_v24 = vld [vmem:[%s8997_s4 + $0xd8] sm:$0xff]  }
 0x612   :  { %v2351_v46 = vpack.c.bf16 %v2325_v14, %v2322_v63  ;;  %v7948_v63 = vld [vmem:[#allocation2 + $0xc8] sm:$0xff]  ;;  %5786 = vmatprep.subr.bf16.mxu1 %v6120_v37  ;;  %v6122_v14 = vld [vmem:[%s8997_s4 + $0xe0] sm:$0xff]  }
 0x613   :  { %9134 = vst [vmem:[#allocation21_spill] sm:$0xff] %v7948_v63  ;;  %5787 = vmatpush3.bf16.msra.mxu1 %v6120_v37  ;;  %v6124_v37 = vld [vmem:[%s8997_s4 + $0xf0] sm:$0xff]  }
 0x614   :  { %5194 = vmatprep.subr.bf16.mxu0 %v2351_v46  ;;  %5788 = vmatprep.subr.bf16.mxu1 %v6121_v24  ;;  %v7960_v46 = vld [vmem:[#allocation2 + $0xd8] sm:$0xff] }
 0x615   :  { %5195 = vmatpush3.bf16.msra.mxu0 %v2343_v33  ;;  %v7885_v33 = vld [vmem:[#allocation2 + $0x20] sm:$0xff]  ;;  %9136 = vst [vmem:[#allocation23_spill] sm:$0xff] %v7960_v46 }
 0x616   :  { %5196 = vmatprep.subr.bf16.mxu0 %v2352_v56  ;;  %v7954_v56 = vld [vmem:[#allocation2 + $0xc0] sm:$0xff] }
 0x617   :  { %5789 = vmatpush3.bf16.msra.mxu1 %v6121_v24  ;;  %9135 = vst [vmem:[#allocation22_spill] sm:$0xff] %v7954_v56  ;;  %v7972_v24 = vld [vmem:[#allocation2 + $0xe8] sm:$0xff] }
 0x618   :  { %5790 = vmatprep.subr.bf16.mxu1 %v6122_v14  ;;  %9138 = vst [vmem:[#allocation7_spill] sm:$0xff] %v7972_v24 }
 0x619   :  { %5197 = vmatpush3.bf16.msra.mxu0 %v2344_v4  ;;  %v7888_v4 = vld [vmem:[#allocation2 + $0x38] sm:$0xff] }
 0x61b   :  { %5791 = vmatpush3.bf16.msra.mxu1 %v6122_v14  ;;  %v6125_v14 = vld [vmem:[%s8997_s4 + $0xf8] sm:$0xff]  }
 0x61c   :  { %2394 = vmatmul.mubr.bf16.vlgmr.msra.gmra.mrb[144].mxu0 %v7873_v36  ;;  %5792 = vmatprep.subr.bf16.mxu1 %v6123_v0 }
 0x61d   :  { %2401 = vmatprep.mubr.bf16.mxu0 %v7876_v19 }
 0x61f   :  { %5793 = vmatpush3.bf16.msra.mxu1 %v6123_v0  ;;  %v7978_v0 = vld [vmem:[#allocation2 + $0xe0] sm:$0xff] }
 0x620   :  { %5794 = vmatprep.subr.bf16.mxu1 %v6124_v37  ;;  %9139 = vst [vmem:[#allocation9_spill] sm:$0xff] %v7978_v0 }
 0x623   :  { %5795 = vmatpush3.bf16.msra.mxu1 %v6124_v37  ;;  %v7990_v37 = vld [vmem:[%s8998_s5 + $0x2] ss:$0 sm:$0xff] }
 0x624   :  { %2402 = vmatmul.mubr.bf16.gmra.mrb[148].mxu0 %v7879_v57  ;;  %5796 = vmatprep.subr.bf16.mxu1 %v6125_v14 }
 0x625   :  { %2409 = vmatprep.mubr.bf16.mxu0 %v7882_v48 }
 0x627   :  { %5797 = vmatpush3.bf16.msra.mxu1 %v6125_v14 }
 0x62c   :  { %2410 = vmatmul.mubr.bf16.gmra.mrb[152].mxu0 %v7885_v33 }
 0x62d   :  { %2417 = vmatprep.mubr.bf16.mxu0 %v7888_v4 }
 0x634   :  { %2418 = vmatmul.mubr.bf16.gmra.mrb[156].mxu0 %v7891_v27 }
 0x635   :  { %2425 = vmatprep.mubr.bf16.mxu0 %v7894_v16 }
 0x63c   :  { %2426 = vmatmul.mubr.bf16.gmra.mrb[160].mxu0 %v7897_v41 }
 0x63d   :  { %2433 = vmatprep.mubr.bf16.mxu0 %v7900_v1 }
 0x644   :  { %2434 = vmatmul.mubr.bf16.gmra.mrb[164].mxu0 %v7903_v38 }
 0x645   :  { %2441 = vmatprep.mubr.bf16.mxu0 %v7906_v20 }
 0x64c   :  { %2442 = vmatmul.mubr.bf16.gmra.mrb[168].mxu0 %v7909_v10 }
 0x64d   :  { %2449 = vmatprep.mubr.bf16.mxu0 %v7912_v61 }
 0x654   :  { %2450 = vmatmul.mubr.bf16.gmra.mrb[172].mxu0 %v7915_v43 }
 0x655   :  { %2457 = vmatprep.mubr.bf16.mxu0 %v7918_v12 }
 0x65c   :  { %2458 = vmatmul.mubr.bf16.gmra.mrb[176].mxu0 %v7921_v29 }
 0x65d   :  { %2465 = vmatprep.mubr.bf16.mxu0 %v7924_v50 }
 0x664   :  { %2466 = vmatmul.mubr.bf16.gmra.mrb[180].mxu0 %v7927_v17 }
 0x665   :  { %2473 = vmatprep.mubr.bf16.mxu0 %v7930_v25  ;;  %v4680_v25 = vclamps-f32 %v7713_v34, 6.103034  ;;  %v4682_v34 = vclamps-f32 %v7723_v8, 6.103034 }
 0x66c   :  { %2474 = vmatmul.mubr.bf16.gmra.mrb[184].mxu0 %v7933_v40 }
 0x66d   :  { %2481 = vmatprep.mubr.bf16.mxu0 %v7936_v53 }
 0x674   :  { %2482 = vmatmul.mubr.bf16.gmra.mrb[188].mxu0 %v7942_v5 }
 0x675   :  { %2489 = vmatprep.mubr.bf16.mxu0 %v7948_v63 }
 0x67c   :  { %2490 = vmatmul.mubr.bf16.gmra.mrb[192].mxu0 %v7954_v56 }
 0x67d   :  { %2497 = vmatprep.mubr.bf16.mxu0 %v7960_v46  ;;  %v7984_v46 = vld [vmem:[#allocation2 + $0xf0] sm:$0xff] }
 0x67e   :  { %9141 = vst [vmem:[#allocation8_spill] sm:$0xff] %v7984_v46 }
 0x684   :  { %2498 = vmatmul.mubr.bf16.gmra.mrb[196].mxu0 %v7966_v39  ;;  %v7981_v39 = vld [vmem:[#allocation2 + $0xf8] sm:$0xff] }
 0x685   :  { %2505 = vmatprep.mubr.bf16.mxu0 %v7972_v24  ;;  %9140 = vst [vmem:[#allocation24_spill] sm:$0xff] %v7981_v39 }
 0x68c   :  { %2506 = vmatmul.mubr.bf16.gmra.mrb[200].mxu0 %v7978_v0  ;;  %v4679_v0 = vclamps-f32 %v7710_v47, 6.103034 }
 0x68d   :  { %2513 = vmatprep.mubr.bf16.mxu0 %v7981_v39 }
 0x694   :  { %2514 = vmatmul.mubr.bf16.gmra.mrb[204].mxu0 %v7984_v46 }
 0x6ef   :  { %v5198_v24 = vpop.f32.mrb[144].mxu0 }
 0x6f0   :  { %v5199_v56 = vpop.f32.mrb[145].mxu0 }
 0x6f1   :  { %v5200_v14 = vadd.f32 %v5199_v56, %v5198_v24  ;;  %v5201_v63 = vpop.f32.mrb[146].mxu0 }
 0x6f2   :  { %v5202_v5 = vpop.f32.mrb[147].mxu0 }
 0x6f3   :  { %v2396_v53 = vadd.f32 %v5200_v14, %v7990_v37  ;;  %v5203_v40 = vadd.f32 %v5202_v5, %v5201_v63  ;;  %v4681_v14 = vclamps-f32 %v7720_v49, 6.103034 }
 0x6f5   :  { %v7994_v39 = vadd.f32 %v4679_v0, %v2396_v53  ;;  %v2399_v46 = vadd.f32 %v5203_v40, %v7990_v37 }
 0x6f7   :  { %v7998_v17 = vadd.f32 %v4680_v25, %v2399_v46  ;;  %v5204_v50 = vpop.f32.mrb[148].mxu0  ;;  %6270 = vtanh.f32 %v7994_v39 }
 0x6f8   :  { %v5205_v29 = vpop.f32.mrb[149].mxu0 }
 0x6f9   :  { %9142 = vst [vmem:[#allocation10_spill] sm:$0xff] %v7998_v17  ;;  %6272 = vtanh.f32 %v7998_v17  ;;  %v5206_v56 = vadd.f32 %v5205_v29, %v5204_v50  ;;  %v5207_v24 = vpop.f32.mrb[150].mxu0 }
 0x6fa   :  { %v5208_v47 = vpop.f32.mrb[151].mxu0 }
 0x6fb   :  { %v2404_v53 = vadd.f32 %v5206_v56, %v7990_v37  ;;  %v5209_v5 = vadd.f32 %v5208_v47, %v5207_v24  ;;  %v4683_v24 = vclamps-f32 %v7730_v35, 6.103034 }
 0x6fd   :  { %v8004_v63 = vadd.f32 %v4681_v14, %v2404_v53  ;;  %v2407_v25 = vadd.f32 %v5209_v5, %v7990_v37  ;;  %v4684_v5 = vclamps-f32 %v7733_v42, 6.103034 }
 0x6ff   :  { %v8008_v40 = vadd.f32 %v4682_v34, %v2407_v25  ;;  %v5210_v46 = vpop.f32.mrb[152].mxu0  ;;  %6274 = vtanh.f32 %v8004_v63 }
 0x700   :  { %v5211_v0 = vpop.f32.mrb[153].mxu0 }
 0x701   :  { %9143 = vst [vmem:[#allocation12_spill] sm:$0xff] %v8008_v40  ;;  %6276 = vtanh.f32 %v8008_v40  ;;  %v5212_v29 = vadd.f32 %v5211_v0, %v5210_v46  ;;  %v5213_v50 = vpop.f32.mrb[154].mxu0  ;;  %v6271_v49 = vpop.eup %6270 }
 0x702   :  { %v5214_v17 = vpop.f32.mrb[155].mxu0 }
 0x703   :  { %v6273_v56 = vpop.eup %6272  ;;  %v2412_v47 = vadd.f32 %v5212_v29, %v7990_v37  ;;  %v5215_v8 = vadd.f32 %v5214_v17, %v5213_v50 }
 0x704   :  { %v2650_v14 = vpack.c.bf16 %v6273_v56, %v6271_v49  ;;  %v4685_v49 = vclamps-f32 %v7740_v31, 6.103034 }
 0x705   :  { %v8014_v53 = vadd.f32 %v4683_v24, %v2412_v47  ;;  %v2415_v34 = vadd.f32 %v5215_v8, %v7990_v37  ;;  %v4686_v8 = vclamps-f32 %v7743_v18, 6.103034 }
 0x706   :  { %5798 = vmatprep.mubr.bf16.mxu1 %v2650_v14 }
 0x707   :  { %v8018_v25 = vadd.f32 %v4684_v5, %v2415_v34  ;;  %v5216_v46 = vpop.f32.mrb[156].mxu0  ;;  %6278 = vtanh.f32 %v8014_v53 }
 0x708   :  { %v5217_v0 = vpop.f32.mrb[157].mxu0 }
 0x709   :  { %6280 = vtanh.f32 %v8018_v25  ;;  %v5218_v35 = vadd.f32 %v5217_v0, %v5216_v46  ;;  %v5219_v40 = vpop.f32.mrb[158].mxu0  ;;  %v6275_v29 = vpop.eup %6274 }
 0x70a   :  { %v5220_v17 = vpop.f32.mrb[159].mxu0 }
 0x70b   :  { %v6277_v50 = vpop.eup %6276  ;;  %v2420_v42 = vadd.f32 %v5218_v35, %v7990_v37  ;;  %v5221_v56 = vadd.f32 %v5220_v17, %v5219_v40  ;;  %v4687_v17 = vclamps-f32 %v7750_v55, 6.103034 }
 0x70c   :  { %v2651_v24 = vpack.c.bf16 %v6277_v50, %v6275_v29 }
 0x70d   :  { %v8024_v47 = vadd.f32 %v4685_v49, %v2420_v42  ;;  %v2423_v14 = vadd.f32 %v5221_v56, %v7990_v37  ;;  %v4688_v56 = vclamps-f32 %v7753_v3, 6.103034 }
 0x70e   :  { %5799 = vmatmul.mubr.bf16.vlgmr.msra.gmra.mrb[112].mxu1 %v2651_v24 }
 0x70f   :  { %v8028_v5 = vadd.f32 %v4686_v8, %v2423_v14  ;;  %v5222_v34 = vpop.f32.mrb[160].mxu0  ;;  %6282 = vtanh.f32 %v8024_v47 }
 0x710   :  { %v5223_v46 = vpop.f32.mrb[161].mxu0 }
 0x711   :  { %6284 = vtanh.f32 %v8028_v5  ;;  %v5224_v31 = vadd.f32 %v5223_v46, %v5222_v34  ;;  %v5225_v0 = vpop.f32.mrb[162].mxu0  ;;  %v6279_v35 = vpop.eup %6278 }
 0x712   :  { %v5226_v40 = vpop.f32.mrb[163].mxu0 }
 0x713   :  { %v6281_v29 = vpop.eup %6280  ;;  %v2428_v18 = vadd.f32 %v5224_v31, %v7990_v37  ;;  %v5227_v50 = vadd.f32 %v5226_v40, %v5225_v0  ;;  %v4689_v40 = vclamps-f32 %v7760_v60, 6.103034 }
 0x714   :  { %v2652_v49 = vpack.c.bf16 %v6281_v29, %v6279_v35 }
 0x715   :  { %v8034_v42 = vadd.f32 %v4687_v17, %v2428_v18  ;;  %v2431_v24 = vadd.f32 %v5227_v50, %v7990_v37  ;;  %v4690_v50 = vclamps-f32 %v7763_v30, 6.103034 }
 0x716   :  { %5802 = vmatprep.mubr.bf16.mxu1 %v2652_v49 }
 0x717   :  { %v8038_v8 = vadd.f32 %v4688_v56, %v2431_v24  ;;  %v5228_v14 = vpop.f32.mrb[164].mxu0  ;;  %6286 = vtanh.f32 %v8034_v42 }
 0x718   :  { %v5229_v34 = vpop.f32.mrb[165].mxu0 }
 0x719   :  { %6288 = vtanh.f32 %v8038_v8  ;;  %v5230_v55 = vadd.f32 %v5229_v34, %v5228_v14  ;;  %v5231_v46 = vpop.f32.mrb[166].mxu0  ;;  %v6283_v31 = vpop.eup %6282 }
 0x71a   :  { %v5232_v0 = vpop.f32.mrb[167].mxu0 }
 0x71b   :  { %v6285_v35 = vpop.eup %6284  ;;  %v2436_v3 = vadd.f32 %v5230_v55, %v7990_v37  ;;  %v5233_v29 = vadd.f32 %v5232_v0, %v5231_v46  ;;  %v4691_v0 = vclamps-f32 %v7770_v32, 6.103034 }
 0x71c   :  { %v2653_v17 = vpack.c.bf16 %v6285_v35, %v6283_v31 }
 0x71d   :  { %v8044_v18 = vadd.f32 %v4689_v40, %v2436_v3  ;;  %v2439_v49 = vadd.f32 %v5233_v29, %v7990_v37  ;;  %v4692_v29 = vclamps-f32 %v7773_v52, 6.103034 }
 0x71e   :  { %5803 = vmatmul.mubr.bf16.gmra.mrb[116].mxu1 %v2653_v17 }
 0x71f   :  { %v8048_v56 = vadd.f32 %v4690_v50, %v2439_v49  ;;  %v5234_v24 = vpop.f32.mrb[168].mxu0  ;;  %6290 = vtanh.f32 %v8044_v18 }
 0x720   :  { %v5235_v14 = vpop.f32.mrb[169].mxu0 }
 0x721   :  { %6292 = vtanh.f32 %v8048_v56  ;;  %v5236_v60 = vadd.f32 %v5235_v14, %v5234_v24  ;;  %v5237_v34 = vpop.f32.mrb[170].mxu0  ;;  %v6287_v55 = vpop.eup %6286 }
 0x722   :  { %v5238_v46 = vpop.f32.mrb[171].mxu0 }
 0x723   :  { %v6289_v31 = vpop.eup %6288  ;;  %v2444_v30 = vadd.f32 %v5236_v60, %v7990_v37  ;;  %v5239_v35 = vadd.f32 %v5238_v46, %v5237_v34  ;;  %v4693_v46 = vclamps-f32 %v7780_v62, 6.103034 }
 0x724   :  { %v2654_v40 = vpack.c.bf16 %v6289_v31, %v6287_v55 }
 0x725   :  { %v8054_v3 = vadd.f32 %v4691_v0, %v2444_v30  ;;  %v2447_v17 = vadd.f32 %v5239_v35, %v7990_v37  ;;  %v4694_v35 = vclamps-f32 %v7783_v15, 6.103034 }
 0x726   :  { %5806 = vmatprep.mubr.bf16.mxu1 %v2654_v40 }
 0x727   :  { %v8058_v50 = vadd.f32 %v4692_v29, %v2447_v17  ;;  %v5240_v49 = vpop.f32.mrb[172].mxu0  ;;  %6294 = vtanh.f32 %v8054_v3 }
 0x728   :  { %v5241_v24 = vpop.f32.mrb[173].mxu0 }
 0x729   :  { %6296 = vtanh.f32 %v8058_v50  ;;  %v5242_v32 = vadd.f32 %v5241_v24, %v5240_v49  ;;  %v5243_v14 = vpop.f32.mrb[174].mxu0  ;;  %v6291_v60 = vpop.eup %6290 }
 0x72a   :  { %v5244_v34 = vpop.f32.mrb[175].mxu0 }
 0x72b   :  { %v6293_v55 = vpop.eup %6292  ;;  %v2452_v52 = vadd.f32 %v5242_v32, %v7990_v37  ;;  %v5245_v31 = vadd.f32 %v5244_v34, %v5243_v14  ;;  %v4695_v34 = vclamps-f32 %v7790_v51, 6.103034 }
 0x72c   :  { %v2655_v0 = vpack.c.bf16 %v6293_v55, %v6291_v60 }
 0x72d   :  { %v8064_v30 = vadd.f32 %v4693_v46, %v2452_v52  ;;  %v2455_v40 = vadd.f32 %v5245_v31, %v7990_v37  ;;  %v4696_v31 = vclamps-f32 %v7793_v58, 6.103034 }
 0x72e   :  { %5807 = vmatmul.mubr.bf16.gmra.mrb[120].mxu1 %v2655_v0 }
 0x72f   :  { %v8068_v29 = vadd.f32 %v4694_v35, %v2455_v40  ;;  %v5246_v17 = vpop.f32.mrb[176].mxu0  ;;  %6298 = vtanh.f32 %v8064_v30 }
 0x730   :  { %v5247_v49 = vpop.f32.mrb[177].mxu0 }
 0x731   :  { %6300 = vtanh.f32 %v8068_v29  ;;  %v5248_v62 = vadd.f32 %v5247_v49, %v5246_v17  ;;  %v5249_v24 = vpop.f32.mrb[178].mxu0  ;;  %v6295_v32 = vpop.eup %6294 }
 0x732   :  { %v5250_v14 = vpop.f32.mrb[179].mxu0 }
 0x733   :  { %v6297_v60 = vpop.eup %6296  ;;  %v2460_v15 = vadd.f32 %v5248_v62, %v7990_v37  ;;  %v5251_v55 = vadd.f32 %v5250_v14, %v5249_v24  ;;  %v4697_v14 = vclamps-f32 %v7800_v7, 6.103034 }
 0x734   :  { %v2656_v46 = vpack.c.bf16 %v6297_v60, %v6295_v32 }
 0x735   :  { %v8074_v52 = vadd.f32 %v4695_v34, %v2460_v15  ;;  %v2463_v0 = vadd.f32 %v5251_v55, %v7990_v37  ;;  %v4698_v55 = vclamps-f32 %v7803_v23, 6.103034 }
 0x736   :  { %5810 = vmatprep.mubr.bf16.mxu1 %v2656_v46 }
 0x737   :  { %v8078_v35 = vadd.f32 %v4696_v31, %v2463_v0  ;;  %v5252_v40 = vpop.f32.mrb[180].mxu0  ;;  %6302 = vtanh.f32 %v8074_v52 }
 0x738   :  { %v5253_v17 = vpop.f32.mrb[181].mxu0 }
 0x739   :  { %6304 = vtanh.f32 %v8078_v35  ;;  %v5254_v51 = vadd.f32 %v5253_v17, %v5252_v40  ;;  %v5255_v49 = vpop.f32.mrb[182].mxu0  ;;  %v6299_v62 = vpop.eup %6298 }
 0x73a   :  { %v5256_v24 = vpop.f32.mrb[183].mxu0 }
 0x73b   :  { %v6301_v32 = vpop.eup %6300  ;;  %v2468_v58 = vadd.f32 %v5254_v51, %v7990_v37  ;;  %v5257_v60 = vadd.f32 %v5256_v24, %v5255_v49  ;;  %v4699_v24 = vclamps-f32 %v7810_v28, 6.103034 }
 0x73c   :  { %v2657_v34 = vpack.c.bf16 %v6301_v32, %v6299_v62 }
 0x73d   :  { %v8084_v15 = vadd.f32 %v4697_v14, %v2468_v58  ;;  %v2471_v46 = vadd.f32 %v5257_v60, %v7990_v37  ;;  %v4700_v60 = vclamps-f32 %v7813_v44, 6.103034 }
 0x73e   :  { %5811 = vmatmul.mubr.bf16.gmra.mrb[124].mxu1 %v2657_v34 }
 0x73f   :  { %v8088_v31 = vadd.f32 %v4698_v55, %v2471_v46  ;;  %v5258_v0 = vpop.f32.mrb[184].mxu0  ;;  %6306 = vtanh.f32 %v8084_v15 }
 0x740   :  { %v5259_v40 = vpop.f32.mrb[185].mxu0 }
 0x741   :  { %6308 = vtanh.f32 %v8088_v31  ;;  %v5260_v7 = vadd.f32 %v5259_v40, %v5258_v0  ;;  %v5261_v17 = vpop.f32.mrb[186].mxu0  ;;  %v6303_v51 = vpop.eup %6302 }
 0x742   :  { %v5262_v49 = vpop.f32.mrb[187].mxu0 }
 0x743   :  { %v6305_v62 = vpop.eup %6304  ;;  %v2476_v23 = vadd.f32 %v5260_v7, %v7990_v37  ;;  %v5263_v32 = vadd.f32 %v5262_v49, %v5261_v17  ;;  %v4701_v49 = vclamps-f32 %v7820_v11, 6.103034 }
 0x744   :  { %v2658_v14 = vpack.c.bf16 %v6305_v62, %v6303_v51 }
 0x745   :  { %v8094_v58 = vadd.f32 %v4699_v24, %v2476_v23  ;;  %v2479_v34 = vadd.f32 %v5263_v32, %v7990_v37  ;;  %v4702_v32 = vclamps-f32 %v7823_v6, 6.103034 }
 0x746   :  { %5814 = vmatprep.mubr.bf16.mxu1 %v2658_v14 }
 0x747   :  { %v8098_v55 = vadd.f32 %v4700_v60, %v2479_v34  ;;  %v5264_v46 = vpop.f32.mrb[188].mxu0  ;;  %6310 = vtanh.f32 %v8094_v58 }
 0x748   :  { %v5265_v0 = vpop.f32.mrb[189].mxu0 }
 0x749   :  { %6312 = vtanh.f32 %v8098_v55  ;;  %v5266_v28 = vadd.f32 %v5265_v0, %v5264_v46  ;;  %v5267_v40 = vpop.f32.mrb[190].mxu0  ;;  %v6307_v7 = vpop.eup %6306 }
 0x74a   :  { %v5268_v17 = vpop.f32.mrb[191].mxu0 }
 0x74b   :  { %v6309_v51 = vpop.eup %6308  ;;  %v2484_v44 = vadd.f32 %v5266_v28, %v7990_v37  ;;  %v5269_v62 = vadd.f32 %v5268_v17, %v5267_v40  ;;  %v4703_v17 = vclamps-f32 %v7830_v22, 6.103034 }
 0x74c   :  { %v2659_v24 = vpack.c.bf16 %v6309_v51, %v6307_v7 }
 0x74d   :  { %v8104_v23 = vadd.f32 %v4701_v49, %v2484_v44  ;;  %v2487_v14 = vadd.f32 %v5269_v62, %v7990_v37  ;;  %v4704_v62 = vclamps-f32 %v7833_v13, 6.103034 }
 0x74e   :  { %5815 = vmatmul.mubr.bf16.gmra.mrb[128].mxu1 %v2659_v24 }
 0x74f   :  { %v8108_v60 = vadd.f32 %v4702_v32, %v2487_v14  ;;  %v5270_v34 = vpop.f32.mrb[192].mxu0  ;;  %6314 = vtanh.f32 %v8104_v23 }
 0x750   :  { %v5271_v46 = vpop.f32.mrb[193].mxu0 }
 0x751   :  { %6316 = vtanh.f32 %v8108_v60  ;;  %v5272_v11 = vadd.f32 %v5271_v46, %v5270_v34  ;;  %v5273_v0 = vpop.f32.mrb[194].mxu0  ;;  %v6311_v28 = vpop.eup %6310 }
 0x752   :  { %v5274_v40 = vpop.f32.mrb[195].mxu0 }
 0x753   :  { %v6313_v7 = vpop.eup %6312  ;;  %v2492_v6 = vadd.f32 %v5272_v11, %v7990_v37  ;;  %v5275_v51 = vadd.f32 %v5274_v40, %v5273_v0  ;;  %v4705_v40 = vclamps-f32 %v7840_v45, 6.103034 }
 0x754   :  { %v2660_v49 = vpack.c.bf16 %v6313_v7, %v6311_v28 }
 0x755   :  { %v8114_v44 = vadd.f32 %v4703_v17, %v2492_v6  ;;  %v2495_v24 = vadd.f32 %v5275_v51, %v7990_v37  ;;  %v4706_v51 = vclamps-f32 %v7843_v2, 6.103034 }
 0x756   :  { %5818 = vmatprep.mubr.bf16.mxu1 %v2660_v49 }
 0x757   :  { %v8118_v32 = vadd.f32 %v4704_v62, %v2495_v24  ;;  %v5276_v14 = vpop.f32.mrb[196].mxu0  ;;  %6318 = vtanh.f32 %v8114_v44 }
 0x758   :  { %v5277_v34 = vpop.f32.mrb[197].mxu0 }
 0x759   :  { %9144 = vst [vmem:[#allocation25_spill] sm:$0xff] %v8118_v32  ;;  %6320 = vtanh.f32 %v8118_v32  ;;  %v5278_v22 = vadd.f32 %v5277_v34, %v5276_v14  ;;  %v5279_v46 = vpop.f32.mrb[198].mxu0  ;;  %v6315_v11 = vpop.eup %6314 }
 0x75a   :  { %v5280_v0 = vpop.f32.mrb[199].mxu0 }
 0x75b   :  { %v6317_v28 = vpop.eup %6316  ;;  %v2500_v13 = vadd.f32 %v5278_v22, %v7990_v37  ;;  %v5281_v7 = vadd.f32 %v5280_v0, %v5279_v46  ;;  %v4707_v0 = vclamps-f32 %v7850_v26, 6.103034 }
 0x75c   :  { %v2661_v17 = vpack.c.bf16 %v6317_v28, %v6315_v11 }
 0x75d   :  { %v8124_v6 = vadd.f32 %v4705_v40, %v2500_v13  ;;  %v2503_v49 = vadd.f32 %v5281_v7, %v7990_v37  ;;  %v4708_v7 = vclamps-f32 %v7853_v21, 6.103034 }
 0x75e   :  { %5819 = vmatmul.mubr.bf16.gmra.mrb[132].mxu1 %v2661_v17 }
 0x75f   :  { %9145 = vst [vmem:[#allocation11_spill] sm:$0xff] %v8124_v6  ;;  %v8128_v62 = vadd.f32 %v4706_v51, %v2503_v49  ;;  %v5282_v24 = vpop.f32.mrb[200].mxu0  ;;  %6322 = vtanh.f32 %v8124_v6 }
 0x760   :  { %v5283_v14 = vpop.f32.mrb[201].mxu0 }
 0x761   :  { %9146 = vst [vmem:[#allocation13_spill] sm:$0xff] %v8128_v62  ;;  %6324 = vtanh.f32 %v8128_v62  ;;  %v5284_v45 = vadd.f32 %v5283_v14, %v5282_v24  ;;  %v5285_v34 = vpop.f32.mrb[202].mxu0  ;;  %v6319_v22 = vpop.eup %6318 }
 0x762   :  { %v5286_v46 = vpop.f32.mrb[203].mxu0 }
 0x763   :  { %v6321_v11 = vpop.eup %6320  ;;  %v2508_v2 = vadd.f32 %v5284_v45, %v7990_v37  ;;  %v5287_v28 = vadd.f32 %v5286_v46, %v5285_v34  ;;  %v4709_v46 = vclamps-f32 %v7860_v9, 6.103034 }
 0x764   :  { %v2662_v40 = vpack.c.bf16 %v6321_v11, %v6319_v22 }
 0x765   :  { %v8134_v13 = vadd.f32 %v4707_v0, %v2508_v2  ;;  %v2511_v17 = vadd.f32 %v5287_v28, %v7990_v37  ;;  %v4710_v28 = vclamps-f32 %v7863_v59, 6.103034 }
 0x766   :  { %5822 = vmatprep.mubr.bf16.mxu1 %v2662_v40 }
 0x767   :  { %9147 = vst [vmem:[#allocation26_spill] sm:$0xff] %v8134_v13  ;;  %v8138_v51 = vadd.f32 %v4708_v7, %v2511_v17  ;;  %v5288_v49 = vpop.f32.mrb[204].mxu0  ;;  %6326 = vtanh.f32 %v8134_v13 }
 0x768   :  { %v5289_v24 = vpop.f32.mrb[205].mxu0 }
 0x769   :  { %9148 = vst [vmem:[#allocation27_spill] sm:$0xff] %v8138_v51  ;;  %6328 = vtanh.f32 %v8138_v51  ;;  %v5290_v26 = vadd.f32 %v5289_v24, %v5288_v49  ;;  %v5291_v14 = vpop.f32.mrb[206].mxu0  ;;  %v6323_v45 = vpop.eup %6322 }
 0x76a   :  { %v5292_v34 = vpop.f32.mrb[207].mxu0 }
 0x76b   :  { %v6325_v22 = vpop.eup %6324  ;;  %v2516_v21 = vadd.f32 %v5290_v26, %v7990_v37  ;;  %v5293_v11 = vadd.f32 %v5292_v34, %v5291_v14 }
 0x76c   :  { %v2663_v0 = vpack.c.bf16 %v6325_v22, %v6323_v45 }
 0x76d   :  { %v8144_v2 = vadd.f32 %v4709_v46, %v2516_v21  ;;  %v2519_v40 = vadd.f32 %v5293_v11, %v7990_v37 }
 0x76e   :  { %5823 = vmatmul.mubr.bf16.gmra.mrb[136].mxu1 %v2663_v0 }
 0x76f   :  { %9149 = vst [vmem:[#allocation28_spill] sm:$0xff] %v8144_v2  ;;  %v8148_v7 = vadd.f32 %v4710_v28, %v2519_v40  ;;  %6330 = vtanh.f32 %v8144_v2 }
 0x771   :  { %9150 = vst [vmem:[#allocation29_spill] sm:$0xff] %v8148_v7  ;;  %6332 = vtanh.f32 %v8148_v7  ;;  %v6327_v17 = vpop.eup %6326 }
 0x773   :  { %v6329_v49 = vpop.eup %6328 }
 0x774   :  { %v2664_v9 = vpack.c.bf16 %v6329_v49, %v6327_v17 }
 0x776   :  { %5826 = vmatprep.mubr.bf16.mxu1 %v2664_v9 }
 0x779   :  { %v6331_v24 = vpop.eup %6330 }
 0x77b   :  { %v6333_v26 = vpop.eup %6332 }
 0x77c   :  { %v2665_v14 = vpack.c.bf16 %v6333_v26, %v6331_v24 }
 0x77e   :  { %5827 = vmatmul.mubr.bf16.gmra.mrb[140].mxu1 %v2665_v14 }
 0x77f   :  { %2948 = vmatprep.mubr.bf16.mxu1 %v7867_v54 }
 0x7e1   :  { %v5800_v59 = vpop.f32.mrb[112].mxu1 }
 0x7e2   :  { %v2765_v45 = vpop.f32.mrb[113].mxu1 }
 0x7e3   :  { %v5801_v37 = vpop.f32.mrb[114].mxu1 }
 0x7e4   :  { %v2893_v34 = vpack.c.bf16 %v5801_v37, %v5800_v59  ;;  %v2768_v22 = vpop.f32.mrb[115].mxu1 }
 0x7e5   :  { %v2892_v46 = vpack.c.bf16 %v2768_v22, %v2765_v45 }
 0x7f1   :  { %v5804_v21 = vpop.f32.mrb[116].mxu1 }
 0x7f2   :  { %v2781_v11 = vpop.f32.mrb[117].mxu1 }
 0x7f3   :  { %v5805_v0 = vpop.f32.mrb[118].mxu1 }
 0x7f4   :  { %v2895_v28 = vpack.c.bf16 %v5805_v0, %v5804_v21  ;;  %v2784_v40 = vpop.f32.mrb[119].mxu1 }
 0x7f5   :  { %v2894_v7 = vpack.c.bf16 %v2784_v40, %v2781_v11 }
 0x801   :  { %v5808_v17 = vpop.f32.mrb[120].mxu1 }
 0x802   :  { %v2797_v49 = vpop.f32.mrb[121].mxu1 }
 0x803   :  { %v5809_v9 = vpop.f32.mrb[122].mxu1 }
 0x804   :  { %v2897_v2 = vpack.c.bf16 %v5809_v9, %v5808_v17  ;;  %v2800_v24 = vpop.f32.mrb[123].mxu1 }
 0x805   :  { %v2896_v26 = vpack.c.bf16 %v2800_v24, %v2797_v49 }
 0x811   :  { %v5812_v14 = vpop.f32.mrb[124].mxu1 }
 0x812   :  { %v2813_v54 = vpop.f32.mrb[125].mxu1 }
 0x813   :  { %v5813_v51 = vpop.f32.mrb[126].mxu1 }
 0x814   :  { %v2899_v13 = vpack.c.bf16 %v5813_v51, %v5812_v14  ;;  %v2816_v62 = vpop.f32.mrb[127].mxu1 }
 0x815   :  { %v2898_v59 = vpack.c.bf16 %v2816_v62, %v2813_v54 }
 0x821   :  { %v5816_v37 = vpop.f32.mrb[128].mxu1 }
 0x822   :  { %v2829_v45 = vpop.f32.mrb[129].mxu1 }
 0x823   :  { %v5817_v22 = vpop.f32.mrb[130].mxu1 }
 0x824   :  { %v2901_v6 = vpack.c.bf16 %v5817_v22, %v5816_v37  ;;  %v2832_v32 = vpop.f32.mrb[131].mxu1 }
 0x825   :  { %v2900_v21 = vpack.c.bf16 %v2832_v32, %v2829_v45 }
 0x827   :  { %5318 = vmatprep.subr.bf16.mxu1 %v2900_v21  ;;  %v9165_v21 = vld [vmem:[#allocation8_spill] sm:$0xff] }
 0x828   :  { %5319 = vmatpush3.bf16.msra.mxu1 %v2892_v46 }
 0x829   :  { %5320 = vmatprep.subr.bf16.mxu1 %v2901_v6 }
 0x82c   :  { %5321 = vmatpush3.bf16.msra.mxu1 %v2893_v34 }
 0x831   :  { %v5820_v11 = vpop.f32.mrb[132].mxu1 }
 0x832   :  { %v2845_v0 = vpop.f32.mrb[133].mxu1 }
 0x833   :  { %v5821_v40 = vpop.f32.mrb[134].mxu1 }
 0x834   :  { %v2903_v17 = vpack.c.bf16 %v5821_v40, %v5820_v11  ;;  %v2848_v49 = vpop.f32.mrb[135].mxu1  ;;  %v6750_v11 = vld [vmem:[#allocation2 + $0x8] sm:$0xff] }
 0x835   :  { %v2902_v9 = vpack.c.bf16 %v2848_v49, %v2845_v0  ;;  %v8211_v0 = vld [vmem:[%s8997_s4 + $0x100] sm:$0xff]  }
 0x837   :  { %5322 = vmatprep.subr.bf16.mxu1 %v2902_v9 }
 0x838   :  { %5323 = vmatpush3.bf16.msra.mxu1 %v2894_v7  ;;  %v6126_v7 = vld [vmem:[%s8996_s3] sm:$0xff]  }
 0x839   :  { %5324 = vmatprep.subr.bf16.mxu1 %v2903_v17  ;;  %5830 = vmatprep.subr.bf16.mxu0 %v6126_v7  ;;  %v8217_v17 = vld [vmem:[%s8998_s5 + $0x3] ss:$0 sm:$0xff] }
 0x83a   :  { %5831 = vmatpush3.bf16.msra.mxu0 %v6126_v7 }
 0x83c   :  { %5325 = vmatpush3.bf16.msra.mxu1 %v2895_v28  ;;  %v6133_v28 = vld [vmem:[%s8996_s3 + $0x38] sm:$0xff]  }
 0x841   :  { %v5824_v62 = vpop.f32.mrb[136].mxu1 }
 0x842   :  { %v2861_v51 = vpop.f32.mrb[137].mxu1 }
 0x843   :  { %v5825_v24 = vpop.f32.mrb[138].mxu1 }
 0x844   :  { %v2905_v14 = vpack.c.bf16 %v5825_v24, %v5824_v62  ;;  %v2864_v54 = vpop.f32.mrb[139].mxu1  ;;  %v4737_v24 = vclamps-f32 %v7994_v39, 6.103034 }
 0x845   :  { %v2904_v32 = vpack.c.bf16 %v2864_v54, %v2861_v51 }
 0x847   :  { %5326 = vmatprep.subr.bf16.mxu1 %v2904_v32 }
 0x848   :  { %5327 = vmatpush3.bf16.msra.mxu1 %v2896_v26  ;;  %v9163_v26 = vld [vmem:[#allocation9_spill] sm:$0xff] }
 0x849   :  { %5328 = vmatprep.subr.bf16.mxu1 %v2905_v14 }
 0x84c   :  { %5329 = vmatpush3.bf16.msra.mxu1 %v2897_v2  ;;  %v9162_v2 = vld [vmem:[#allocation7_spill] sm:$0xff] }
 0x851   :  { %v5828_v6 = vpop.f32.mrb[140].mxu1 }
 0x852   :  { %v2877_v34 = vpop.f32.mrb[141].mxu1 }
 0x853   :  { %v5829_v46 = vpop.f32.mrb[142].mxu1 }
 0x854   :  { %v2907_v37 = vpack.c.bf16 %v5829_v46, %v5828_v6  ;;  %v2880_v45 = vpop.f32.mrb[143].mxu1  ;;  %v9166_v6 = vld [vmem:[#allocation10_spill] sm:$0xff] }
 0x855   :  { %v2906_v22 = vpack.c.bf16 %v2880_v45, %v2877_v34  ;;  %v4738_v34 = vclamps-f32 %v9166_v6, 6.103034  ;;  %v6135_v6 = vld [vmem:[%s8997_s4 + $0x108] sm:$0xff]  }
 0x857   :  { %5330 = vmatprep.subr.bf16.mxu1 %v2906_v22 }
 0x858   :  { %5331 = vmatpush3.bf16.msra.mxu1 %v2898_v59  ;;  %v9164_v59 = vld [vmem:[#allocation24_spill] sm:$0xff] }
 0x859   :  { %5332 = vmatprep.subr.bf16.mxu1 %v2907_v37 }
 0x85c   :  { %5333 = vmatpush3.bf16.msra.mxu1 %v2899_v13  ;;  %v6132_v13 = vld [vmem:[%s8996_s3 + $0x30] sm:$0xff]  }
 0x85f   :  { %2949 = vmatmul.mubr.bf16.vlgmr.msra.gmra.mrb[144].mxu1 %v7873_v36  ;;  %v9151_v36 = vld [vmem:[#allocation14_spill] sm:$0xff] }
 0x860   :  { %2956 = vmatprep.mubr.bf16.mxu1 %v7876_v19  ;;  %v9152_v19 = vld [vmem:[#allocation15_spill] sm:$0xff] }
 0x867   :  { %2957 = vmatmul.mubr.bf16.gmra.mrb[148].mxu1 %v7879_v57  ;;  %v9153_v57 = vld [vmem:[#allocation16_spill] sm:$0xff] }
 0x868   :  { %2964 = vmatprep.mubr.bf16.mxu1 %v7882_v48  ;;  %v9154_v48 = vld [vmem:[#allocation17_spill] sm:$0xff] }
 0x86f   :  { %2965 = vmatmul.mubr.bf16.gmra.mrb[152].mxu1 %v7885_v33  ;;  %v9155_v33 = vld [vmem:[#allocation18_spill] sm:$0xff] }
 0x870   :  { %2972 = vmatprep.mubr.bf16.mxu1 %v7888_v4  ;;  %v9156_v4 = vld [vmem:[#allocation19_spill] sm:$0xff] }
 0x877   :  { %2973 = vmatmul.mubr.bf16.gmra.mrb[156].mxu1 %v7891_v27  ;;  %v6127_v27 = vld [vmem:[%s8996_s3 + $0x8] sm:$0xff]  }
 0x878   :  { %2980 = vmatprep.mubr.bf16.mxu1 %v7894_v16  ;;  %5832 = vmatprep.subr.bf16.mxu0 %v6127_v27  ;;  %v9157_v16 = vld [vmem:[#allocation20_spill] sm:$0xff] }
 0x879   :  { %5833 = vmatpush3.bf16.msra.mxu0 %v6127_v27 }
 0x87f   :  { %2981 = vmatmul.mubr.bf16.gmra.mrb[160].mxu1 %v7897_v41  ;;  %v6128_v41 = vld [vmem:[%s8996_s3 + $0x10] sm:$0xff]  }
 0x880   :  { %2988 = vmatprep.mubr.bf16.mxu1 %v7900_v1  ;;  %v9158_v1 = vld [vmem:[#allocation21_spill] sm:$0xff]  ;;  %5834 = vmatprep.subr.bf16.mxu0 %v6128_v41 }
 0x881   :  { %5835 = vmatpush3.bf16.msra.mxu0 %v6128_v41 }
 0x887   :  { %2989 = vmatmul.mubr.bf16.gmra.mrb[164].mxu1 %v7903_v38  ;;  %v6129_v38 = vld [vmem:[%s8996_s3 + $0x18] sm:$0xff]  }
 0x888   :  { %2996 = vmatprep.mubr.bf16.mxu1 %v7906_v20  ;;  %5836 = vmatprep.subr.bf16.mxu0 %v6129_v38  ;;  %v9159_v20 = vld [vmem:[#allocation22_spill] sm:$0xff] }
 0x889   :  { %5837 = vmatpush3.bf16.msra.mxu0 %v6129_v38 }
 0x88f   :  { %2997 = vmatmul.mubr.bf16.gmra.mrb[168].mxu1 %v7909_v10  ;;  %v6130_v10 = vld [vmem:[%s8996_s3 + $0x20] sm:$0xff]  }
 0x890   :  { %3004 = vmatprep.mubr.bf16.mxu1 %v7912_v61  ;;  %v9160_v61 = vld [vmem:[#allocation23_spill] sm:$0xff]  ;;  %5838 = vmatprep.subr.bf16.mxu0 %v6130_v10 }
 0x891   :  { %5839 = vmatpush3.bf16.msra.mxu0 %v6130_v10 }
 0x897   :  { %3005 = vmatmul.mubr.bf16.gmra.mrb[172].mxu1 %v7915_v43  ;;  %v6131_v43 = vld [vmem:[%s8996_s3 + $0x28] sm:$0xff]  }
 0x898   :  { %3012 = vmatprep.mubr.bf16.mxu1 %v7918_v12  ;;  %5840 = vmatprep.subr.bf16.mxu0 %v6131_v43  ;;  %v9161_v12 = vld [vmem:[#allocation6_spill] sm:$0xff] }
 0x899   :  { %5841 = vmatpush3.bf16.msra.mxu0 %v6131_v43 }
 0x89a   :  { %5842 = vmatprep.subr.bf16.mxu0 %v6132_v13 }
 0x89d   :  { %5843 = vmatpush3.bf16.msra.mxu0 %v6132_v13 }
 0x89e   :  { %5844 = vmatprep.subr.bf16.mxu0 %v6133_v28 }
 0x89f   :  { %3013 = vmatmul.mubr.bf16.gmra.mrb[176].mxu1 %v9151_v36 }
 0x8a0   :  { %3020 = vmatprep.mubr.bf16.mxu1 %v9152_v19 }
 0x8a1   :  { %5845 = vmatpush3.bf16.msra.mxu0 %v6133_v28 }
 0x8a2   :  { %5878 = vmatprep.subr.bf16.mxu0 %v8211_v0 }
 0x8a7   :  { %3021 = vmatmul.mubr.bf16.gmra.mrb[180].mxu1 %v9153_v57  ;;  %v4739_v57 = vclamps-f32 %v8004_v63, 6.103034  ;;  %v4741_v63 = vclamps-f32 %v8014_v53, 6.103034 }
 0x8a8   :  { %3028 = vmatprep.mubr.bf16.mxu1 %v9154_v48 }
 0x8af   :  { %3029 = vmatmul.mubr.bf16.gmra.mrb[184].mxu1 %v9155_v33 }
 0x8b0   :  { %3036 = vmatprep.mubr.bf16.mxu1 %v9156_v4  ;;  %v9167_v4 = vld [vmem:[#allocation12_spill] sm:$0xff] }
 0x8b1   :  { %v4740_v27 = vclamps-f32 %v9167_v4, 6.103034 }
 0x8b7   :  { %3037 = vmatmul.mubr.bf16.gmra.mrb[188].mxu1 %v9157_v16 }
 0x8b8   :  { %3044 = vmatprep.mubr.bf16.mxu1 %v9158_v1 }
 0x8bf   :  { %3045 = vmatmul.mubr.bf16.gmra.mrb[192].mxu1 %v9159_v20 }
 0x8c0   :  { %3052 = vmatprep.mubr.bf16.mxu1 %v9160_v61 }
 0x8c7   :  { %3053 = vmatmul.mubr.bf16.gmra.mrb[196].mxu1 %v9161_v12 }
 0x8c8   :  { %3060 = vmatprep.mubr.bf16.mxu1 %v9162_v2 }
 0x8cf   :  { %3061 = vmatmul.mubr.bf16.gmra.mrb[200].mxu1 %v9163_v26 }
 0x8d0   :  { %3068 = vmatprep.mubr.bf16.mxu1 %v9164_v59  ;;  %v4742_v59 = vclamps-f32 %v8018_v25, 6.103034 }
 0x8d7   :  { %3069 = vmatmul.mubr.bf16.gmra.mrb[204].mxu1 %v9165_v21 }
 0x8d8   :  { %3952 = vmatprep.mubr.bf16.mxu1 %v6750_v11 }
 0x932   :  { %v5334_v40 = vpop.f32.mrb[144].mxu1 }
 0x933   :  { %v5335_v49 = vpop.f32.mrb[145].mxu1 }
 0x934   :  { %v5336_v9 = vadd.f32 %v5335_v49, %v5334_v40  ;;  %v5337_v62 = vpop.f32.mrb[146].mxu1 }
 0x935   :  { %v5338_v51 = vpop.f32.mrb[147].mxu1 }
 0x936   :  { %v2951_v14 = vadd.f32 %v5336_v9, %v8217_v17  ;;  %v5339_v54 = vadd.f32 %v5338_v51, %v5337_v62 }
 0x938   :  { %v3077_v32 = vadd.f32 %v4737_v24, %v2951_v14  ;;  %v2954_v46 = vadd.f32 %v5339_v54, %v8217_v17  ;;  %v4743_v14 = vclamps-f32 %v8024_v47, 6.103034 }
 0x93a   :  { %v3078_v37 = vadd.f32 %v4738_v34, %v2954_v46  ;;  %v5340_v45 = vpop.f32.mrb[148].mxu1  ;;  %6334 = vtanh.f32 %v3077_v32  ;;  %v4744_v46 = vclamps-f32 %v8028_v5, 6.103034 }
 0x93b   :  { %v5341_v22 = vpop.f32.mrb[149].mxu1 }
 0x93c   :  { %6336 = vtanh.f32 %v3078_v37  ;;  %v5342_v7 = vadd.f32 %v5341_v22, %v5340_v45  ;;  %v5343_v36 = vpop.f32.mrb[150].mxu1 }
 0x93d   :  { %v5344_v19 = vpop.f32.mrb[151].mxu1 }
 0x93e   :  { %v2959_v39 = vadd.f32 %v5342_v7, %v8217_v17  ;;  %v5345_v48 = vadd.f32 %v5344_v19, %v5343_v36  ;;  %v6136_v7 = vld [vmem:[%s8997_s4 + $0x110] sm:$0xff]  }
 0x940   :  { %v3079_v33 = vadd.f32 %v4739_v57, %v2959_v39  ;;  %v2962_v16 = vadd.f32 %v5345_v48, %v8217_v17  ;;  %v4745_v48 = vclamps-f32 %v8034_v42, 6.103034 }
 0x942   :  { %v3080_v41 = vadd.f32 %v4740_v27, %v2962_v16  ;;  %v5346_v1 = vpop.f32.mrb[152].mxu1  ;;  %6338 = vtanh.f32 %v3079_v33  ;;  %v6137_v27 = vld [vmem:[%s8997_s4 + $0x118] sm:$0xff]  }
 0x943   :  { %v5347_v38 = vpop.f32.mrb[153].mxu1 }
 0x944   :  { %6340 = vtanh.f32 %v3080_v41  ;;  %v5348_v20 = vadd.f32 %v5347_v38, %v5346_v1  ;;  %v5349_v10 = vpop.f32.mrb[154].mxu1  ;;  %v6335_v61 = vpop.eup %6334  ;;  %v4746_v41 = vclamps-f32 %v8038_v8, 6.103034 }
 0x945   :  { %v5350_v43 = vpop.f32.mrb[155].mxu1 }
 0x946   :  { %v6337_v12 = vpop.eup %6336  ;;  %v2967_v13 = vadd.f32 %v5348_v20, %v8217_v17  ;;  %v5351_v2 = vadd.f32 %v5350_v43, %v5349_v10  ;;  %v6138_v10 = vld [vmem:[%s8997_s4 + $0x120] sm:$0xff]  }
 0x947   :  { %v8229_v28 = vpack.c.bf16 %v6337_v12, %v6335_v61 }
 0x948   :  { %v3081_v26 = vadd.f32 %v4741_v63, %v2967_v13  ;;  %v2970_v21 = vadd.f32 %v5351_v2, %v8217_v17  ;;  %v4747_v13 = vclamps-f32 %v8044_v18, 6.103034 }
 0x949   :  { %5846 = vmatprep.mubr.bf16.mxu0 %v8229_v28 }
 0x94a   :  { %v3082_v11 = vadd.f32 %v4742_v59, %v2970_v21  ;;  %v5352_v40 = vpop.f32.mrb[156].mxu1  ;;  %6342 = vtanh.f32 %v3081_v26  ;;  %v6139_v21 = vld [vmem:[%s8997_s4 + $0x128] sm:$0xff]  }
 0x94b   :  { %v5353_v49 = vpop.f32.mrb[157].mxu1 }
 0x94c   :  { %6344 = vtanh.f32 %v3082_v11  ;;  %v5354_v9 = vadd.f32 %v5353_v49, %v5352_v40  ;;  %v5355_v62 = vpop.f32.mrb[158].mxu1  ;;  %v6339_v53 = vpop.eup %6338  ;;  %v4748_v40 = vclamps-f32 %v8048_v56, 6.103034 }
 0x94d   :  { %v5356_v51 = vpop.f32.mrb[159].mxu1 }
 0x94e   :  { %v6341_v24 = vpop.eup %6340  ;;  %v2975_v54 = vadd.f32 %v5354_v9, %v8217_v17  ;;  %v5357_v32 = vadd.f32 %v5356_v51, %v5355_v62 }
 0x94f   :  { %v8236_v25 = vpack.c.bf16 %v6341_v24, %v6339_v53  ;;  %v6140_v53 = vld [vmem:[%s8997_s4 + $0x130] sm:$0xff]  }
 0x950   :  { %v3083_v34 = vadd.f32 %v4743_v14, %v2975_v54  ;;  %v2978_v37 = vadd.f32 %v5357_v32, %v8217_v17  ;;  %v4749_v32 = vclamps-f32 %v8054_v3, 6.103034 }
 0x951   :  { %5847 = vmatmul.mubr.bf16.vlgmr.msra.gmra.mrb[208].mxu0 %v8236_v25 }
 0x952   :  { %v3084_v45 = vadd.f32 %v4744_v46, %v2978_v37  ;;  %v5358_v22 = vpop.f32.mrb[160].mxu1  ;;  %5879 = vmatpush3.bf16.msra.mxu0 %v8211_v0  ;;  %6346 = vtanh.f32 %v3083_v34  ;;  %v6141_v37 = vld [vmem:[%s8997_s4 + $0x138] sm:$0xff]  }
 0x953   :  { %v5359_v47 = vpop.f32.mrb[161].mxu1  ;;  %5880 = vmatprep.subr.bf16.mxu0 %v6135_v6 }
 0x954   :  { %6348 = vtanh.f32 %v3084_v45  ;;  %v5360_v36 = vadd.f32 %v5359_v47, %v5358_v22  ;;  %v5361_v19 = vpop.f32.mrb[162].mxu1  ;;  %v6343_v57 = vpop.eup %6342  ;;  %v4750_v22 = vclamps-f32 %v8058_v50, 6.103034 }
 0x955   :  { %v5362_v5 = vpop.f32.mrb[163].mxu1 }
 0x956   :  { %v6345_v39 = vpop.eup %6344  ;;  %v2983_v33 = vadd.f32 %v5360_v36, %v8217_v17  ;;  %v5363_v4 = vadd.f32 %v5362_v5, %v5361_v19  ;;  %5881 = vmatpush3.bf16.msra.mxu0 %v6135_v6 }
 0x957   :  { %v8250_v0 = vpack.c.bf16 %v6345_v39, %v6343_v57  ;;  %5882 = vmatprep.subr.bf16.mxu0 %v6136_v7 }
 0x958   :  { %v3085_v16 = vadd.f32 %v4745_v48, %v2983_v33  ;;  %v2986_v1 = vadd.f32 %v5363_v4, %v8217_v17  ;;  %v4751_v33 = vclamps-f32 %v8064_v30, 6.103034 }
 0x959   :  { %5850 = vmatprep.mubr.bf16.mxu0 %v8250_v0 }
 0x95a   :  { %v3086_v38 = vadd.f32 %v4746_v41, %v2986_v1  ;;  %v5364_v42 = vpop.f32.mrb[164].mxu1  ;;  %5883 = vmatpush3.bf16.msra.mxu0 %v6136_v7  ;;  %6350 = vtanh.f32 %v3085_v16  ;;  %v4752_v41 = vclamps-f32 %v8068_v29, 6.103034 }
 0x95b   :  { %v5365_v20 = vpop.f32.mrb[165].mxu1  ;;  %5884 = vmatprep.subr.bf16.mxu0 %v6137_v27 }
 0x95c   :  { %6352 = vtanh.f32 %v3086_v38  ;;  %v5366_v61 = vadd.f32 %v5365_v20, %v5364_v42  ;;  %v5367_v43 = vpop.f32.mrb[166].mxu1  ;;  %v6347_v12 = vpop.eup %6346 }
 0x95d   :  { %v5368_v63 = vpop.f32.mrb[167].mxu1 }
 0x95e   :  { %v6349_v8 = vpop.eup %6348  ;;  %v2991_v2 = vadd.f32 %v5366_v61, %v8217_v17  ;;  %v5369_v26 = vadd.f32 %v5368_v63, %v5367_v43  ;;  %5885 = vmatpush3.bf16.msra.mxu0 %v6137_v27  ;;  %v4753_v63 = vclamps-f32 %v8074_v52, 6.103034 }
 0x95f   :  { %v8263_v59 = vpack.c.bf16 %v6349_v8, %v6347_v12  ;;  %5886 = vmatprep.subr.bf16.mxu0 %v6138_v10 }
 0x960   :  { %v3087_v11 = vadd.f32 %v4747_v13, %v2991_v2  ;;  %v2994_v49 = vadd.f32 %v5369_v26, %v8217_v17  ;;  %v4754_v26 = vclamps-f32 %v8078_v35, 6.103034 }
 0x961   :  { %5851 = vmatmul.mubr.bf16.gmra.mrb[212].mxu0 %v8263_v59 }
 0x962   :  { %v3088_v9 = vadd.f32 %v4748_v40, %v2994_v49  ;;  %v5370_v18 = vpop.f32.mrb[168].mxu1  ;;  %5887 = vmatpush3.bf16.msra.mxu0 %v6138_v10  ;;  %6354 = vtanh.f32 %v3087_v11 }
 0x963   :  { %v5371_v62 = vpop.f32.mrb[169].mxu1  ;;  %5888 = vmatprep.subr.bf16.mxu0 %v6139_v21 }
 0x964   :  { %6356 = vtanh.f32 %v3088_v9  ;;  %v5372_v51 = vadd.f32 %v5371_v62, %v5370_v18  ;;  %v5373_v24 = vpop.f32.mrb[170].mxu1  ;;  %v6351_v14 = vpop.eup %6350 }
 0x965   :  { %v5374_v54 = vpop.f32.mrb[171].mxu1 }
 0x966   :  { %v6353_v56 = vpop.eup %6352  ;;  %v2999_v6 = vadd.f32 %v5372_v51, %v8217_v17  ;;  %v5375_v34 = vadd.f32 %v5374_v54, %v5373_v24  ;;  %5889 = vmatpush3.bf16.msra.mxu0 %v6139_v21  ;;  %v4755_v51 = vclamps-f32 %v8084_v15, 6.103034 }
 0x967   :  { %v8276_v46 = vpack.c.bf16 %v6353_v56, %v6351_v14  ;;  %5890 = vmatprep.subr.bf16.mxu0 %v6140_v53  ;;  %v4756_v56 = vclamps-f32 %v8088_v31, 6.103034 }
 0x968   :  { %v3089_v45 = vadd.f32 %v4749_v32, %v2999_v6  ;;  %v3002_v47 = vadd.f32 %v5375_v34, %v8217_v17 }
 0x969   :  { %5854 = vmatprep.mubr.bf16.mxu0 %v8276_v46 }
 0x96a   :  { %v3090_v7 = vadd.f32 %v4750_v22, %v3002_v47  ;;  %v5376_v3 = vpop.f32.mrb[172].mxu1  ;;  %5891 = vmatpush3.bf16.msra.mxu0 %v6140_v53  ;;  %6358 = vtanh.f32 %v3089_v45 }
 0x96b   :  { %v5377_v36 = vpop.f32.mrb[173].mxu1  ;;  %5892 = vmatprep.subr.bf16.mxu0 %v6141_v37 }
 0x96c   :  { %6360 = vtanh.f32 %v3090_v7  ;;  %v5378_v19 = vadd.f32 %v5377_v36, %v5376_v3  ;;  %v5379_v57 = vpop.f32.mrb[174].mxu1  ;;  %v6355_v5 = vpop.eup %6354  ;;  %v4757_v3 = vclamps-f32 %v8094_v58, 6.103034 }
 0x96d   :  { %v5380_v39 = vpop.f32.mrb[175].mxu1 }
 0x96e   :  { %v6357_v48 = vpop.eup %6356  ;;  %v3007_v50 = vadd.f32 %v5378_v19, %v8217_v17  ;;  %v5381_v4 = vadd.f32 %v5380_v39, %v5379_v57  ;;  %5893 = vmatpush3.bf16.msra.mxu0 %v6141_v37 }
 0x96f   :  { %v8286_v27 = vpack.c.bf16 %v6357_v48, %v6355_v5  ;;  %v4758_v5 = vclamps-f32 %v8098_v55, 6.103034 }
 0x970   :  { %v3091_v16 = vadd.f32 %v4751_v33, %v3007_v50  ;;  %v3010_v1 = vadd.f32 %v5381_v4, %v8217_v17 }
 0x971   :  { %5855 = vmatmul.mubr.bf16.gmra.mrb[216].mxu0 %v8286_v27 }
 0x972   :  { %v3092_v38 = vadd.f32 %v4752_v41, %v3010_v1  ;;  %v5382_v42 = vpop.f32.mrb[176].mxu1  ;;  %6362 = vtanh.f32 %v3091_v16 }
 0x973   :  { %v5383_v20 = vpop.f32.mrb[177].mxu1 }
 0x974   :  { %6364 = vtanh.f32 %v3092_v38  ;;  %v5384_v10 = vadd.f32 %v5383_v20, %v5382_v42  ;;  %v5385_v30 = vpop.f32.mrb[178].mxu1  ;;  %v6359_v61 = vpop.eup %6358  ;;  %v4759_v38 = vclamps-f32 %v8104_v23, 6.103034 }
 0x975   :  { %v5386_v43 = vpop.f32.mrb[179].mxu1 }
 0x976   :  { %v6361_v12 = vpop.eup %6360  ;;  %v3015_v8 = vadd.f32 %v5384_v10, %v8217_v17  ;;  %v5387_v13 = vadd.f32 %v5386_v43, %v5385_v30  ;;  %v4760_v30 = vclamps-f32 %v8108_v60, 6.103034 }
 0x977   :  { %v8293_v29 = vpack.c.bf16 %v6361_v12, %v6359_v61 }
 0x978   :  { %v3093_v2 = vadd.f32 %v4753_v63, %v3015_v8  ;;  %v3018_v21 = vadd.f32 %v5387_v13, %v8217_v17 }
 0x979   :  { %5858 = vmatprep.mubr.bf16.mxu0 %v8293_v29 }
 0x97a   :  { %v3094_v11 = vadd.f32 %v4754_v26, %v3018_v21  ;;  %v5388_v40 = vpop.f32.mrb[180].mxu1  ;;  %6366 = vtanh.f32 %v3093_v2  ;;  %v4761_v21 = vclamps-f32 %v8114_v44, 6.103034 }
 0x97b   :  { %v5389_v49 = vpop.f32.mrb[181].mxu1 }
 0x97c   :  { %6368 = vtanh.f32 %v3094_v11  ;;  %v5390_v9 = vadd.f32 %v5389_v49, %v5388_v40  ;;  %v5391_v18 = vpop.f32.mrb[182].mxu1  ;;  %v6363_v52 = vpop.eup %6362 }
 0x97d   :  { %v5392_v62 = vpop.f32.mrb[183].mxu1 }
 0x97e   :  { %v6365_v53 = vpop.eup %6364  ;;  %v3023_v24 = vadd.f32 %v5390_v9, %v8217_v17  ;;  %v5393_v14 = vadd.f32 %v5392_v62, %v5391_v18  ;;  %v9168_v9 = vld [vmem:[#allocation25_spill] sm:$0xff] }
 0x97f   :  { %v8300_v35 = vpack.c.bf16 %v6365_v53, %v6363_v52  ;;  %v4762_v18 = vclamps-f32 %v9168_v9, 6.103034 }
 0x980   :  { %v3095_v54 = vadd.f32 %v4755_v51, %v3023_v24  ;;  %v3026_v32 = vadd.f32 %v5393_v14, %v8217_v17 }
 0x981   :  { %5859 = vmatmul.mubr.bf16.gmra.mrb[220].mxu0 %v8300_v35 }
 0x982   :  { %v3096_v6 = vadd.f32 %v4756_v56, %v3026_v32  ;;  %v5394_v34 = vpop.f32.mrb[184].mxu1  ;;  %6370 = vtanh.f32 %v3095_v54  ;;  %v9169_v32 = vld [vmem:[#allocation11_spill] sm:$0xff] }
 0x983   :  { %v5395_v37 = vpop.f32.mrb[185].mxu1 }
 0x984   :  { %6372 = vtanh.f32 %v3096_v6  ;;  %v5396_v45 = vadd.f32 %v5395_v37, %v5394_v34  ;;  %v5397_v22 = vpop.f32.mrb[186].mxu1  ;;  %v6367_v15 = vpop.eup %6366  ;;  %v4763_v6 = vclamps-f32 %v9169_v32, 6.103034 }
 0x985   :  { %v5398_v47 = vpop.f32.mrb[187].mxu1 }
 0x986   :  { %v6369_v7 = vpop.eup %6368  ;;  %v3031_v36 = vadd.f32 %v5396_v45, %v8217_v17  ;;  %v5399_v19 = vadd.f32 %v5398_v47, %v5397_v22 }
 0x987   :  { %v8307_v31 = vpack.c.bf16 %v6369_v7, %v6367_v15  ;;  %v9170_v15 = vld [vmem:[#allocation13_spill] sm:$0xff] }
 0x988   :  { %v3097_v57 = vadd.f32 %v4757_v3, %v3031_v36  ;;  %v3034_v39 = vadd.f32 %v5399_v19, %v8217_v17  ;;  %v4764_v47 = vclamps-f32 %v9170_v15, 6.103034 }
 0x989   :  { %5862 = vmatprep.mubr.bf16.mxu0 %v8307_v31 }
 0x98a   :  { %v3098_v48 = vadd.f32 %v4758_v5, %v3034_v39  ;;  %v5400_v33 = vpop.f32.mrb[188].mxu1  ;;  %6374 = vtanh.f32 %v3097_v57 }
 0x98b   :  { %v5401_v50 = vpop.f32.mrb[189].mxu1 }
 0x98c   :  { %6376 = vtanh.f32 %v3098_v48  ;;  %v5402_v4 = vadd.f32 %v5401_v50, %v5400_v33  ;;  %v5403_v16 = vpop.f32.mrb[190].mxu1  ;;  %v6371_v58 = vpop.eup %6370  ;;  %v9171_v50 = vld [vmem:[#allocation26_spill] sm:$0xff] }
 0x98d   :  { %v5404_v41 = vpop.f32.mrb[191].mxu1 }
 0x98e   :  { %v6373_v1 = vpop.eup %6372  ;;  %v3039_v42 = vadd.f32 %v5402_v4, %v8217_v17  ;;  %v5405_v20 = vadd.f32 %v5404_v41, %v5403_v16  ;;  %v4765_v4 = vclamps-f32 %v9171_v50, 6.103034 }
 0x98f   :  { %v8314_v55 = vpack.c.bf16 %v6373_v1, %v6371_v58 }
 0x990   :  { %v3099_v10 = vadd.f32 %v4759_v38, %v3039_v42  ;;  %v3042_v61 = vadd.f32 %v5405_v20, %v8217_v17  ;;  %v9172_v38 = vld [vmem:[#allocation27_spill] sm:$0xff] }
 0x991   :  { %5863 = vmatmul.mubr.bf16.gmra.mrb[224].mxu0 %v8314_v55  ;;  %v4766_v42 = vclamps-f32 %v9172_v38, 6.103034 }
 0x992   :  { %v3100_v43 = vadd.f32 %v4760_v30, %v3042_v61  ;;  %v5406_v12 = vpop.f32.mrb[192].mxu1  ;;  %6378 = vtanh.f32 %v3099_v10 }
 0x993   :  { %v5407_v63 = vpop.f32.mrb[193].mxu1 }
 0x994   :  { %6380 = vtanh.f32 %v3100_v43  ;;  %v5408_v8 = vadd.f32 %v5407_v63, %v5406_v12  ;;  %v5409_v13 = vpop.f32.mrb[194].mxu1  ;;  %v6375_v23 = vpop.eup %6374 }
 0x995   :  { %v5410_v2 = vpop.f32.mrb[195].mxu1 }
 0x996   :  { %v6377_v26 = vpop.eup %6376  ;;  %v3047_v11 = vadd.f32 %v5408_v8, %v8217_v17  ;;  %v5411_v40 = vadd.f32 %v5410_v2, %v5409_v13 }
 0x997   :  { %v8321_v60 = vpack.c.bf16 %v6377_v26, %v6375_v23  ;;  %v9173_v23 = vld [vmem:[#allocation28_spill] sm:$0xff] }
 0x998   :  { %v3101_v49 = vadd.f32 %v4761_v21, %v3047_v11  ;;  %v3050_v52 = vadd.f32 %v5411_v40, %v8217_v17  ;;  %v4767_v2 = vclamps-f32 %v9173_v23, 6.103034 }
 0x999   :  { %5866 = vmatprep.mubr.bf16.mxu0 %v8321_v60 }
 0x99a   :  { %v3102_v62 = vadd.f32 %v4762_v18, %v3050_v52  ;;  %v5412_v53 = vpop.f32.mrb[196].mxu1  ;;  %6382 = vtanh.f32 %v3101_v49  ;;  %v9174_v49 = vld [vmem:[#allocation29_spill] sm:$0xff] }
 0x99b   :  { %v5413_v51 = vpop.f32.mrb[197].mxu1  ;;  %v4768_v9 = vclamps-f32 %v9174_v49, 6.103034 }
 0x99c   :  { %6384 = vtanh.f32 %v3102_v62  ;;  %v5414_v24 = vadd.f32 %v5413_v51, %v5412_v53  ;;  %v5415_v14 = vpop.f32.mrb[198].mxu1  ;;  %v6379_v44 = vpop.eup %6378 }
 0x99d   :  { %v5416_v54 = vpop.f32.mrb[199].mxu1 }
 0x99e   :  { %v6381_v56 = vpop.eup %6380  ;;  %v3055_v34 = vadd.f32 %v5414_v24, %v8217_v17  ;;  %v5417_v37 = vadd.f32 %v5416_v54, %v5415_v14 }
 0x99f   :  { %v3152_v45 = vpack.c.bf16 %v6381_v56, %v6379_v44 }
 0x9a0   :  { %v3103_v22 = vadd.f32 %v4763_v6, %v3055_v34  ;;  %v3058_v7 = vadd.f32 %v5417_v37, %v8217_v17 }
 0x9a1   :  { %5867 = vmatmul.mubr.bf16.gmra.mrb[228].mxu0 %v3152_v45 }
 0x9a2   :  { %v3104_v3 = vadd.f32 %v4764_v47, %v3058_v7  ;;  %v5418_v36 = vpop.f32.mrb[200].mxu1  ;;  %6386 = vtanh.f32 %v3103_v22 }
 0x9a3   :  { %v5419_v19 = vpop.f32.mrb[201].mxu1 }
 0x9a4   :  { %6388 = vtanh.f32 %v3104_v3  ;;  %v5420_v57 = vadd.f32 %v5419_v19, %v5418_v36  ;;  %v5421_v5 = vpop.f32.mrb[202].mxu1  ;;  %v6383_v39 = vpop.eup %6382 }
 0x9a5   :  { %v5422_v48 = vpop.f32.mrb[203].mxu1 }
 0x9a6   :  { %v6385_v33 = vpop.eup %6384  ;;  %v3063_v16 = vadd.f32 %v5420_v57, %v8217_v17  ;;  %v5423_v58 = vadd.f32 %v5422_v48, %v5421_v5 }
 0x9a7   :  { %v3153_v41 = vpack.c.bf16 %v6385_v33, %v6383_v39 }
 0x9a8   :  { %v3105_v1 = vadd.f32 %v4765_v4, %v3063_v16  ;;  %v3066_v20 = vadd.f32 %v5423_v58, %v8217_v17 }
 0x9a9   :  { %5870 = vmatprep.mubr.bf16.mxu0 %v3153_v41 }
 0x9aa   :  { %v3106_v10 = vadd.f32 %v4766_v42, %v3066_v20  ;;  %v5424_v30 = vpop.f32.mrb[204].mxu1  ;;  %6390 = vtanh.f32 %v3105_v1 }
 0x9ab   :  { %v5425_v61 = vpop.f32.mrb[205].mxu1 }
 0x9ac   :  { %6392 = vtanh.f32 %v3106_v10  ;;  %v5426_v43 = vadd.f32 %v5425_v61, %v5424_v30  ;;  %v5427_v12 = vpop.f32.mrb[206].mxu1  ;;  %v6387_v63 = vpop.eup %6386 }
 0x9ad   :  { %v5428_v8 = vpop.f32.mrb[207].mxu1 }
 0x9ae   :  { %v6389_v13 = vpop.eup %6388  ;;  %v3071_v26 = vadd.f32 %v5426_v43, %v8217_v17  ;;  %v5429_v21 = vadd.f32 %v5428_v8, %v5427_v12 }
 0x9af   :  { %v3154_v11 = vpack.c.bf16 %v6389_v13, %v6387_v63 }
 0x9b0   :  { %v3107_v40 = vadd.f32 %v4767_v2, %v3071_v26  ;;  %v3074_v18 = vadd.f32 %v5429_v21, %v8217_v17 }
 0x9b1   :  { %5871 = vmatmul.mubr.bf16.gmra.mrb[232].mxu0 %v3154_v11 }
 0x9b2   :  { %v3108_v52 = vadd.f32 %v4768_v9, %v3074_v18  ;;  %6394 = vtanh.f32 %v3107_v40 }
 0x9b4   :  { %6396 = vtanh.f32 %v3108_v52  ;;  %v6391_v62 = vpop.eup %6390 }
 0x9b6   :  { %v6393_v53 = vpop.eup %6392 }
 0x9b7   :  { %v3155_v51 = vpack.c.bf16 %v6393_v53, %v6391_v62 }
 0x9b9   :  { %5874 = vmatprep.mubr.bf16.mxu0 %v3155_v51 }
 0x9bc   :  { %v6395_v24 = vpop.eup %6394 }
 0x9be   :  { %v6397_v14 = vpop.eup %6396 }
 0x9bf   :  { %v3156_v44 = vpack.c.bf16 %v6397_v14, %v6395_v24 }
 0x9c1   :  { %5875 = vmatmul.mubr.bf16.gmra.mrb[236].mxu0 %v3156_v44 }
 0x9c2   :  { %5894 = vmatprep.mubr.bf16.mxu0 %v8229_v28 }
 0x9c9   :  { %5895 = vmatmul.mubr.bf16.vlgmr.msra.gmra.mrb[240].mxu0 %v8236_v25 }
 0x9ca   :  { %5898 = vmatprep.mubr.bf16.mxu0 %v8250_v0 }
 0x9d1   :  { %5899 = vmatmul.mubr.bf16.gmra.mrb[244].mxu0 %v8263_v59 }
 0x9d2   :  { %5902 = vmatprep.mubr.bf16.mxu0 %v8276_v46 }
 0x9d9   :  { %5903 = vmatmul.mubr.bf16.gmra.mrb[248].mxu0 %v8286_v27 }
 0x9da   :  { %5906 = vmatprep.mubr.bf16.mxu0 %v8293_v29 }
 0x9e1   :  { %5907 = vmatmul.mubr.bf16.gmra.mrb[252].mxu0 %v8300_v35 }
 0x9e2   :  { %5910 = vmatprep.mubr.bf16.mxu0 %v8307_v31 }
 0x9e9   :  { %5911 = vmatmul.mubr.bf16.gmra.mrb[0].mxu0 %v8314_v55 }
 0x9ea   :  { %5914 = vmatprep.mubr.bf16.mxu0 %v8321_v60 }
 0x9f1   :  { %5915 = vmatmul.mubr.bf16.gmra.mrb[4].mxu0 %v3152_v45 }
 0x9f2   :  { %5918 = vmatprep.mubr.bf16.mxu0 %v3153_v41 }
 0x9f9   :  { %5919 = vmatmul.mubr.bf16.gmra.mrb[8].mxu0 %v3154_v11 }
 0x9fa   :  { %5922 = vmatprep.mubr.bf16.mxu0 %v3155_v51 }
 0xa01   :  { %5923 = vmatmul.mubr.bf16.gmra.mrb[12].mxu0 %v3156_v44 }
 0xa24   :  { %v8349_v17 = vpop.f32.mrb[208].mxu0 }
 0xa25   :  { %v8351_v28 = vpop.f32.mrb[209].mxu0 }
 0xa26   :  { %v8353_v25 = vpop.f32.mrb[210].mxu0 }
 0xa27   :  { %v8355_v0 = vpop.f32.mrb[211].mxu0 }
 0xa34   :  { %v8357_v59 = vpop.f32.mrb[212].mxu0 }
 0xa35   :  { %v8359_v46 = vpop.f32.mrb[213].mxu0 }
 0xa36   :  { %v8361_v27 = vpop.f32.mrb[214].mxu0 }
 0xa37   :  { %v8363_v29 = vpop.f32.mrb[215].mxu0 }
 0xa44   :  { %v8365_v35 = vpop.f32.mrb[216].mxu0 }
 0xa45   :  { %v8367_v31 = vpop.f32.mrb[217].mxu0 }
 0xa46   :  { %v8369_v55 = vpop.f32.mrb[218].mxu0 }
 0xa47   :  { %v8371_v60 = vpop.f32.mrb[219].mxu0 }
 0xa54   :  { %v8373_v54 = vpop.f32.mrb[220].mxu0 }
 0xa55   :  { %v8375_v56 = vpop.f32.mrb[221].mxu0 }
 0xa56   :  { %v8377_v32 = vpop.f32.mrb[222].mxu0 }
 0xa57   :  { %v8379_v6 = vpop.f32.mrb[223].mxu0 }
 0xa64   :  { %v8381_v34 = vpop.f32.mrb[224].mxu0 }
 0xa65   :  { %v8383_v37 = vpop.f32.mrb[225].mxu0 }
 0xa66   :  { %v8385_v45 = vpop.f32.mrb[226].mxu0 }
 0xa67   :  { %v8387_v22 = vpop.f32.mrb[227].mxu0 }
 0xa74   :  { %v8389_v15 = vpop.f32.mrb[228].mxu0 }
 0xa75   :  { %v8391_v47 = vpop.f32.mrb[229].mxu0 }
 0xa76   :  { %v8393_v7 = vpop.f32.mrb[230].mxu0 }
 0xa77   :  { %v8395_v3 = vpop.f32.mrb[231].mxu0 }
 0xa84   :  { %v8397_v36 = vpop.f32.mrb[232].mxu0 }
 0xa85   :  { %v8399_v19 = vpop.f32.mrb[233].mxu0 }
 0xa86   :  { %v8401_v57 = vpop.f32.mrb[234].mxu0 }
 0xa87   :  { %v8403_v5 = vpop.f32.mrb[235].mxu0 }
 0xa94   :  { %v8405_v39 = vpop.f32.mrb[236].mxu0 }
 0xa95   :  { %v8407_v48 = vpop.f32.mrb[237].mxu0 }
 0xa96   :  { %v8409_v33 = vpop.f32.mrb[238].mxu0 }
 0xa97   :  { %v8411_v50 = vpop.f32.mrb[239].mxu0 }
 0xa9c   :  { %v5896_v4 = vpop.f32.mrb[240].mxu0 }
 0xa9d   :  { %v3769_v16 = vpop.f32.mrb[241].mxu0 }
 0xa9e   :  { %v5897_v58 = vpop.f32.mrb[242].mxu0 }
 0xa9f   :  { %v3897_v41 = vpack.c.bf16 %v5897_v58, %v5896_v4  ;;  %v3772_v1 = vpop.f32.mrb[243].mxu0 }
 0xaa0   :  { %v3896_v38 = vpack.c.bf16 %v3772_v1, %v3769_v16 }
 0xaa4   :  { %v5900_v42 = vpop.f32.mrb[244].mxu0 }
 0xaa5   :  { %v3785_v20 = vpop.f32.mrb[245].mxu0 }
 0xaa6   :  { %v5901_v10 = vpop.f32.mrb[246].mxu0 }
 0xaa7   :  { %v3899_v30 = vpack.c.bf16 %v5901_v10, %v5900_v42  ;;  %v3788_v61 = vpop.f32.mrb[247].mxu0 }
 0xaa8   :  { %v3898_v43 = vpack.c.bf16 %v3788_v61, %v3785_v20 }
 0xaac   :  { %v5904_v12 = vpop.f32.mrb[248].mxu0 }
 0xaad   :  { %v3801_v63 = vpop.f32.mrb[249].mxu0 }
 0xaae   :  { %v5905_v8 = vpop.f32.mrb[250].mxu0 }
 0xaaf   :  { %v3901_v13 = vpack.c.bf16 %v5905_v8, %v5904_v12  ;;  %v3804_v23 = vpop.f32.mrb[251].mxu0 }
 0xab0   :  { %v3900_v2 = vpack.c.bf16 %v3804_v23, %v3801_v63 }
 0xab4   :  { %v5908_v26 = vpop.f32.mrb[252].mxu0 }
 0xab5   :  { %v3817_v21 = vpop.f32.mrb[253].mxu0 }
 0xab6   :  { %v5909_v11 = vpop.f32.mrb[254].mxu0 }
 0xab7   :  { %v3903_v40 = vpack.c.bf16 %v5909_v11, %v5908_v26  ;;  %v3820_v49 = vpop.f32.mrb[255].mxu0  ;;  %v6752_v11 = vld [vmem:[#allocation2 + $0x18] sm:$0xff] }
 0xab8   :  { %v3902_v9 = vpack.c.bf16 %v3820_v49, %v3817_v21  ;;  %v6754_v49 = vld [vmem:[#allocation2 + $0x28] sm:$0xff] }
 0xabc   :  { %v5912_v18 = vpop.f32.mrb[0].mxu0 }
 0xabd   :  { %v3833_v52 = vpop.f32.mrb[1].mxu0 }
 0xabe   :  { %v5913_v62 = vpop.f32.mrb[2].mxu0 }
 0xabf   :  { %v3905_v53 = vpack.c.bf16 %v5913_v62, %v5912_v18  ;;  %v3836_v51 = vpop.f32.mrb[3].mxu0  ;;  %v6756_v18 = vld [vmem:[#allocation2 + $0x38] sm:$0xff]  ;;  %v6759_v62 = vld [vmem:[#allocation2 + $0x40] sm:$0xff] }
 0xac0   :  { %v3904_v24 = vpack.c.bf16 %v3836_v51, %v3833_v52  ;;  %v6757_v52 = vld [vmem:[#allocation2 + $0x30] sm:$0xff]  ;;  %v6763_v51 = vld [vmem:[#allocation2 + $0x60] sm:$0xff] }
 0xac2   :  { %5478 = vmatprep.subr.bf16.mxu1 %v3904_v24  ;;  %v6764_v24 = vld [vmem:[#allocation2 + $0x78] sm:$0xff] }
 0xac3   :  { %5479 = vmatpush3.bf16.msra.mxu1 %v3896_v38 }
 0xac4   :  { %v5916_v14 = vpop.f32.mrb[4].mxu0  ;;  %5480 = vmatprep.subr.bf16.mxu1 %v3905_v53  ;;  %v6762_v53 = vld [vmem:[#allocation2 + $0x68] sm:$0xff] }
 0xac5   :  { %v3849_v44 = vpop.f32.mrb[5].mxu0 }
 0xac6   :  { %v5917_v4 = vpop.f32.mrb[6].mxu0 }
 0xac7   :  { %v3907_v16 = vpack.c.bf16 %v5917_v4, %v5916_v14  ;;  %v3852_v58 = vpop.f32.mrb[7].mxu0  ;;  %5481 = vmatpush3.bf16.msra.mxu1 %v3897_v41  ;;  %v6765_v14 = vld [vmem:[#allocation2 + $0x70] sm:$0xff]  ;;  %v6767_v4 = vld [vmem:[#allocation2 + $0x80] sm:$0xff] }
 0xac8   :  { %v3906_v1 = vpack.c.bf16 %v3852_v58, %v3849_v44  ;;  %v6766_v44 = vld [vmem:[#allocation2 + $0x88] sm:$0xff]  ;;  %v6769_v58 = vld [vmem:[#allocation2 + $0x90] sm:$0xff] }
 0xaca   :  { %5482 = vmatprep.subr.bf16.mxu1 %v3906_v1  ;;  %v6770_v1 = vld [vmem:[#allocation2 + $0xa8] sm:$0xff] }
 0xacb   :  { %5483 = vmatpush3.bf16.msra.mxu1 %v3898_v43  ;;  %v6751_v43 = vld [vmem:[#allocation2] sm:$0xff] }
 0xacc   :  { %v5920_v42 = vpop.f32.mrb[8].mxu0  ;;  %5484 = vmatprep.subr.bf16.mxu1 %v3907_v16  ;;  %v6768_v16 = vld [vmem:[#allocation2 + $0x98] sm:$0xff] }
 0xacd   :  { %v3865_v20 = vpop.f32.mrb[9].mxu0 }
 0xace   :  { %v5921_v10 = vpop.f32.mrb[10].mxu0 }
 0xacf   :  { %v3909_v61 = vpack.c.bf16 %v5921_v10, %v5920_v42  ;;  %v3868_v12 = vpop.f32.mrb[11].mxu0  ;;  %5485 = vmatpush3.bf16.msra.mxu1 %v3899_v30  ;;  %v6753_v30 = vld [vmem:[#allocation2 + $0x10] sm:$0xff]  ;;  %v6771_v42 = vld [vmem:[#allocation2 + $0xa0] sm:$0xff] }
 0xad0   :  { %v3908_v63 = vpack.c.bf16 %v3868_v12, %v3865_v20  ;;  %v6772_v20 = vld [vmem:[#allocation2 + $0xb8] sm:$0xff]  ;;  %v6773_v10 = vld [vmem:[#allocation2 + $0xb0] sm:$0xff]  ;;  %v6775_v12 = vld [vmem:[#allocation2 + $0xc0] sm:$0xff] }
 0xad2   :  { %5486 = vmatprep.subr.bf16.mxu1 %v3908_v63  ;;  %v6776_v63 = vld [vmem:[#allocation2 + $0xd8] sm:$0xff] }
 0xad3   :  { %5487 = vmatpush3.bf16.msra.mxu1 %v3900_v2  ;;  %v6755_v2 = vld [vmem:[#allocation2 + $0x20] sm:$0xff] }
 0xad4   :  { %v5924_v38 = vpop.f32.mrb[12].mxu0  ;;  %5488 = vmatprep.subr.bf16.mxu1 %v3909_v61  ;;  %v6774_v61 = vld [vmem:[#allocation2 + $0xc8] sm:$0xff] }
 0xad5   :  { %v3881_v8 = vpop.f32.mrb[13].mxu0 }
 0xad6   :  { %v5925_v23 = vpop.f32.mrb[14].mxu0 }
 0xad7   :  { %v3911_v26 = vpack.c.bf16 %v5925_v23, %v5924_v38  ;;  %v3884_v21 = vpop.f32.mrb[15].mxu0  ;;  %5489 = vmatpush3.bf16.msra.mxu1 %v3901_v13  ;;  %v6758_v13 = vld [vmem:[#allocation2 + $0x48] sm:$0xff]  ;;  %v6777_v38 = vld [vmem:[#allocation2 + $0xd0] sm:$0xff]  ;;  %v6779_v23 = vld [vmem:[#allocation2 + $0xe0] sm:$0xff] }
 0xad8   :  { %v3910_v41 = vpack.c.bf16 %v3884_v21, %v3881_v8  ;;  %v6778_v8 = vld [vmem:[#allocation2 + $0xe8] sm:$0xff]  ;;  %v6781_v21 = vld [vmem:[#allocation2 + $0xf0] sm:$0xff] }
 0xada   :  { %5490 = vmatprep.subr.bf16.mxu1 %v3910_v41  ;;  %v4803_v41 = vclamps-f32 %v8351_v28, 0.99999 }
 0xadb   :  { %5491 = vmatpush3.bf16.msra.mxu1 %v3902_v9  ;;  %v6760_v9 = vld [vmem:[#allocation2 + $0x58] sm:$0xff] }
 0xadc   :  { %5492 = vmatprep.subr.bf16.mxu1 %v3911_v26  ;;  %v6780_v26 = vld [vmem:[#allocation2 + $0xf8] sm:$0xff]  ;;  %v3446_v28 = vadd.f32 1.0, %v4803_v41 }
 0xadf   :  { %5493 = vmatpush3.bf16.msra.mxu1 %v3903_v40  ;;  %v6761_v40 = vld [vmem:[#allocation2 + $0x50] sm:$0xff] }
 0xae2   :  { %3953 = vmatmul.mubr.bf16.vlgmr.msra.gmra.mrb[208].mxu1 %v6751_v43  ;;  %v4804_v43 = vclamps-f32 %v8355_v0, 0.99999 }
 0xae3   :  { %3960 = vmatprep.mubr.bf16.mxu1 %v6752_v11  ;;  %v3478_v11 = vsub.f32 1.0, %v4803_v41 }
 0xae5   :  { %6398 = vrcp.f32 %v3478_v11  ;;  %v8429_v11 = vld [vmem:[%s8998_s5 + $0x4] ss:$0 sm:$0xff] }
 0xaea   :  { %3961 = vmatmul.mubr.bf16.gmra.mrb[212].mxu1 %v6753_v30  ;;  %v3479_v30 = vsub.f32 1.0, %v4804_v43 }
 0xaeb   :  { %3968 = vmatprep.mubr.bf16.mxu1 %v6754_v49  ;;  %v4805_v49 = vclamps-f32 %v8349_v17, 0.99999  ;;  %v4809_v17 = vclamps-f32 %v8357_v59, 0.99999 }
 0xaec   :  { %6400 = vrcp.f32 %v3479_v30 }
 0xaf2   :  { %3969 = vmatmul.mubr.bf16.gmra.mrb[216].mxu1 %v6755_v2  ;;  %v4806_v2 = vclamps-f32 %v8353_v25, 0.99999 }
 0xaf3   :  { %3976 = vmatprep.mubr.bf16.mxu1 %v6756_v18  ;;  %v3480_v18 = vsub.f32 1.0, %v4805_v49 }
 0xaf5   :  { %6402 = vrcp.f32 %v3480_v18 }
 0xafa   :  { %3977 = vmatmul.mubr.bf16.gmra.mrb[220].mxu1 %v6757_v52  ;;  %v3481_v52 = vsub.f32 1.0, %v4806_v2 }
 0xafb   :  { %3984 = vmatprep.mubr.bf16.mxu1 %v6758_v13  ;;  %v4807_v13 = vclamps-f32 %v8359_v46, 0.99999  ;;  %v4810_v46 = vclamps-f32 %v8361_v27, 0.99999 }
 0xafc   :  { %6404 = vrcp.f32 %v3481_v52 }
 0xb02   :  { %3985 = vmatmul.mubr.bf16.gmra.mrb[224].mxu1 %v6759_v62  ;;  %v6399_v62 = vpop.eup %6398 }
 0xb03   :  { %3992 = vmatprep.mubr.bf16.mxu1 %v6760_v9  ;;  %v4808_v9 = vclamps-f32 %v8363_v29, 0.99999  ;;  %v6401_v0 = vpop.eup %6400 }
 0xb04   :  { %v6403_v25 = vpop.eup %6402 }
 0xb0a   :  { %3993 = vmatmul.mubr.bf16.gmra.mrb[228].mxu1 %v6761_v40  ;;  %v3482_v40 = vsub.f32 1.0, %v4807_v13 }
 0xb0b   :  { %4000 = vmatprep.mubr.bf16.mxu1 %v6762_v53  ;;  %v3542_v53 = vmul.f32 %v6399_v62, %v3446_v28 }
 0xb0c   :  { %6406 = vrcp.f32 %v3482_v40 }
 0xb0d   :  { %6408 = vlog2.f32 %v3542_v53 }
 0xb12   :  { %4001 = vmatmul.mubr.bf16.gmra.mrb[232].mxu1 %v6763_v51  ;;  %v3447_v51 = vadd.f32 1.0, %v4804_v43 }
 0xb13   :  { %4008 = vmatprep.mubr.bf16.mxu1 %v6764_v24  ;;  %v3483_v24 = vsub.f32 1.0, %v4808_v9 }
 0xb15   :  { %6410 = vrcp.f32 %v3483_v24 }
 0xb1a   :  { %4009 = vmatmul.mubr.bf16.gmra.mrb[236].mxu1 %v6765_v14  ;;  %v3543_v14 = vmul.f32 %v6401_v0, %v3447_v51 }
 0xb1b   :  { %4016 = vmatprep.mubr.bf16.mxu1 %v6766_v44  ;;  %v3448_v44 = vadd.f32 1.0, %v4805_v49 }
 0xb1c   :  { %6412 = vlog2.f32 %v3543_v14 }
 0xb1d   :  { %v3544_v29 = vmul.f32 %v6403_v25, %v3448_v44 }
 0xb22   :  { %4017 = vmatmul.mubr.bf16.gmra.mrb[240].mxu1 %v6767_v4  ;;  %v3484_v4 = vsub.f32 1.0, %v4809_v17 }
 0xb23   :  { %4024 = vmatprep.mubr.bf16.mxu1 %v6768_v16  ;;  %v6405_v16 = vpop.eup %6404 }
 0xb24   :  { %6414 = vrcp.f32 %v3484_v4 }
 0xb25   :  { %6416 = vlog2.f32 %v3544_v29 }
 0xb2a   :  { %4025 = vmatmul.mubr.bf16.gmra.mrb[244].mxu1 %v6769_v58  ;;  %v4811_v58 = vclamps-f32 %v8367_v31, 0.99999  ;;  %v4813_v31 = vclamps-f32 %v8365_v35, 0.99999 }
 0xb2b   :  { %4032 = vmatprep.mubr.bf16.mxu1 %v6770_v1  ;;  %v3449_v1 = vadd.f32 1.0, %v4806_v2 }
 0xb2c   :  { %v3486_v59 = vsub.f32 1.0, %v4811_v58  ;;  %v3488_v62 = vsub.f32 1.0, %v4813_v31 }
 0xb32   :  { %4033 = vmatmul.mubr.bf16.gmra.mrb[248].mxu1 %v6771_v42  ;;  %v3485_v42 = vsub.f32 1.0, %v4810_v46 }
 0xb33   :  { %4040 = vmatprep.mubr.bf16.mxu1 %v6772_v20  ;;  %v3545_v20 = vmul.f32 %v6405_v16, %v3449_v1  ;;  %v3453_v16 = vadd.f32 1.0, %v4810_v46 }
 0xb34   :  { %6418 = vrcp.f32 %v3485_v42 }
 0xb35   :  { %6420 = vlog2.f32 %v3545_v20 }
 0xb36   :  { %6422 = vrcp.f32 %v3486_v59 }
 0xb3a   :  { %4041 = vmatmul.mubr.bf16.gmra.mrb[252].mxu1 %v6773_v10  ;;  %v6407_v10 = vpop.eup %6406 }
 0xb3b   :  { %4048 = vmatprep.mubr.bf16.mxu1 %v6774_v61  ;;  %v3450_v61 = vadd.f32 1.0, %v4807_v13  ;;  %v3452_v13 = vadd.f32 1.0, %v4809_v17 }
 0xb42   :  { %4049 = vmatmul.mubr.bf16.gmra.mrb[0].mxu1 %v6775_v12  ;;  %v4812_v12 = vclamps-f32 %v8371_v60, 0.99999 }
 0xb43   :  { %4056 = vmatprep.mubr.bf16.mxu1 %v6776_v63  ;;  %v6409_v63 = vpop.eup %6408 }
 0xb44   :  { %v6411_v27 = vpop.eup %6410  ;;  %v3575_v41 = vmul.f32 0.6931472, %v6409_v63  ;;  %v3454_v63 = vadd.f32 1.0, %v4811_v58 }
 0xb46   :  { %v3638_v0 = vmul.f32 0.5, %v3575_v41 }
 0xb4a   :  { %4057 = vmatmul.mubr.bf16.gmra.mrb[4].mxu1 %v6777_v38  ;;  %v3546_v38 = vmul.f32 %v6407_v10, %v3450_v61  ;;  %v4145_v10 = vlaneseq }
 0xb4b   :  { %4064 = vmatprep.mubr.bf16.mxu1 %v6778_v8  ;;  %v6413_v8 = vpop.eup %6412 }
 0xb4c   :  { %v6415_v49 = vpop.eup %6414  ;;  %6424 = vlog2.f32 %v3546_v38  ;;  %v3577_v52 = vmul.f32 0.6931472, %v6413_v8 }
 0xb4d   :  { %v6417_v40 = vpop.eup %6416  ;;  %v3548_v24 = vmul.f32 %v6415_v49, %v3452_v13 }
 0xb4e   :  { %v6419_v14 = vpop.eup %6418  ;;  %v3639_v44 = vmul.f32 0.5, %v3577_v52  ;;  %v3579_v1 = vmul.f32 0.6931472, %v6417_v40 }
 0xb4f   :  { %v6421_v17 = vpop.eup %6420  ;;  %v3549_v61 = vmul.f32 %v6419_v14, %v3453_v16 }
 0xb50   :  { %v6423_v42 = vpop.eup %6422  ;;  %v3581_v46 = vmul.f32 0.6931472, %v6421_v17 }
 0xb52   :  { %4065 = vmatmul.mubr.bf16.gmra.mrb[8].mxu1 %v6779_v23  ;;  %v3451_v23 = vadd.f32 1.0, %v4808_v9  ;;  %v4814_v9 = vclamps-f32 %v8369_v55, 0.99999  ;;  %v4819_v55 = vclamps-f32 %v8383_v37, 0.99999 }
 0xb53   :  { %4072 = vmatprep.mubr.bf16.mxu1 %v6780_v26  ;;  %v3487_v26 = vsub.f32 1.0, %v4812_v12 }
 0xb54   :  { %v3547_v43 = vmul.f32 %v6411_v27, %v3451_v23  ;;  %v3489_v29 = vsub.f32 1.0, %v4814_v9  ;;  %v4815_v27 = vclamps-f32 %v8375_v56, 0.99999 }
 0xb55   :  { %6426 = vrcp.f32 %v3487_v26  ;;  %v3550_v26 = vmul.f32 %v6423_v42, %v3454_v63  ;;  %v3456_v42 = vadd.f32 1.0, %v4813_v31 }
 0xb56   :  { %6428 = vlog2.f32 %v3547_v43  ;;  %v6425_v43 = vpop.eup %6424  ;;  %v3490_v58 = vsub.f32 1.0, %v4815_v27 }
 0xb57   :  { %6430 = vrcp.f32 %v3488_v62  ;;  %v3641_v62 = vmul.f32 0.5, %v3581_v46 }
 0xb5a   :  { %4073 = vmatmul.mubr.bf16.gmra.mrb[12].mxu1 %v6781_v21 }
 0xb5f   :  { %v6427_v52 = vpop.eup %6426 }
 0xb60   :  { %v6429_v40 = vpop.eup %6428 }
 0xbb5   :  { %v5494_v21 = vpop.f32.mrb[208].mxu1 }
 0xbb6   :  { %v5495_v30 = vpop.f32.mrb[209].mxu1 }
 0xbb7   :  { %v5496_v2 = vadd.f32 %v5495_v30, %v5494_v21  ;;  %v5497_v18 = vpop.f32.mrb[210].mxu1  ;;  %v3640_v21 = vmul.f32 0.5, %v3579_v1  ;;  %v4816_v30 = vclamps-f32 %v8379_v6, 0.99999 }
 0xbb8   :  { %v5498_v28 = vpop.f32.mrb[211].mxu1 }
 0xbb9   :  { %v3955_v53 = vadd.f32 %v5496_v2, %v8429_v11  ;;  %v5499_v51 = vadd.f32 %v5498_v28, %v5497_v18  ;;  %v8441_v18 = vand.u32 127, %v4145_v10 }
 0xbbb   :  { %v4081_v25 = vadd.f32 %v3955_v53, %v3638_v0  ;;  %v3958_v4 = vadd.f32 %v5499_v51, %v8429_v11  ;;  %v3455_v0 = vadd.f32 1.0, %v4812_v12  ;;  %v4817_v53 = vclamps-f32 %v8373_v54, 0.99999 }
 0xbbc   :  { %v3583_v51 = vmul.f32 0.6931472, %v6425_v43  ;;  %vm4147_vm0 = vcmp.lt.s32.totalorder %v8441_v18, 8  ;;  %v3585_v12 = vmul.f32 0.6931472, %v6429_v40  ;;  %v3457_v43 = vadd.f32 1.0, %v4814_v9 }
 0xbbd   :  { %6432 = vtanh.f32 %v4081_v25  ;;  %v4082_v20 = vadd.f32 %v3958_v4, %v3639_v44  ;;  %v5500_v59 = vpop.f32.mrb[212].mxu1  ;;  %v6431_v44 = vpop.eup %6430  ;;  %v3551_v4 = vmul.f32 %v6427_v52, %v3455_v0 }
 0xbbe   :  { %6434 = vlog2.f32 %v3548_v24  ;;  %v5501_v38 = vpop.f32.mrb[213].mxu1  ;;  %v3491_v24 = vsub.f32 1.0, %v4816_v30  ;;  %v3552_v31 = vmul.f32 %v6431_v44, %v3456_v42 }
 0xbbf   :  { %6436 = vtanh.f32 %v4082_v20  ;;  %v5502_v8 = vadd.f32 %v5501_v38, %v5500_v59  ;;  %v5503_v23 = vpop.f32.mrb[214].mxu1  ;;  %v3492_v20 = vsub.f32 1.0, %v4817_v53  ;;  %v3642_v59 = vmul.f32 0.5, %v3583_v51 }
 0xbc0   :  { %6438 = vrcp.f32 %v3489_v29  ;;  %v5504_v41 = vpop.f32.mrb[215].mxu1  ;;  %v4818_v38 = vclamps-f32 %v8377_v32, 0.99999 }
 0xbc1   :  { %v3963_v49 = vadd.f32 %v5502_v8, %v8429_v11  ;;  %v5505_v2 = vadd.f32 %v5504_v41, %v5503_v23  ;;  %6440 = vlog2.f32 %v3549_v61 }
 0xbc2   :  { %6442 = vlog2.f32 %v3550_v26  ;;  %v3643_v26 = vmul.f32 0.5, %v3585_v12  ;;  %v3458_v12 = vadd.f32 1.0, %v4815_v27 }
 0xbc3   :  { %v4083_v13 = vadd.f32 %v3963_v49, %v3640_v21  ;;  %v3966_v28 = vadd.f32 %v5505_v2, %v8429_v11 }
 0xbc5   :  { %6444 = vtanh.f32 %v4083_v13  ;;  %v4084_v14 = vadd.f32 %v3966_v28, %v3641_v62  ;;  %v5506_v25 = vpop.f32.mrb[216].mxu1 }
 0xbc6   :  { %6446 = vrcp.f32 %v3490_v58  ;;  %v5507_v17 = vpop.f32.mrb[217].mxu1  ;;  %v3493_v58 = vsub.f32 1.0, %v4818_v38 }
 0xbc7   :  { %v6433_v16 = vpop.eup %6432  ;;  %6448 = vtanh.f32 %v4084_v14  ;;  %v5508_v29 = vadd.f32 %v5507_v17, %v5506_v25  ;;  %v5509_v60 = vpop.f32.mrb[218].mxu1 }
 0xbc8   :  { %v6435_v1 = vpop.eup %6434  ;;  %v5510_v10 = vpop.f32.mrb[219].mxu1  ;;  %v8458_v61 = vsel %vm4147_vm0, %v6433_v16, -1e+30  ;;  %6450 = vrcp.f32 %v3491_v24  ;;  %v4820_v16 = vclamps-f32 %v8387_v22, 0.99999 }
 0xbc9   :  { %v6437_v63 = vpop.eup %6436  ;;  %v3971_v8 = vadd.f32 %v5508_v29, %v8429_v11  ;;  %v5511_v23 = vadd.f32 %v5510_v10, %v5509_v60  ;;  %4180 = vmax.xlane.f32.xlu0 %v8458_v61  ;;  %6452 = vlog2.f32 %v3551_v4  ;;  %v3587_v2 = vmul.f32 0.6931472, %v6435_v1 }
 0xbca   :  { %v6439_v35 = vpop.eup %6438  ;;  %6454 = vrcp.f32 %v3492_v20  ;;  %v8468_v49 = vsel %vm4147_vm0, %v6437_v63, -1e+30  ;;  %v3494_v1 = vsub.f32 1.0, %v4819_v55  ;;  %v3459_v20 = vadd.f32 1.0, %v4816_v30 }
 0xbcb   :  { %v4085_v46 = vadd.f32 %v3971_v8, %v3642_v59  ;;  %v3974_v21 = vadd.f32 %v5511_v23, %v8429_v11  ;;  %v6441_v41 = vpop.eup %6440  ;;  %v3553_v28 = vmul.f32 %v6439_v35, %v3457_v43  ;;  %v3644_v25 = vmul.f32 0.5, %v3587_v2 }
 0xbcc   :  { %v6443_v62 = vpop.eup %6442  ;;  %v3589_v24 = vmul.f32 0.6931472, %v6441_v41  ;;  %v4821_v35 = vclamps-f32 %v8381_v34, 0.99999  ;;  %v3495_v27 = vsub.f32 1.0, %v4820_v16  ;;  %v3460_v43 = vadd.f32 1.0, %v4817_v53 }
 0xbcd   :  { %6456 = vtanh.f32 %v4085_v46  ;;  %v4086_v52 = vadd.f32 %v3974_v21, %v3643_v26  ;;  %v5512_v13 = vpop.f32.mrb[220].mxu1  ;;  %4182 = vmax.xlane.f32.xlu0 %v8468_v49  ;;  %v3591_v56 = vmul.f32 0.6931472, %v6443_v62  ;;  %v3463_v37 = vadd.f32 1.0, %v4820_v16 }
 0xbce   :  { %6458 = vlog2.f32 %v3552_v31  ;;  %v5513_v9 = vpop.f32.mrb[221].mxu1  ;;  %v3645_v10 = vmul.f32 0.5, %v3589_v24  ;;  %v3496_v62 = vsub.f32 1.0, %v4821_v35 }
 0xbcf   :  { %v6445_v40 = vpop.eup %6444  ;;  %6460 = vtanh.f32 %v4086_v52  ;;  %v5514_v0 = vadd.f32 %v5513_v9, %v5512_v13  ;;  %v5515_v51 = vpop.f32.mrb[222].mxu1 }
 0xbd0   :  { %v6447_v14 = vpop.eup %6446  ;;  %v5516_v44 = vpop.f32.mrb[223].mxu1  ;;  %v8476_v4 = vsel %vm4147_vm0, %v6445_v40, -1e+30  ;;  %6462 = vrcp.f32 %v3493_v58 }
 0xbd1   :  { %v6449_v17 = vpop.eup %6448  ;;  %v3979_v29 = vadd.f32 %v5514_v0, %v8429_v11  ;;  %v5517_v60 = vadd.f32 %v5516_v44, %v5515_v51  ;;  %4184 = vmax.xlane.f32.xlu1 %v8476_v4  ;;  %6464 = vlog2.f32 %v3553_v28  ;;  %v3554_v23 = vmul.f32 %v6447_v14, %v3458_v12 }
 0xbd2   :  { %v6451_v42 = vpop.eup %6450  ;;  %v8491_v31 = vsel %vm4147_vm0, %v6449_v17, -1e+30  ;;  %v3646_v28 = vmul.f32 0.5, %v3591_v56  ;;  %v4822_v51 = vclamps-f32 %v8385_v45, 0.99999  ;;  %v3461_v12 = vadd.f32 1.0, %v4818_v38 }
 0xbd3   :  { %v4087_v59 = vadd.f32 %v3979_v29, %v3644_v25  ;;  %v3982_v63 = vadd.f32 %v5517_v60, %v8429_v11  ;;  %v6453_v8 = vpop.eup %6452  ;;  %v3555_v26 = vmul.f32 %v6451_v42, %v3459_v20 }
 0xbd4   :  { %v6455_v30 = vpop.eup %6454  ;;  %v3593_v52 = vmul.f32 0.6931472, %v6453_v8  ;;  %v3497_v42 = vsub.f32 1.0, %v4822_v51 }
 0xbd5   :  { %6466 = vtanh.f32 %v4087_v59  ;;  %v4088_v46 = vadd.f32 %v3982_v63, %v3645_v10  ;;  %v5518_v6 = vpop.f32.mrb[224].mxu1  ;;  %4186 = vmax.xlane.f32.xlu1 %v8491_v31  ;;  %v3556_v24 = vmul.f32 %v6455_v30, %v3460_v43  ;;  %v4823_v63 = vclamps-f32 %v8391_v47, 0.99999 }
 0xbd6   :  { %6468 = vrcp.f32 %v3494_v1  ;;  %v5519_v21 = vpop.f32.mrb[225].mxu1  ;;  %v3647_v17 = vmul.f32 0.5, %v3593_v52 }
 0xbd7   :  { %v6457_v41 = vpop.eup %6456  ;;  %6470 = vtanh.f32 %v4088_v46  ;;  %v5520_v2 = vadd.f32 %v5519_v21, %v5518_v6  ;;  %v5521_v58 = vpop.f32.mrb[226].mxu1  ;;  %v4824_v21 = vclamps-f32 %v8395_v3, 0.99999  ;;  %v3498_v52 = vsub.f32 1.0, %v4823_v63 }
 0xbd8   :  { %v6459_v13 = vpop.eup %6458  ;;  %6472 = vlog2.f32 %v3554_v23  ;;  %v5522_v9 = vpop.f32.mrb[227].mxu1  ;;  %v8502_v40 = vsel %vm4147_vm0, %v6457_v41, -1e+30 }
 0xbd9   :  { %v6461_v0 = vpop.eup %6460  ;;  %6474 = vrcp.f32 %v3495_v27  ;;  %v3987_v54 = vadd.f32 %v5520_v2, %v8429_v11  ;;  %v5523_v53 = vadd.f32 %v5522_v9, %v5521_v58  ;;  %4188 = vmax.xlane.f32.xlu0 %v8502_v40  ;;  %v3595_v1 = vmul.f32 0.6931472, %v6459_v13 }
 0xbda   :  { %6476 = vlog2.f32 %v3555_v26  ;;  %v8509_v14 = vsel %vm4147_vm0, %v6461_v0, -1e+30  ;;  %v6463_v25 = vpop.eup %6462  ;;  %v3462_v58 = vadd.f32 1.0, %v4819_v55  ;;  %v4825_v55 = vclamps-f32 %v8389_v15, 0.99999 }
 0xbdb   :  { %v4089_v44 = vadd.f32 %v3987_v54, %v3646_v28  ;;  %v3990_v29 = vadd.f32 %v5523_v53, %v8429_v11  ;;  %4190 = vmax.xlane.f32.xlu1 %v8509_v14  ;;  %v6465_v60 = vpop.eup %6464  ;;  %6478 = vrcp.f32 %v3496_v62  ;;  %v3557_v10 = vmul.f32 %v6463_v25, %v3461_v12 }
 0xbdc   :  { %v3597_v46 = vmul.f32 0.6931472, %v6465_v60  ;;  %v3648_v38 = vmul.f32 0.5, %v3595_v1  ;;  %v3467_v47 = vadd.f32 1.0, %v4824_v21 }
 0xbdd   :  { %6480 = vtanh.f32 %v4089_v44  ;;  %v4090_v20 = vadd.f32 %v3990_v29, %v3647_v17  ;;  %v5524_v59 = vpop.f32.mrb[228].mxu1 }
 0xbde   :  { %6482 = vlog2.f32 %v3556_v24  ;;  %v5525_v8 = vpop.f32.mrb[229].mxu1  ;;  %v3649_v9 = vmul.f32 0.5, %v3597_v46  ;;  %v3499_v24 = vsub.f32 1.0, %v4824_v21  ;;  %v4830_v21 = vclamps-f32 %v8401_v57, 0.99999 }
 0xbdf   :  { %v6467_v23 = vpop.eup %6466  ;;  %6484 = vtanh.f32 %v4090_v20  ;;  %v5526_v56 = vadd.f32 %v5525_v8, %v5524_v59  ;;  %v5527_v27 = vpop.f32.mrb[230].mxu1  ;;  %v4826_v8 = vclamps-f32 %v8393_v7, 0.99999 }
 0xbe0   :  { %v6469_v32 = vpop.eup %6468  ;;  %v5528_v6 = vpop.f32.mrb[231].mxu1  ;;  %v8520_v30 = vsel %vm4147_vm0, %v6467_v23, -1e+30  ;;  %6486 = vrcp.f32 %v3497_v42  ;;  %v3464_v42 = vadd.f32 1.0, %v4821_v35 }
 0xbe1   :  { %v6471_v26 = vpop.eup %6470  ;;  %v3995_v41 = vadd.f32 %v5526_v56, %v8429_v11  ;;  %v5529_v43 = vadd.f32 %v5528_v6, %v5527_v27  ;;  %4192 = vmax.xlane.f32.xlu0 %v8520_v30  ;;  %6488 = vlog2.f32 %v3557_v10  ;;  %v3558_v53 = vmul.f32 %v6469_v32, %v3462_v58 }
 0xbe2   :  { %v6473_v2 = vpop.eup %6472  ;;  %v8531_v13 = vsel %vm4147_vm0, %v6471_v26, -1e+30  ;;  %v3500_v10 = vsub.f32 1.0, %v4825_v55  ;;  %v3465_v58 = vadd.f32 1.0, %v4822_v51  ;;  %v3469_v15 = vadd.f32 1.0, %v4826_v8 }
 0xbe3   :  { %v6475_v62 = vpop.eup %6474  ;;  %v4091_v28 = vadd.f32 %v3995_v41, %v3648_v38  ;;  %v3998_v0 = vadd.f32 %v5529_v43, %v8429_v11  ;;  %4194 = vmax.xlane.f32.xlu1 %v8531_v13  ;;  %v3599_v17 = vmul.f32 0.6931472, %v6473_v2 }
 0xbe4   :  { %v6477_v54 = vpop.eup %6476  ;;  %v3559_v60 = vmul.f32 %v6475_v62, %v3463_v37  ;;  %v3501_v62 = vsub.f32 1.0, %v4826_v8 }
 0xbe5   :  { %6490 = vtanh.f32 %v4091_v28  ;;  %v4092_v25 = vadd.f32 %v3998_v0, %v3649_v9  ;;  %v5530_v44 = vpop.f32.mrb[232].mxu1  ;;  %v6479_v29 = vpop.eup %6478  ;;  %v3601_v20 = vmul.f32 0.6931472, %v6477_v54  ;;  %v3650_v34 = vmul.f32 0.5, %v3599_v17 }
 0xbe6   :  { %6492 = vrcp.f32 %v3498_v52  ;;  %v5531_v12 = vpop.f32.mrb[233].mxu1  ;;  %v3560_v32 = vmul.f32 %v6479_v29, %v3464_v42  ;;  %v4827_v54 = vclamps-f32 %v8399_v19, 0.99999 }
 0xbe7   :  { %v6481_v1 = vpop.eup %6480  ;;  %6494 = vtanh.f32 %v4092_v25  ;;  %v5532_v22 = vadd.f32 %v5531_v12, %v5530_v44  ;;  %v5533_v16 = vpop.f32.mrb[234].mxu1  ;;  %v3651_v41 = vmul.f32 0.5, %v3601_v20  ;;  %v4828_v12 = vclamps-f32 %v8403_v5, 0.99999 }
 0xbe8   :  { %v6483_v59 = vpop.eup %6482  ;;  %6496 = vlog2.f32 %v3558_v53  ;;  %v5534_v23 = vpop.f32.mrb[235].mxu1  ;;  %v8547_v56 = vsel %vm4147_vm0, %v6481_v1, -1e+30  ;;  %v3502_v20 = vsub.f32 1.0, %v4827_v54  ;;  %v4834_v5 = vclamps-f32 %v8409_v33, 0.99999 }
 0xbe9   :  { %v6485_v27 = vpop.eup %6484  ;;  %6498 = vrcp.f32 %v3499_v24  ;;  %v4003_v35 = vadd.f32 %v5532_v22, %v8429_v11  ;;  %v5535_v46 = vadd.f32 %v5534_v23, %v5533_v16  ;;  %4196 = vmax.xlane.f32.xlu0 %v8547_v56  ;;  %v3603_v52 = vmul.f32 0.6931472, %v6483_v59 }
 0xbea   :  { %6500 = vlog2.f32 %v3559_v60  ;;  %v8553_v38 = vsel %vm4147_vm0, %v6485_v27, -1e+30  ;;  %v6487_v6 = vpop.eup %6486  ;;  %v3466_v16 = vadd.f32 1.0, %v4823_v63  ;;  %v3503_v63 = vsub.f32 1.0, %v4828_v12 }
 0xbeb   :  { %v4093_v26 = vadd.f32 %v4003_v35, %v3650_v34  ;;  %v4006_v43 = vadd.f32 %v5535_v46, %v8429_v11  ;;  %4198 = vmax.xlane.f32.xlu1 %v8553_v38  ;;  %v6489_v2 = vpop.eup %6488  ;;  %6502 = vrcp.f32 %v3500_v10  ;;  %v3561_v0 = vmul.f32 %v6487_v6, %v3465_v58 }
 0xbec   :  { %v3605_v44 = vmul.f32 0.6931472, %v6489_v2  ;;  %v3652_v51 = vmul.f32 0.5, %v3603_v52  ;;  %v4829_v2 = vclamps-f32 %v8397_v36, 0.99999  ;;  %v3471_v19 = vadd.f32 1.0, %v4828_v12 }
 0xbed   :  { %6504 = vtanh.f32 %v4093_v26  ;;  %v4094_v28 = vadd.f32 %v4006_v43, %v3651_v41  ;;  %v5536_v9 = vpop.f32.mrb[236].mxu1  ;;  %v3473_v36 = vadd.f32 1.0, %v4830_v21 }
 0xbee   :  { %6506 = vlog2.f32 %v3560_v32  ;;  %v5537_v53 = vpop.f32.mrb[237].mxu1  ;;  %v3653_v27 = vmul.f32 0.5, %v3605_v44 }
 0xbef   :  { %v6491_v37 = vpop.eup %6490  ;;  %6508 = vtanh.f32 %v4094_v28  ;;  %v5538_v24 = vadd.f32 %v5537_v53, %v5536_v9  ;;  %v5539_v25 = vpop.f32.mrb[238].mxu1 }
 0xbf0   :  { %v6493_v45 = vpop.eup %6492  ;;  %v5540_v17 = vpop.f32.mrb[239].mxu1  ;;  %v8564_v29 = vsel %vm4147_vm0, %v6491_v37, -1e+30  ;;  %6510 = vrcp.f32 %v3501_v62 }
 0xbf1   :  { %v6495_v60 = vpop.eup %6494  ;;  %v4011_v1 = vadd.f32 %v5538_v24, %v8429_v11  ;;  %v5541_v42 = vadd.f32 %v5540_v17, %v5539_v25  ;;  %4200 = vmax.xlane.f32.xlu0 %v8564_v29  ;;  %6512 = vlog2.f32 %v3561_v0  ;;  %v3562_v46 = vmul.f32 %v6493_v45, %v3466_v16 }
 0xbf2   :  { %v6497_v22 = vpop.eup %6496  ;;  %v8575_v59 = vsel %vm4147_vm0, %v6495_v60, -1e+30  ;;  %v3468_v45 = vadd.f32 1.0, %v4825_v55 }
 0xbf3   :  { %v6499_v10 = vpop.eup %6498  ;;  %v4095_v23 = vadd.f32 %v4011_v1, %v3652_v51  ;;  %v4014_v34 = vadd.f32 %v5541_v42, %v8429_v11  ;;  %4202 = vmax.xlane.f32.xlu1 %v8575_v59  ;;  %v3607_v26 = vmul.f32 0.6931472, %v6497_v22  ;;  %v3504_v51 = vsub.f32 1.0, %v4829_v2 }
 0xbf4   :  { %v6501_v35 = vpop.eup %6500  ;;  %v3563_v43 = vmul.f32 %v6499_v10, %v3467_v47  ;;  %v3505_v10 = vsub.f32 1.0, %v4830_v21 }
 0xbf5   :  { %6514 = vtanh.f32 %v4095_v23  ;;  %v4096_v32 = vadd.f32 %v4014_v34, %v3653_v27  ;;  %v5542_v6 = vpop.f32.mrb[240].mxu1  ;;  %v6503_v41 = vpop.eup %6502  ;;  %v3609_v9 = vmul.f32 0.6931472, %v6501_v35  ;;  %v3654_v24 = vmul.f32 0.5, %v3607_v26 }
 0xbf6   :  { %6516 = vrcp.f32 %v3502_v20  ;;  %v5543_v58 = vpop.f32.mrb[241].mxu1  ;;  %v3564_v20 = vmul.f32 %v6503_v41, %v3468_v45  ;;  %v4831_v35 = vclamps-f32 %v8407_v48, 0.99999 }
 0xbf7   :  { %v6505_v52 = vpop.eup %6504  ;;  %6518 = vtanh.f32 %v4096_v32  ;;  %v5544_v62 = vadd.f32 %v5543_v58, %v5542_v6  ;;  %v5545_v28 = vpop.f32.mrb[242].mxu1  ;;  %v3655_v42 = vmul.f32 0.5, %v3609_v9  ;;  %v4832_v58 = vclamps-f32 %v8411_v50, 0.99999 }
 0xbf8   :  { %v6507_v3 = vpop.eup %6506  ;;  %6520 = vlog2.f32 %v3562_v46  ;;  %v5546_v0 = vpop.f32.mrb[243].mxu1  ;;  %v8587_v53 = vsel %vm4147_vm0, %v6505_v52, -1e+30  ;;  %v3470_v9 = vadd.f32 1.0, %v4827_v54 }
 0xbf9   :  { %v6509_v37 = vpop.eup %6508  ;;  %6522 = vrcp.f32 %v3503_v63  ;;  %v4019_v25 = vadd.f32 %v5544_v62, %v8429_v11  ;;  %v5547_v44 = vadd.f32 %v5546_v0, %v5545_v28  ;;  %4204 = vmax.xlane.f32.xlu0 %v8587_v53  ;;  %v3611_v55 = vmul.f32 0.6931472, %v6507_v3 }
 0xbfa   :  { %6524 = vlog2.f32 %v3563_v43  ;;  %v8597_v17 = vsel %vm4147_vm0, %v6509_v37, -1e+30  ;;  %v6511_v60 = vpop.eup %6510  ;;  %v3506_v3 = vsub.f32 1.0, %v4831_v35  ;;  %v3507_v54 = vsub.f32 1.0, %v4832_v58 }
 0xbfb   :  { %v4097_v1 = vadd.f32 %v4019_v25, %v3654_v24  ;;  %v4022_v22 = vadd.f32 %v5547_v44, %v8429_v11  ;;  %4206 = vmax.xlane.f32.xlu1 %v8597_v17  ;;  %v6513_v16 = vpop.eup %6512  ;;  %v3565_v34 = vmul.f32 %v6511_v60, %v3469_v15  ;;  %v3656_v7 = vmul.f32 0.5, %v3611_v55 }
 0xbfc   :  { %v3613_v6 = vmul.f32 0.6931472, %v6513_v16  ;;  %v4833_v16 = vclamps-f32 %v8405_v39, 0.99999 }
 0xbfd   :  { %6526 = vtanh.f32 %v4097_v1  ;;  %v4098_v23 = vadd.f32 %v4022_v22, %v3655_v42  ;;  %v5548_v27 = vpop.f32.mrb[244].mxu1 }
 0xbfe   :  { %6528 = vrcp.f32 %v3504_v51  ;;  %v5549_v46 = vpop.f32.mrb[245].mxu1  ;;  %v3657_v25 = vmul.f32 0.5, %v3613_v6 }
 0xbff   :  { %v6515_v47 = vpop.eup %6514  ;;  %6530 = vtanh.f32 %v4098_v23  ;;  %v5550_v63 = vadd.f32 %v5549_v46, %v5548_v27  ;;  %v5551_v32 = vpop.f32.mrb[246].mxu1 }
 0xc00   :  { %v6517_v26 = vpop.eup %6516  ;;  %6532 = vlog2.f32 %v3564_v20  ;;  %v5552_v8 = vpop.f32.mrb[247].mxu1  ;;  %v8608_v41 = vsel %vm4147_vm0, %v6515_v47, -1e+30 }
 0xc01   :  { %v6519_v43 = vpop.eup %6518  ;;  %6534 = vrcp.f32 %v3505_v10  ;;  %v4027_v52 = vadd.f32 %v5550_v63, %v8429_v11  ;;  %v5553_v62 = vadd.f32 %v5552_v8, %v5551_v32  ;;  %4208 = vmax.xlane.f32.xlu0 %v8608_v41  ;;  %v3566_v51 = vmul.f32 %v6517_v26, %v3470_v9 }
 0xc02   :  { %v6521_v28 = vpop.eup %6520  ;;  %6536 = vlog2.f32 %v3565_v34  ;;  %v8619_v0 = vsel %vm4147_vm0, %v6519_v43, -1e+30  ;;  %v3472_v26 = vadd.f32 1.0, %v4829_v2  ;;  %v3509_v2 = vsub.f32 1.0, %v4834_v5 }
 0xc03   :  { %v6523_v37 = vpop.eup %6522  ;;  %v4099_v24 = vadd.f32 %v4027_v52, %v3656_v7  ;;  %v4030_v44 = vadd.f32 %v5553_v62, %v8429_v11  ;;  %4210 = vmax.xlane.f32.xlu1 %v8619_v0  ;;  %v3615_v42 = vmul.f32 0.6931472, %v6521_v28  ;;  %v3508_v7 = vsub.f32 1.0, %v4833_v16 }
 0xc04   :  { %v6525_v45 = vpop.eup %6524  ;;  %v3567_v22 = vmul.f32 %v6523_v37, %v3471_v19 }
 0xc05   :  { %6538 = vtanh.f32 %v4099_v24  ;;  %v4100_v60 = vadd.f32 %v4030_v44, %v3657_v25  ;;  %v5554_v1 = vpop.f32.mrb[248].mxu1  ;;  %v3617_v23 = vmul.f32 0.6931472, %v6525_v45  ;;  %v3658_v47 = vmul.f32 0.5, %v3615_v42 }
 0xc06   :  { %6540 = vrcp.f32 %v3506_v3  ;;  %v5555_v20 = vpop.f32.mrb[249].mxu1 }
 0xc07   :  { %v6527_v15 = vpop.eup %6526  ;;  %6542 = vtanh.f32 %v4100_v60  ;;  %v5556_v55 = vadd.f32 %v5555_v20, %v5554_v1  ;;  %v5557_v10 = vpop.f32.mrb[250].mxu1  ;;  %v3659_v62 = vmul.f32 0.5, %v3617_v23 }
 0xc08   :  { %v6529_v27 = vpop.eup %6528  ;;  %6544 = vlog2.f32 %v3566_v51  ;;  %v5558_v12 = vpop.f32.mrb[251].mxu1  ;;  %v8631_v34 = vsel %vm4147_vm0, %v6527_v15, -1e+30 }
 0xc09   :  { %v6531_v46 = vpop.eup %6530  ;;  %6546 = vrcp.f32 %v3507_v54  ;;  %v4035_v63 = vadd.f32 %v5556_v55, %v8429_v11  ;;  %v5559_v32 = vadd.f32 %v5558_v12, %v5557_v10  ;;  %4212 = vmax.xlane.f32.xlu0 %v8631_v34  ;;  %v3568_v3 = vmul.f32 %v6529_v27, %v3472_v26 }
 0xc0a   :  { %v6533_v6 = vpop.eup %6532  ;;  %6548 = vlog2.f32 %v3567_v22  ;;  %v8641_v8 = vsel %vm4147_vm0, %v6531_v46, -1e+30  ;;  %v3474_v10 = vadd.f32 1.0, %v4831_v35 }
 0xc0b   :  { %v6535_v43 = vpop.eup %6534  ;;  %v4101_v52 = vadd.f32 %v4035_v63, %v3658_v47  ;;  %v4038_v28 = vadd.f32 %v5559_v32, %v8429_v11  ;;  %4214 = vmax.xlane.f32.xlu1 %v8641_v8  ;;  %v3619_v25 = vmul.f32 0.6931472, %v6533_v6  ;;  %v3475_v6 = vadd.f32 1.0, %v4832_v58 }
 0xc0c   :  { %v6537_v9 = vpop.eup %6536  ;;  %v3569_v44 = vmul.f32 %v6535_v43, %v3473_v36 }
 0xc0d   :  { %6550 = vtanh.f32 %v4101_v52  ;;  %v4102_v37 = vadd.f32 %v4038_v28, %v3659_v62  ;;  %v5560_v24 = vpop.f32.mrb[252].mxu1  ;;  %v3621_v60 = vmul.f32 0.6931472, %v6537_v9  ;;  %v3660_v22 = vmul.f32 0.5, %v3619_v25 }
 0xc0e   :  { %6552 = vrcp.f32 %v3508_v7  ;;  %v5561_v45 = vpop.f32.mrb[253].mxu1 }
 0xc0f   :  { %v6539_v51 = vpop.eup %6538  ;;  %6554 = vtanh.f32 %v4102_v37  ;;  %v5562_v19 = vadd.f32 %v5561_v45, %v5560_v24  ;;  %v5563_v54 = vpop.f32.mrb[254].mxu1  ;;  %v3661_v46 = vmul.f32 0.5, %v3621_v60 }
 0xc10   :  { %v6541_v1 = vpop.eup %6540  ;;  %6556 = vlog2.f32 %v3568_v3  ;;  %v5564_v42 = vpop.f32.mrb[255].mxu1  ;;  %v8651_v57 = vsel %vm4147_vm0, %v6539_v51, -1e+30 }
 0xc11   :  { %v6543_v21 = vpop.eup %6542  ;;  %6558 = vrcp.f32 %v3509_v2  ;;  %v4043_v20 = vadd.f32 %v5562_v19, %v8429_v11  ;;  %v5565_v15 = vadd.f32 %v5564_v42, %v5563_v54  ;;  %4216 = vmax.xlane.f32.xlu0 %v8651_v57  ;;  %v3570_v32 = vmul.f32 %v6541_v1, %v3474_v10 }
 0xc12   :  { %v6545_v55 = vpop.eup %6544  ;;  %6560 = vlog2.f32 %v3569_v44  ;;  %v8659_v23 = vsel %vm4147_vm0, %v6543_v21, -1e+30  ;;  %v3476_v44 = vadd.f32 1.0, %v4833_v16  ;;  %v3477_v21 = vadd.f32 1.0, %v4834_v5 }
 0xc13   :  { %v6547_v27 = vpop.eup %6546  ;;  %v4103_v12 = vadd.f32 %v4043_v20, %v3660_v22  ;;  %v4046_v47 = vadd.f32 %v5565_v15, %v8429_v11  ;;  %4218 = vmax.xlane.f32.xlu1 %v8659_v23  ;;  %v3623_v35 = vmul.f32 0.6931472, %v6545_v55 }
 0xc14   :  { %v6549_v63 = vpop.eup %6548  ;;  %v3571_v7 = vmul.f32 %v6547_v27, %v3475_v6 }
 0xc15   :  { %6562 = vtanh.f32 %v4103_v12  ;;  %v4104_v26 = vadd.f32 %v4046_v47, %v3661_v46  ;;  %v5566_v48 = vpop.f32.mrb[0].mxu1  ;;  %v3625_v9 = vmul.f32 0.6931472, %v6549_v63  ;;  %v3662_v58 = vmul.f32 0.5, %v3623_v35 }
 0xc16   :  { %v5567_v43 = vpop.f32.mrb[1].mxu1 }
 0xc17   :  { %v6551_v52 = vpop.eup %6550  ;;  %6564 = vtanh.f32 %v4104_v26  ;;  %v5568_v62 = vadd.f32 %v5567_v43, %v5566_v48  ;;  %v5569_v28 = vpop.f32.mrb[2].mxu1  ;;  %v3663_v54 = vmul.f32 0.5, %v3625_v9 }
 0xc18   :  { %v6553_v3 = vpop.eup %6552  ;;  %6566 = vlog2.f32 %v3570_v32  ;;  %v5570_v36 = vpop.f32.mrb[3].mxu1  ;;  %v8667_v2 = vsel %vm4147_vm0, %v6551_v52, -1e+30 }
 0xc19   :  { %v6555_v50 = vpop.eup %6554  ;;  %v4051_v37 = vadd.f32 %v5568_v62, %v8429_v11  ;;  %v5571_v24 = vadd.f32 %v5570_v36, %v5569_v28  ;;  %4220 = vmax.xlane.f32.xlu0 %v8667_v2  ;;  %6568 = vlog2.f32 %v3571_v7  ;;  %v3572_v42 = vmul.f32 %v6553_v3, %v3476_v44 }
 0xc1a   :  { %v6557_v25 = vpop.eup %6556  ;;  %v8675_v45 = vsel %vm4147_vm0, %v6555_v50, -1e+30 }
 0xc1b   :  { %v6559_v51 = vpop.eup %6558  ;;  %v4105_v19 = vadd.f32 %v4051_v37, %v3662_v58  ;;  %v4054_v60 = vadd.f32 %v5571_v24, %v8429_v11  ;;  %4222 = vmax.xlane.f32.xlu1 %v8675_v45  ;;  %v3627_v22 = vmul.f32 0.6931472, %v6557_v25 }
 0xc1c   :  { %v6561_v1 = vpop.eup %6560  ;;  %v3573_v20 = vmul.f32 %v6559_v51, %v3477_v21  ;;  %v6782_v21 = vld [vmem:[%s8998_s5 + $0x4] ss:$0 sm:$0xff] }
 0xc1d   :  { %6570 = vtanh.f32 %v4105_v19  ;;  %v4106_v39 = vadd.f32 %v4054_v60, %v3663_v54  ;;  %v5572_v16 = vpop.f32.mrb[4].mxu1  ;;  %v3629_v12 = vmul.f32 0.6931472, %v6561_v1  ;;  %v3664_v33 = vmul.f32 0.5, %v3627_v22 }
 0xc1e   :  { %v5573_v15 = vpop.f32.mrb[5].mxu1 }
 0xc1f   :  { %v6563_v55 = vpop.eup %6562  ;;  %6572 = vtanh.f32 %v4106_v39  ;;  %v5574_v10 = vadd.f32 %v5573_v15, %v5572_v16  ;;  %v5575_v27 = vpop.f32.mrb[6].mxu1  ;;  %v3665_v35 = vmul.f32 0.5, %v3629_v12 }
 0xc20   :  { %6574 = vlog2.f32 %v3572_v42  ;;  %v5576_v46 = vpop.f32.mrb[7].mxu1  ;;  %v8683_v47 = vsel %vm4147_vm0, %v6563_v55, -1e+30 }
 0xc21   :  { %v6565_v63 = vpop.eup %6564  ;;  %v4059_v5 = vadd.f32 %v5574_v10, %v8429_v11  ;;  %v5577_v32 = vadd.f32 %v5576_v46, %v5575_v27  ;;  %4224 = vmax.xlane.f32.xlu0 %v8683_v47  ;;  %6576 = vlog2.f32 %v3573_v20 }
 0xc22   :  { %v6567_v6 = vpop.eup %6566  ;;  %v8689_v26 = vsel %vm4147_vm0, %v6565_v63, -1e+30 }
 0xc23   :  { %v4107_v48 = vadd.f32 %v4059_v5, %v3664_v33  ;;  %v4062_v7 = vadd.f32 %v5577_v32, %v8429_v11  ;;  %4226 = vmax.xlane.f32.xlu1 %v8689_v26  ;;  %v6569_v43 = vpop.eup %6568  ;;  %v3631_v28 = vmul.f32 0.6931472, %v6567_v6 }
 0xc24   :  { %v3633_v58 = vmul.f32 0.6931472, %v6569_v43 }
 0xc25   :  { %6578 = vtanh.f32 %v4107_v48  ;;  %v4108_v52 = vadd.f32 %v4062_v7, %v3665_v35  ;;  %v5578_v62 = vpop.f32.mrb[8].mxu1  ;;  %v3666_v44 = vmul.f32 0.5, %v3631_v28 }
 0xc26   :  { %v5579_v9 = vpop.f32.mrb[9].mxu1  ;;  %v3667_v42 = vmul.f32 0.5, %v3633_v58 }
 0xc27   :  { %v6571_v3 = vpop.eup %6570  ;;  %6580 = vtanh.f32 %v4108_v52  ;;  %v5580_v36 = vadd.f32 %v5579_v9, %v5578_v62  ;;  %v5581_v50 = vpop.f32.mrb[10].mxu1 }
 0xc28   :  { %v5582_v37 = vpop.f32.mrb[11].mxu1  ;;  %v8695_v24 = vsel %vm4147_vm0, %v6571_v3, -1e+30 }
 0xc29   :  { %v6573_v25 = vpop.eup %6572  ;;  %v4067_v51 = vadd.f32 %v5580_v36, %v8429_v11  ;;  %v5583_v19 = vadd.f32 %v5582_v37, %v5581_v50  ;;  %4228 = vmax.xlane.f32.xlu0 %v8695_v24 }
 0xc2a   :  { %v6575_v54 = vpop.eup %6574  ;;  %v8701_v60 = vsel %vm4147_vm0, %v6573_v25, -1e+30 }
 0xc2b   :  { %v4109_v1 = vadd.f32 %v4067_v51, %v3666_v44  ;;  %v4070_v39 = vadd.f32 %v6782_v21, %v5583_v19  ;;  %4230 = vmax.xlane.f32.xlu1 %v8701_v60  ;;  %v6577_v16 = vpop.eup %6576  ;;  %v3635_v20 = vmul.f32 0.6931472, %v6575_v54 }
 0xc2c   :  { %v3637_v12 = vmul.f32 0.6931472, %v6577_v16 }
 0xc2d   :  { %6582 = vtanh.f32 %v4109_v1  ;;  %v4110_v11 = vadd.f32 %v4070_v39, %v3667_v42  ;;  %v5584_v22 = vpop.f32.mrb[12].mxu1  ;;  %v3668_v5 = vmul.f32 0.5, %v3635_v20 }
 0xc2e   :  { %v5585_v15 = vpop.f32.mrb[13].mxu1  ;;  %v3669_v7 = vmul.f32 0.5, %v3637_v12 }
 0xc2f   :  { %v6579_v55 = vpop.eup %6578  ;;  %6584 = vtanh.f32 %v4110_v11  ;;  %v5586_v10 = vadd.f32 %v5585_v15, %v5584_v22  ;;  %v5587_v27 = vpop.f32.mrb[14].mxu1 }
 0xc30   :  { %v5588_v46 = vpop.f32.mrb[15].mxu1  ;;  %v8709_v63 = vsel %vm4147_vm0, %v6579_v55, -1e+30 }
 0xc31   :  { %v6581_v33 = vpop.eup %6580  ;;  %v4075_v32 = vadd.f32 %v6782_v21, %v5586_v10  ;;  %v5589_v6 = vadd.f32 %v5588_v46, %v5587_v27  ;;  %4232 = vmax.xlane.f32.xlu0 %v8709_v63 }
 0xc32   :  { %v8714_v48 = vsel %vm4147_vm0, %v6581_v33, -1e+30 }
 0xc33   :  { %v4111_v35 = vadd.f32 %v4075_v32, %v3668_v5  ;;  %v4078_v43 = vadd.f32 %v6782_v21, %v5589_v6  ;;  %4234 = vmax.xlane.f32.xlu1 %v8714_v48 }
 0xc35   :  { %6586 = vtanh.f32 %v4111_v35  ;;  %v4112_v52 = vadd.f32 %v4078_v43, %v3669_v7 }
 0xc37   :  { %v6583_v62 = vpop.eup %6582  ;;  %6588 = vtanh.f32 %v4112_v52 }
 0xc38   :  { %v8719_v28 = vsel %vm4147_vm0, %v6583_v62, -1e+30 }
 0xc39   :  { %v6585_v9 = vpop.eup %6584  ;;  %4236 = vmax.xlane.f32.xlu0 %v8719_v28 }
 0xc3a   :  { %v8724_v3 = vsel %vm4147_vm0, %v6585_v9, -1e+30 }
 0xc3b   :  { %4238 = vmax.xlane.f32.xlu1 %v8724_v3 }
 0xc3f   :  { %v6587_v36 = vpop.eup %6586 }
 0xc40   :  { %v8729_v50 = vsel %vm4147_vm0, %v6587_v36, -1e+30 }
 0xc41   :  { %v6589_v58 = vpop.eup %6588  ;;  %4240 = vmax.xlane.f32.xlu0 %v8729_v50 }
 0xc42   :  { %v8734_v37 = vsel %vm4147_vm0, %v6589_v58, -1e+30 }
 0xc43   :  { %4242 = vmax.xlane.f32.xlu1 %v8734_v37 }
 0xc56   :  { %v4181_v25 = vpop.xlane.xlu0 %4180 }
 0xc57   :  { %v8738_v44 = vsub.f32 %v8458_v61, %v4181_v25 }
 0xc59   :  { %v4276_v51 = vmul.f32 1.442695, %v8738_v44 }
 0xc5a   :  { %v4183_v19 = vpop.xlane.xlu0 %4182 }
 0xc5b   :  { %6590 = vpow2.f32 %v4276_v51  ;;  %v8742_v54 = vsub.f32 %v8468_v49, %v4183_v19 }
 0xc5d   :  { %v4278_v1 = vmul.f32 1.442695, %v8742_v54 }
 0xc5e   :  { %v4185_v42 = vpop.xlane.xlu1 %4184 }
 0xc5f   :  { %6592 = vpow2.f32 %v4278_v1  ;;  %v8746_v18 = vsub.f32 %v8476_v4, %v4185_v42 }
 0xc61   :  { %v4280_v21 = vmul.f32 1.442695, %v8746_v18 }
 0xc62   :  { %v4187_v39 = vpop.xlane.xlu1 %4186 }
 0xc63   :  { %6594 = vpow2.f32 %v4280_v21  ;;  %v8750_v61 = vsub.f32 %v8491_v31, %v4187_v39 }
 0xc65   :  { %v6591_v16 = vpop.eup %6590  ;;  %v4282_v11 = vmul.f32 1.442695, %v8750_v61 }
 0xc66   :  { %4340 = vadd.xlane.f32.xlu0 %v6591_v16  ;;  %v4189_v49 = vpop.xlane.xlu0 %4188 }
 0xc67   :  { %6596 = vpow2.f32 %v4282_v11  ;;  %v8754_v22 = vsub.f32 %v8502_v40, %v4189_v49 }
 0xc68   :  { %v4191_v20 = vpop.xlane.xlu1 %4190 }
 0xc69   :  { %v6593_v15 = vpop.eup %6592  ;;  %v4284_v4 = vmul.f32 1.442695, %v8754_v22  ;;  %v8758_v55 = vsub.f32 %v8509_v14, %v4191_v20 }
 0xc6a   :  { %4342 = vadd.xlane.f32.xlu1 %v6593_v15 }
 0xc6b   :  { %6598 = vpow2.f32 %v4284_v4  ;;  %v4286_v31 = vmul.f32 1.442695, %v8758_v55 }
 0xc6d   :  { %v6595_v10 = vpop.eup %6594  ;;  %6600 = vpow2.f32 %v4286_v31 }
 0xc6e   :  { %4344 = vadd.xlane.f32.xlu0 %v6595_v10  ;;  %v4193_v27 = vpop.xlane.xlu0 %4192 }
 0xc6f   :  { %v8762_v12 = vsub.f32 %v8520_v30, %v4193_v27 }
 0xc70   :  { %v4195_v40 = vpop.xlane.xlu1 %4194 }
 0xc71   :  { %v6597_v46 = vpop.eup %6596  ;;  %v4288_v33 = vmul.f32 1.442695, %v8762_v12  ;;  %v8766_v5 = vsub.f32 %v8531_v13, %v4195_v40 }
 0xc72   :  { %4346 = vadd.xlane.f32.xlu1 %v6597_v46 }
 0xc73   :  { %6602 = vpow2.f32 %v4288_v33  ;;  %v4290_v14 = vmul.f32 1.442695, %v8766_v5 }
 0xc75   :  { %v6599_v32 = vpop.eup %6598  ;;  %6604 = vpow2.f32 %v4290_v14 }
 0xc76   :  { %4348 = vadd.xlane.f32.xlu0 %v6599_v32  ;;  %v4197_v6 = vpop.xlane.xlu0 %4196 }
 0xc77   :  { %v6601_v35 = vpop.eup %6600  ;;  %v8770_v7 = vsub.f32 %v8547_v56, %v4197_v6 }
 0xc78   :  { %v4199_v30 = vpop.xlane.xlu1 %4198  ;;  %4350 = vadd.xlane.f32.xlu1 %v6601_v35 }
 0xc79   :  { %v4292_v43 = vmul.f32 1.442695, %v8770_v7  ;;  %v8774_v52 = vsub.f32 %v8553_v38, %v4199_v30 }
 0xc7b   :  { %6606 = vpow2.f32 %v4292_v43  ;;  %v4294_v13 = vmul.f32 1.442695, %v8774_v52 }
 0xc7d   :  { %v6603_v62 = vpop.eup %6602  ;;  %6608 = vpow2.f32 %v4294_v13 }
 0xc7e   :  { %4352 = vadd.xlane.f32.xlu0 %v6603_v62  ;;  %v4201_v9 = vpop.xlane.xlu0 %4200 }
 0xc7f   :  { %v6605_v36 = vpop.eup %6604  ;;  %v8778_v58 = vsub.f32 %v8564_v29, %v4201_v9 }
 0xc80   :  { %v4203_v56 = vpop.xlane.xlu1 %4202  ;;  %4354 = vadd.xlane.f32.xlu1 %v6605_v36 }
 0xc81   :  { %v4296_v25 = vmul.f32 1.442695, %v8778_v58  ;;  %v8782_v51 = vsub.f32 %v8575_v59, %v4203_v56 }
 0xc83   :  { %6610 = vpow2.f32 %v4296_v25  ;;  %v4298_v38 = vmul.f32 1.442695, %v8782_v51 }
 0xc85   :  { %v6607_v19 = vpop.eup %6606  ;;  %6612 = vpow2.f32 %v4298_v38 }
 0xc86   :  { %4356 = vadd.xlane.f32.xlu0 %v6607_v19  ;;  %v4205_v1 = vpop.xlane.xlu0 %4204 }
 0xc87   :  { %v6609_v42 = vpop.eup %6608  ;;  %v8786_v21 = vsub.f32 %v8587_v53, %v4205_v1 }
 0xc88   :  { %v4207_v29 = vpop.xlane.xlu1 %4206  ;;  %4358 = vadd.xlane.f32.xlu1 %v6609_v42 }
 0xc89   :  { %v4300_v39 = vmul.f32 1.442695, %v8786_v21  ;;  %v8790_v16 = vsub.f32 %v8597_v17, %v4207_v29 }
 0xc8b   :  { %6614 = vpow2.f32 %v4300_v39  ;;  %v4302_v59 = vmul.f32 1.442695, %v8790_v16 }
 0xc8d   :  { %v6611_v11 = vpop.eup %6610  ;;  %6616 = vpow2.f32 %v4302_v59 }
 0xc8e   :  { %4360 = vadd.xlane.f32.xlu0 %v6611_v11  ;;  %v4209_v49 = vpop.xlane.xlu0 %4208 }
 0xc8f   :  { %v6613_v20 = vpop.eup %6612  ;;  %v8794_v15 = vsub.f32 %v8608_v41, %v4209_v49 }
 0xc90   :  { %v4211_v53 = vpop.xlane.xlu1 %4210  ;;  %4362 = vadd.xlane.f32.xlu1 %v6613_v20 }
 0xc91   :  { %v4304_v4 = vmul.f32 1.442695, %v8794_v15  ;;  %v8798_v31 = vsub.f32 %v8619_v0, %v4211_v53 }
 0xc93   :  { %6618 = vpow2.f32 %v4304_v4  ;;  %v4306_v17 = vmul.f32 1.442695, %v8798_v31 }
 0xc95   :  { %v6615_v10 = vpop.eup %6614  ;;  %6620 = vpow2.f32 %v4306_v17 }
 0xc96   :  { %4364 = vadd.xlane.f32.xlu0 %v6615_v10  ;;  %v4213_v27 = vpop.xlane.xlu0 %4212 }
 0xc97   :  { %v6617_v40 = vpop.eup %6616  ;;  %v8802_v46 = vsub.f32 %v8631_v34, %v4213_v27 }
 0xc98   :  { %v4215_v41 = vpop.xlane.xlu1 %4214  ;;  %4366 = vadd.xlane.f32.xlu1 %v6617_v40 }
 0xc99   :  { %v4308_v33 = vmul.f32 1.442695, %v8802_v46  ;;  %v8806_v14 = vsub.f32 %v8641_v8, %v4215_v41 }
 0xc9b   :  { %6622 = vpow2.f32 %v4308_v33  ;;  %v4310_v0 = vmul.f32 1.442695, %v8806_v14 }
 0xc9d   :  { %v6619_v32 = vpop.eup %6618  ;;  %6624 = vpow2.f32 %v4310_v0 }
 0xc9e   :  { %4368 = vadd.xlane.f32.xlu0 %v6619_v32  ;;  %v4217_v6 = vpop.xlane.xlu0 %4216 }
 0xc9f   :  { %v6621_v35 = vpop.eup %6620  ;;  %v8810_v30 = vsub.f32 %v8651_v57, %v4217_v6 }
 0xca0   :  { %v4219_v34 = vpop.xlane.xlu1 %4218  ;;  %4370 = vadd.xlane.f32.xlu1 %v6621_v35 }
 0xca1   :  { %v4312_v43 = vmul.f32 1.442695, %v8810_v30  ;;  %v8814_v13 = vsub.f32 %v8659_v23, %v4219_v34 }
 0xca3   :  { %6626 = vpow2.f32 %v4312_v43  ;;  %v4314_v8 = vmul.f32 1.442695, %v8814_v13 }
 0xca5   :  { %v6623_v62 = vpop.eup %6622  ;;  %6628 = vpow2.f32 %v4314_v8 }
 0xca6   :  { %4372 = vadd.xlane.f32.xlu0 %v6623_v62  ;;  %v4221_v9 = vpop.xlane.xlu0 %4220 }
 0xca7   :  { %v6625_v36 = vpop.eup %6624  ;;  %v8818_v56 = vsub.f32 %v8667_v2, %v4221_v9 }
 0xca8   :  { %v4223_v57 = vpop.xlane.xlu1 %4222  ;;  %4374 = vadd.xlane.f32.xlu1 %v6625_v36 }
 0xca9   :  { %v4316_v25 = vmul.f32 1.442695, %v8818_v56  ;;  %v8822_v38 = vsub.f32 %v8675_v45, %v4223_v57 }
 0xcab   :  { %6630 = vpow2.f32 %v4316_v25  ;;  %v4318_v23 = vmul.f32 1.442695, %v8822_v38 }
 0xcad   :  { %v6627_v19 = vpop.eup %6626  ;;  %6632 = vpow2.f32 %v4318_v23 }
 0xcae   :  { %4376 = vadd.xlane.f32.xlu0 %v6627_v19  ;;  %v4225_v1 = vpop.xlane.xlu0 %4224 }
 0xcaf   :  { %v6629_v42 = vpop.eup %6628  ;;  %v8826_v29 = vsub.f32 %v8683_v47, %v4225_v1 }
 0xcb0   :  { %v4227_v2 = vpop.xlane.xlu1 %4226  ;;  %4378 = vadd.xlane.f32.xlu1 %v6629_v42 }
 0xcb1   :  { %v4320_v39 = vmul.f32 1.442695, %v8826_v29  ;;  %v8830_v59 = vsub.f32 %v8689_v26, %v4227_v2 }
 0xcb3   :  { %6634 = vpow2.f32 %v4320_v39  ;;  %v4322_v45 = vmul.f32 1.442695, %v8830_v59 }
 0xcb5   :  { %v6631_v11 = vpop.eup %6630  ;;  %6636 = vpow2.f32 %v4322_v45 }
 0xcb6   :  { %4380 = vadd.xlane.f32.xlu0 %v6631_v11  ;;  %v4229_v49 = vpop.xlane.xlu0 %4228 }
 0xcb7   :  { %v6633_v20 = vpop.eup %6632  ;;  %v8834_v53 = vsub.f32 %v8695_v24, %v4229_v49 }
 0xcb8   :  { %v4231_v47 = vpop.xlane.xlu1 %4230  ;;  %4382 = vadd.xlane.f32.xlu1 %v6633_v20 }
 0xcb9   :  { %v4324_v4 = vmul.f32 1.442695, %v8834_v53  ;;  %v8838_v17 = vsub.f32 %v8701_v60, %v4231_v47 }
 0xcbb   :  { %6638 = vpow2.f32 %v4324_v4  ;;  %v4326_v26 = vmul.f32 1.442695, %v8838_v17 }
 0xcbd   :  { %v6635_v10 = vpop.eup %6634  ;;  %6640 = vpow2.f32 %v4326_v26 }
 0xcbe   :  { %4384 = vadd.xlane.f32.xlu0 %v6635_v10  ;;  %v4233_v27 = vpop.xlane.xlu0 %4232 }
 0xcbf   :  { %v6637_v40 = vpop.eup %6636  ;;  %v8842_v41 = vsub.f32 %v8709_v63, %v4233_v27 }
 0xcc0   :  { %v4235_v24 = vpop.xlane.xlu1 %4234  ;;  %4386 = vadd.xlane.f32.xlu1 %v6637_v40 }
 0xcc1   :  { %v4328_v33 = vmul.f32 1.442695, %v8842_v41  ;;  %v8846_v0 = vsub.f32 %v8714_v48, %v4235_v24 }
 0xcc3   :  { %6642 = vpow2.f32 %v4328_v33  ;;  %v4330_v60 = vmul.f32 1.442695, %v8846_v0 }
 0xcc5   :  { %v6639_v32 = vpop.eup %6638  ;;  %6644 = vpow2.f32 %v4330_v60 }
 0xcc6   :  { %4388 = vadd.xlane.f32.xlu0 %v6639_v32  ;;  %v4237_v6 = vpop.xlane.xlu0 %4236 }
 0xcc7   :  { %v6641_v35 = vpop.eup %6640  ;;  %v8850_v34 = vsub.f32 %v8719_v28, %v4237_v6 }
 0xcc8   :  { %4390 = vadd.xlane.f32.xlu1 %v6641_v35  ;;  %v4239_v63 = vpop.xlane.xlu1 %4238 }
 0xcc9   :  { %v4332_v43 = vmul.f32 1.442695, %v8850_v34  ;;  %v8854_v8 = vsub.f32 %v8724_v3, %v4239_v63 }
 0xccb   :  { %6646 = vpow2.f32 %v4332_v43  ;;  %v4334_v48 = vmul.f32 1.442695, %v8854_v8 }
 0xccd   :  { %v6643_v62 = vpop.eup %6642  ;;  %6648 = vpow2.f32 %v4334_v48 }
 0xcce   :  { %4392 = vadd.xlane.f32.xlu0 %v6643_v62  ;;  %v4241_v9 = vpop.xlane.xlu0 %4240 }
 0xccf   :  { %v6645_v36 = vpop.eup %6644  ;;  %v8858_v57 = vsub.f32 %v8729_v50, %v4241_v9 }
 0xcd0   :  { %4394 = vadd.xlane.f32.xlu1 %v6645_v36  ;;  %v4243_v28 = vpop.xlane.xlu1 %4242 }
 0xcd1   :  { %v4336_v25 = vmul.f32 1.442695, %v8858_v57  ;;  %v8862_v23 = vsub.f32 %v8734_v37, %v4243_v28 }
 0xcd3   :  { %6650 = vpow2.f32 %v4336_v25  ;;  %v4338_v3 = vmul.f32 1.442695, %v8862_v23 }
 0xcd5   :  { %v6647_v19 = vpop.eup %6646  ;;  %6652 = vpow2.f32 %v4338_v3 }
 0xcd6   :  { %4396 = vadd.xlane.f32.xlu0 %v6647_v19 }
 0xcd7   :  { %v6649_v1 = vpop.eup %6648 }
 0xcd8   :  { %4398 = vadd.xlane.f32.xlu1 %v6649_v1 }
 0xcdd   :  { %v6651_v42 = vpop.eup %6650 }
 0xcde   :  { %4400 = vadd.xlane.f32.xlu0 %v6651_v42 }
 0xcdf   :  { %v6653_v2 = vpop.eup %6652 }
 0xce0   :  { %4402 = vadd.xlane.f32.xlu1 %v6653_v2 }
 0xcf3   :  { %v4341_v50 = vpop.xlane.xlu0 %4340 }
 0xcf4   :  { %6654 = vlog2.f32 %v4341_v50 }
 0xcf7   :  { %v4343_v39 = vpop.xlane.xlu1 %4342 }
 0xcf8   :  { %6656 = vlog2.f32 %v4343_v39 }
 0xcfb   :  { %v4345_v45 = vpop.xlane.xlu0 %4344 }
 0xcfc   :  { %6658 = vlog2.f32 %v4345_v45 }
 0xcfe   :  { %v6655_v37 = vpop.eup %6654 }
 0xcff   :  { %v4405_v11 = vmul.f32 0.6931472, %v6655_v37  ;;  %v4347_v49 = vpop.xlane.xlu1 %4346 }
 0xd00   :  { %6660 = vlog2.f32 %v4347_v49 }
 0xd01   :  { %v4468_v20 = vsub.f32 %v8738_v44, %v4405_v11 }
 0xd02   :  { %v6657_v47 = vpop.eup %6656 }
 0xd03   :  { %4500 = vst [vmem:[%s8999_s6] sm:$0xff] %v4468_v20  ;;  %v4407_v4 = vmul.f32 0.6931472, %v6657_v47  ;;  %v4349_v26 = vpop.xlane.xlu0 %4348 }
 0xd04   :  { %6662 = vlog2.f32 %v4349_v26 }
 0xd05   :  { %v4469_v10 = vsub.f32 %v8742_v54, %v4407_v4  ;;  %v4351_v27 = vpop.xlane.xlu1 %4350 }
 0xd06   :  { %v6659_v40 = vpop.eup %6658  ;;  %6664 = vlog2.f32 %v4351_v27 }
 0xd07   :  { %4501 = vst [vmem:[%s8999_s6 + $0x8] sm:$0xff] %v4469_v10  ;;  %v4409_v24 = vmul.f32 0.6931472, %v6659_v40 }
 0xd09   :  { %v4470_v44 = vsub.f32 %v8746_v18, %v4409_v24 }
 0xd0a   :  { %v6661_v33 = vpop.eup %6660 }
 0xd0b   :  { %4502 = vst [vmem:[%s8999_s6 + $0x10] sm:$0xff] %v4470_v44  ;;  %v4411_v60 = vmul.f32 0.6931472, %v6661_v33  ;;  %v4353_v32 = vpop.xlane.xlu0 %4352 }
 0xd0c   :  { %6666 = vlog2.f32 %v4353_v32 }
 0xd0d   :  { %v4471_v54 = vsub.f32 %v8750_v61, %v4411_v60  ;;  %v4355_v6 = vpop.xlane.xlu1 %4354 }
 0xd0e   :  { %v6663_v35 = vpop.eup %6662  ;;  %6668 = vlog2.f32 %v4355_v6 }
 0xd0f   :  { %4503 = vst [vmem:[%s8999_s6 + $0x18] sm:$0xff] %v4471_v54  ;;  %v4413_v63 = vmul.f32 0.6931472, %v6663_v35 }
 0xd10   :  { %v6665_v43 = vpop.eup %6664 }
 0xd11   :  { %v4472_v18 = vsub.f32 %v8754_v22, %v4413_v63  ;;  %v4415_v48 = vmul.f32 0.6931472, %v6665_v43 }
 0xd13   :  { %4504 = vst [vmem:[%s8999_s6 + $0x20] sm:$0xff] %v4472_v18  ;;  %v4473_v62 = vsub.f32 %v8758_v55, %v4415_v48  ;;  %v4357_v9 = vpop.xlane.xlu0 %4356 }
 0xd14   :  { %6670 = vlog2.f32 %v4357_v9 }
 0xd15   :  { %4505 = vst [vmem:[%s8999_s6 + $0x28] sm:$0xff] %v4473_v62  ;;  %v4359_v61 = vpop.xlane.xlu1 %4358 }
 0xd16   :  { %v6667_v36 = vpop.eup %6666  ;;  %6672 = vlog2.f32 %v4359_v61 }
 0xd17   :  { %v4417_v28 = vmul.f32 0.6931472, %v6667_v36 }
 0xd18   :  { %v6669_v25 = vpop.eup %6668 }
 0xd19   :  { %v4474_v22 = vsub.f32 %v8762_v12, %v4417_v28  ;;  %v4419_v3 = vmul.f32 0.6931472, %v6669_v25 }
 0xd1b   :  { %4506 = vst [vmem:[%s8999_s6 + $0x30] sm:$0xff] %v4474_v22  ;;  %v4475_v55 = vsub.f32 %v8766_v5, %v4419_v3  ;;  %v4361_v19 = vpop.xlane.xlu0 %4360 }
 0xd1c   :  { %6674 = vlog2.f32 %v4361_v19 }
 0xd1d   :  { %4507 = vst [vmem:[%s8999_s6 + $0x38] sm:$0xff] %v4475_v55  ;;  %v4363_v1 = vpop.xlane.xlu1 %4362 }
 0xd1e   :  { %v6671_v42 = vpop.eup %6670  ;;  %6676 = vlog2.f32 %v4363_v1 }
 0xd1f   :  { %v4421_v2 = vmul.f32 0.6931472, %v6671_v42 }
 0xd20   :  { %v6673_v50 = vpop.eup %6672 }
 0xd21   :  { %v4476_v12 = vsub.f32 %v8770_v7, %v4421_v2  ;;  %v4423_v39 = vmul.f32 0.6931472, %v6673_v50 }
 0xd23   :  { %4508 = vst [vmem:[%s8999_s6 + $0x40] sm:$0xff] %v4476_v12  ;;  %v4477_v5 = vsub.f32 %v8774_v52, %v4423_v39  ;;  %v4365_v45 = vpop.xlane.xlu0 %4364 }
 0xd24   :  { %6678 = vlog2.f32 %v4365_v45 }
 0xd25   :  { %4509 = vst [vmem:[%s8999_s6 + $0x48] sm:$0xff] %v4477_v5  ;;  %v4367_v37 = vpop.xlane.xlu1 %4366 }
 0xd26   :  { %v6675_v11 = vpop.eup %6674  ;;  %6680 = vlog2.f32 %v4367_v37 }
 0xd27   :  { %v4425_v49 = vmul.f32 0.6931472, %v6675_v11 }
 0xd28   :  { %v6677_v20 = vpop.eup %6676 }
 0xd29   :  { %v4478_v7 = vsub.f32 %v8778_v58, %v4425_v49  ;;  %v4427_v47 = vmul.f32 0.6931472, %v6677_v20 }
 0xd2b   :  { %4510 = vst [vmem:[%s8999_s6 + $0x50] sm:$0xff] %v4478_v7  ;;  %v4479_v52 = vsub.f32 %v8782_v51, %v4427_v47  ;;  %v4369_v4 = vpop.xlane.xlu0 %4368 }
 0xd2c   :  { %6682 = vlog2.f32 %v4369_v4 }
 0xd2d   :  { %4511 = vst [vmem:[%s8999_s6 + $0x58] sm:$0xff] %v4479_v52  ;;  %v4371_v26 = vpop.xlane.xlu1 %4370 }
 0xd2e   :  { %v6679_v10 = vpop.eup %6678  ;;  %6684 = vlog2.f32 %v4371_v26 }
 0xd2f   :  { %v4429_v27 = vmul.f32 0.6931472, %v6679_v10 }
 0xd30   :  { %v6681_v40 = vpop.eup %6680 }
 0xd31   :  { %v4480_v58 = vsub.f32 %v8786_v21, %v4429_v27  ;;  %v4431_v24 = vmul.f32 0.6931472, %v6681_v40 }
 0xd33   :  { %4512 = vst [vmem:[%s8999_s6 + $0x60] sm:$0xff] %v4480_v58  ;;  %v4481_v51 = vsub.f32 %v8790_v16, %v4431_v24  ;;  %v4373_v44 = vpop.xlane.xlu0 %4372 }
 0xd34   :  { %6686 = vlog2.f32 %v4373_v44 }
 0xd35   :  { %4513 = vst [vmem:[%s8999_s6 + $0x68] sm:$0xff] %v4481_v51  ;;  %v4375_v33 = vpop.xlane.xlu1 %4374 }
 0xd36   :  { %v6683_v60 = vpop.eup %6682  ;;  %6688 = vlog2.f32 %v4375_v33 }
 0xd37   :  { %v4433_v32 = vmul.f32 0.6931472, %v6683_v60 }
 0xd38   :  { %v6685_v54 = vpop.eup %6684 }
 0xd39   :  { %v4482_v21 = vsub.f32 %v8794_v15, %v4433_v32  ;;  %v4435_v6 = vmul.f32 0.6931472, %v6685_v54 }
 0xd3b   :  { %4514 = vst [vmem:[%s8999_s6 + $0x70] sm:$0xff] %v4482_v21  ;;  %v4483_v16 = vsub.f32 %v8798_v31, %v4435_v6  ;;  %v4377_v35 = vpop.xlane.xlu0 %4376 }
 0xd3c   :  { %6690 = vlog2.f32 %v4377_v35 }
 0xd3d   :  { %4515 = vst [vmem:[%s8999_s6 + $0x78] sm:$0xff] %v4483_v16  ;;  %v4379_v63 = vpop.xlane.xlu1 %4378 }
 0xd3e   :  { %v6687_v43 = vpop.eup %6686  ;;  %6692 = vlog2.f32 %v4379_v63 }
 0xd3f   :  { %v4437_v18 = vmul.f32 0.6931472, %v6687_v43 }
 0xd40   :  { %v6689_v48 = vpop.eup %6688 }
 0xd41   :  { %v4484_v15 = vsub.f32 %v8802_v46, %v4437_v18  ;;  %v4439_v62 = vmul.f32 0.6931472, %v6689_v48 }
 0xd43   :  { %4516 = vst [vmem:[%s8999_s6 + $0x80] sm:$0xff] %v4484_v15  ;;  %v4485_v31 = vsub.f32 %v8806_v14, %v4439_v62  ;;  %v4381_v9 = vpop.xlane.xlu0 %4380 }
 0xd44   :  { %6694 = vlog2.f32 %v4381_v9 }
 0xd45   :  { %4517 = vst [vmem:[%s8999_s6 + $0x88] sm:$0xff] %v4485_v31  ;;  %v4383_v61 = vpop.xlane.xlu1 %4382 }
 0xd46   :  { %v6691_v36 = vpop.eup %6690  ;;  %6696 = vlog2.f32 %v4383_v61 }
 0xd47   :  { %v4441_v28 = vmul.f32 0.6931472, %v6691_v36 }
 0xd48   :  { %v6693_v25 = vpop.eup %6692 }
 0xd49   :  { %v4486_v46 = vsub.f32 %v8810_v30, %v4441_v28  ;;  %v4443_v22 = vmul.f32 0.6931472, %v6693_v25 }
 0xd4b   :  { %4518 = vst [vmem:[%s8999_s6 + $0x90] sm:$0xff] %v4486_v46  ;;  %v4487_v14 = vsub.f32 %v8814_v13, %v4443_v22  ;;  %v4385_v3 = vpop.xlane.xlu0 %4384 }
 0xd4c   :  { %6698 = vlog2.f32 %v4385_v3 }
 0xd4d   :  { %4519 = vst [vmem:[%s8999_s6 + $0x98] sm:$0xff] %v4487_v14  ;;  %v4387_v55 = vpop.xlane.xlu1 %4386 }
 0xd4e   :  { %v6695_v19 = vpop.eup %6694  ;;  %6700 = vlog2.f32 %v4387_v55 }
 0xd4f   :  { %v4445_v1 = vmul.f32 0.6931472, %v6695_v19 }
 0xd50   :  { %v6697_v42 = vpop.eup %6696 }
 0xd51   :  { %v4488_v30 = vsub.f32 %v8818_v56, %v4445_v1  ;;  %v4447_v2 = vmul.f32 0.6931472, %v6697_v42 }
 0xd53   :  { %4520 = vst [vmem:[%s8999_s6 + $0xa0] sm:$0xff] %v4488_v30  ;;  %v4489_v13 = vsub.f32 %v8822_v38, %v4447_v2  ;;  %v4389_v50 = vpop.xlane.xlu0 %4388 }
 0xd54   :  { %6702 = vlog2.f32 %v4389_v50 }
 0xd55   :  { %4521 = vst [vmem:[%s8999_s6 + $0xa8] sm:$0xff] %v4489_v13  ;;  %v4391_v12 = vpop.xlane.xlu1 %4390 }
 0xd56   :  { %v6699_v39 = vpop.eup %6698  ;;  %6704 = vlog2.f32 %v4391_v12 }
 0xd57   :  { %v4449_v5 = vmul.f32 0.6931472, %v6699_v39 }
 0xd58   :  { %v6701_v45 = vpop.eup %6700 }
 0xd59   :  { %v4490_v56 = vsub.f32 %v8826_v29, %v4449_v5  ;;  %v4451_v37 = vmul.f32 0.6931472, %v6701_v45 }
 0xd5b   :  { %4522 = vst [vmem:[%s8999_s6 + $0xb0] sm:$0xff] %v4490_v56  ;;  %v4491_v38 = vsub.f32 %v8830_v59, %v4451_v37  ;;  %v4393_v11 = vpop.xlane.xlu0 %4392 }
 0xd5c   :  { %6706 = vlog2.f32 %v4393_v11 }
 0xd5d   :  { %4523 = vst [vmem:[%s8999_s6 + $0xb8] sm:$0xff] %v4491_v38  ;;  %v4395_v49 = vpop.xlane.xlu1 %4394 }
 0xd5e   :  { %v6703_v20 = vpop.eup %6702  ;;  %6708 = vlog2.f32 %v4395_v49 }
 0xd5f   :  { %v4453_v7 = vmul.f32 0.6931472, %v6703_v20 }
 0xd60   :  { %v6705_v47 = vpop.eup %6704 }
 0xd61   :  { %v4492_v29 = vsub.f32 %v8834_v53, %v4453_v7  ;;  %v4455_v52 = vmul.f32 0.6931472, %v6705_v47 }
 0xd63   :  { %4524 = vst [vmem:[%s8999_s6 + $0xc0] sm:$0xff] %v4492_v29  ;;  %v4493_v59 = vsub.f32 %v8838_v17, %v4455_v52  ;;  %v4397_v4 = vpop.xlane.xlu0 %4396 }
 0xd64   :  { %6710 = vlog2.f32 %v4397_v4 }
 0xd65   :  { %4525 = vst [vmem:[%s8999_s6 + $0xc8] sm:$0xff] %v4493_v59  ;;  %v4399_v26 = vpop.xlane.xlu1 %4398 }
 0xd66   :  { %v6707_v10 = vpop.eup %6706  ;;  %6712 = vlog2.f32 %v4399_v26 }
 0xd67   :  { %v4457_v27 = vmul.f32 0.6931472, %v6707_v10 }
 0xd68   :  { %v6709_v40 = vpop.eup %6708 }
 0xd69   :  { %v4494_v53 = vsub.f32 %v8842_v41, %v4457_v27  ;;  %v4459_v58 = vmul.f32 0.6931472, %v6709_v40 }
 0xd6b   :  { %4526 = vst [vmem:[%s8999_s6 + $0xd0] sm:$0xff] %v4494_v53  ;;  %v4495_v17 = vsub.f32 %v8846_v0, %v4459_v58  ;;  %v4401_v24 = vpop.xlane.xlu0 %4400 }
 0xd6c   :  { %6714 = vlog2.f32 %v4401_v24 }
 0xd6d   :  { %4527 = vst [vmem:[%s8999_s6 + $0xd8] sm:$0xff] %v4495_v17  ;;  %v4403_v51 = vpop.xlane.xlu1 %4402 }
 0xd6e   :  { %v6711_v44 = vpop.eup %6710  ;;  %6716 = vlog2.f32 %v4403_v51 }
 0xd6f   :  { %v4461_v33 = vmul.f32 0.6931472, %v6711_v44 }
 0xd70   :  { %v6713_v60 = vpop.eup %6712 }
 0xd71   :  { %v4496_v41 = vsub.f32 %v8850_v34, %v4461_v33  ;;  %v4463_v32 = vmul.f32 0.6931472, %v6713_v60 }
 0xd73   :  { %4528 = vst [vmem:[%s8999_s6 + $0xe0] sm:$0xff] %v4496_v41  ;;  %v4497_v0 = vsub.f32 %v8854_v8, %v4463_v32 }
 0xd75   :  { %4529 = vst [vmem:[%s8999_s6 + $0xe8] sm:$0xff] %v4497_v0 }
 0xd76   :  { %v6715_v54 = vpop.eup %6714 }
 0xd77   :  { %v4465_v21 = vmul.f32 0.6931472, %v6715_v54 }
 0xd78   :  { %v6717_v6 = vpop.eup %6716 }
 0xd79   :  { %v4498_v16 = vsub.f32 %v8858_v57, %v4465_v21  ;;  %v4467_v35 = vmul.f32 0.6931472, %v6717_v6 }
 0xd7b   :  { %4530 = vst [vmem:[%s8999_s6 + $0xf0] sm:$0xff] %v4498_v16  ;;  %v4499_v34 = vsub.f32 %v8862_v23, %v4467_v35 }
 0xd7d   :  { %4531 = vst [vmem:[%s8999_s6 + $0xf8] sm:$0xff] %v4499_v34 }
 0xd7e   :  { %4536 = vsyncmov [#allocation3] }
 0xd81   :  { %s4537_s21 = vpop.sfrf %4536 }
 0xd82   :  { %p4861_p0 = scmp.ne.s32.totalorder %s4537_s21, 0 }
 0xd84   :  { %4541 = shalt.err (%p4861_p0)  }

</bundles_post_ra>
